<compile_context>
chip_gen: v5e
topology: v5e:2x2
jax: 0.10.0
libtpu: 0.0.40
codegen_flags: <defaults>
</compile_context>

<pallas_src>
import numpy as np

import jax
import jax.numpy as jnp
from jax.experimental import pallas as pl
from jax.experimental.pallas import tpu as pltpu


# -----------------------------------------------------------------------------
# Static (trace-time) helpers
# -----------------------------------------------------------------------------
def _conv_out(n, k=3, stride=2, pad=1):
    return (n + 2 * pad - k) // stride + 1


def _round8(n):
    return ((n + 7) // 8) * 8


def _im2col_l1(x_nchw, h1, w1, s1_pad):
    """Layer-1 im2col in plain JAX (tiny): (B,3,H,W) -> (27, B*s1_pad).

    Row index = tap*3 + cin with tap = kh*3 + kw; column = b*s1_pad + oh*w1+ow.
    """
    B, C, H, W = x_nchw.shape
    x = jnp.transpose(x_nchw, (0, 2, 3, 1)).astype(jnp.float32)      # NHWC
    xp = jnp.pad(x, ((0, 0), (1, 1), (1, 1), (0, 0)))
    taps = []
    for kh in range(3):
        for kw in range(3):
            taps.append(xp[:, kh:kh + 2 * (h1 - 1) + 1:2,
                           kw:kw + 2 * (w1 - 1) + 1:2, :])           # (B,h1,w1,C)
    p = jnp.stack(taps, axis=3).reshape(B, h1 * w1, 9 * C)           # t*C + c
    if s1_pad != h1 * w1:
        p = jnp.pad(p, ((0, 0), (0, s1_pad - h1 * w1), (0, 0)))
    return jnp.transpose(p, (2, 0, 1)).reshape(9 * C, B * s1_pad)


def _flatten_weight(w_oihw):
    """(Cout, Cin, 3, 3) -> (Cout, 9*Cin) with column index tap*Cin + cin."""
    o, c, _, _ = w_oihw.shape
    return jnp.transpose(w_oihw, (0, 2, 3, 1)).reshape(o, 9 * c).astype(jnp.float32)


def _gather_cols(hin, win, sin_pad, hout, wout, sout_pad, batch):
    """Per-tap 0/1 column-gather matrices r[t]: (B*sin_pad, B*sout_pad).

    Right-multiplying a (C, B*sin_pad) activation by r[t] selects, for each
    valid output pixel, tap t's source pixel (stride 2, pad 1).  Conv zero
    padding and sublane/lane pad positions simply have no 1s, so garbage in
    pad columns never propagates.
    """
    r = np.zeros((9, batch * sin_pad, batch * sout_pad), np.float32)
    for kh in range(3):
        for kw in range(3):
            t = kh * 3 + kw
            for oh in range(hout):
                for ow in range(wout):
                    ih, iw = 2 * oh + kh - 1, 2 * ow + kw - 1
                    if 0 <= ih < hin and 0 <= iw < win:
                        for b in range(batch):
                            r[t, b * sin_pad + ih * win + iw,
                              b * sout_pad + oh * wout + ow] = 1.0
    return r


def _gather_pool_cols(hin, win, sin_pad, hout, wout, batch):
    """Layer-3 gather with AdaptiveAvgPool2d((1,1)) folded in: (9, B*sin_pad, B)."""
    n = hout * wout
    rp = np.zeros((9, batch * sin_pad, batch), np.float32)
    for kh in range(3):
        for kw in range(3):
            t = kh * 3 + kw
            for oh in range(hout):
                for ow in range(wout):
                    ih, iw = 2 * oh + kh - 1, 2 * ow + kw - 1
                    if 0 <= ih < hin and 0 <= iw < win:
                        for b in range(batch):
                            rp[t, b * sin_pad + ih * win + iw, b] += 1.0 / n
    return rp


# -----------------------------------------------------------------------------
# Fused encoder kernel (single invocation, no grid; whole batch at once)
# -----------------------------------------------------------------------------
def _encoder_kernel(p1t_ref, w1_ref, b1_ref, r2_ref, w2_ref, b2_ref,
                    rp3_ref, w3_ref, b3_ref, o_ref, pt2_ref, pt3_ref):
    c1 = w1_ref.shape[0]          # 64
    c2 = w2_ref.shape[0]          # 128

    # Layer 1: im2col was hoisted to the wrapper -> ONE matmul, K = 27.
    a1 = jnp.dot(w1_ref[...], p1t_ref[...], preferred_element_type=jnp.float32)
    a1 = jnp.maximum(a1 + b1_ref[...], 0.0)                      # (64, B*S1)

    # Layer 2 im2col: 9 independent column-gather matmuls into a VMEM scratch
    # (static, 8-aligned sublane offsets -> ref stores, no value spills),
    # then ONE conv matmul with K = 9*64 = 576.
    for t in range(9):
        pt2_ref[t * c1:(t + 1) * c1, :] = jnp.dot(
            a1, r2_ref[t], preferred_element_type=jnp.float32)
    a2 = jnp.dot(w2_ref[...], pt2_ref[...], preferred_element_type=jnp.float32)
    a2 = jnp.maximum(a2 + b2_ref[...], 0.0)                      # (128, B*S2)

    # Layer 3 + AdaptiveAvgPool fused: pooling is linear and conv3 has no
    # ReLU, so the per-tap gather matrices already carry the 1/(OH*OW)
    # averaging weights.  ONE conv matmul with K = 9*128 = 1152 -> (E, B).
    for t in range(9):
        pt3_ref[t * c2:(t + 1) * c2, :] = jnp.dot(
            a2, rp3_ref[t], preferred_element_type=jnp.float32)
    out = jnp.dot(w3_ref[...], pt3_ref[...], preferred_element_type=jnp.float32)
    o_ref[...] = (out + b3_ref[...]).astype(o_ref.dtype)         # (E, B)


# -----------------------------------------------------------------------------
# Wrapper
# -----------------------------------------------------------------------------
def encoder_forward(x_nchw, params):
    """x_nchw: (B, 3, H, W) float32 -> (B, 1, embed_dim)."""
    B, C, H, W = x_nchw.shape
    h1, w1 = _conv_out(H), _conv_out(W)
    h2, w2 = _conv_out(h1), _conv_out(w1)
    h3, w3 = _conv_out(h2), _conv_out(w2)
    s1, s2 = _round8(h1 * w1), _round8(h2 * w2)

    p1t = _im2col_l1(x_nchw, h1, w1, s1)                 # (27, B*s1)
    w1f = _flatten_weight(params["w1"])                  # (64, 27)
    w2f = _flatten_weight(params["w2"])                  # (128, 576)
    w3f = _flatten_weight(params["w3"])                  # (E, 1152)
    b1 = params["b1"].reshape(-1, 1).astype(jnp.float32)
    b2 = params["b2"].reshape(-1, 1).astype(jnp.float32)
    b3 = params["b3"].reshape(-1, 1).astype(jnp.float32)
    r2 = jnp.asarray(_gather_cols(h1, w1, s1, h2, w2, s2, B))      # (9,B*s1,B*s2)
    rp3 = jnp.asarray(_gather_pool_cols(h2, w2, s2, h3, w3, B))    # (9,B*s2,B)

    c1, c2 = w1f.shape[0], w2f.shape[0]
    embed = w3f.shape[0]

    vmem = lambda: pl.BlockSpec(memory_space=pltpu.MemorySpace.VMEM)
    out_eb = pl.pallas_call(
        _encoder_kernel,
        out_shape=jax.ShapeDtypeStruct((embed, B), jnp.float32),
        in_specs=[vmem() for _ in range(9)],
        out_specs=vmem(),
        scratch_shapes=[
            pltpu.VMEM((9 * c1, B * s2), jnp.float32),   # layer-2 patches
            pltpu.VMEM((9 * c2, B), jnp.float32),        # layer-3 pooled patches
        ],
    )(p1t, w1f, b1, r2, w2f, b2, rp3, w3f, b3)

    return jnp.transpose(out_eb)[:, None, :]             # (B, 1, embed)


# -----------------------------------------------------------------------------
# Pure-JAX reference (correctness sanity check)
# -----------------------------------------------------------------------------
def encoder_reference(x_nchw, params):
    x = jnp.transpose(x_nchw, (0, 2, 3, 1))
    dn = ("NHWC", "HWIO", "NHWC")

    def conv(x, w_oihw, b, relu):
        w = jnp.transpose(w_oihw, (2, 3, 1, 0))  # HWIO
        y = jax.lax.conv_general_dilated(
            x, w, window_strides=(2, 2), padding=((1, 1), (1, 1)),
            dimension_numbers=dn, precision=jax.lax.Precision.HIGHEST) + b
        return jnp.maximum(y, 0.0) if relu else y

    x = conv(x, params["w1"], params["b1"], True)
    x = conv(x, params["w2"], params["b2"], True)
    x = conv(x, params["w3"], params["b3"], False)
    pooled = jnp.mean(x, axis=(1, 2))
    return pooled[:, None, :]


# -----------------------------------------------------------------------------
# Main
# -----------------------------------------------------------------------------
if __name__ == "__main__":
    B, C, H, W = 2, 3, 16, 16
    embed_dim = 32

    key = jax.random.PRNGKey(0)
    kx, k1, k2, k3, kb1, kb2, kb3 = jax.random.split(key, 7)

    x = jax.random.normal(kx, (B, C, H, W), dtype=jnp.float32)
    params = {
        "w1": jax.random.normal(k1, (64, 3, 3, 3), dtype=jnp.float32) * 0.1,
        "b1": jax.random.normal(kb1, (64,), dtype=jnp.float32) * 0.1,
        "w2": jax.random.normal(k2, (128, 64, 3, 3), dtype=jnp.float32) * 0.05,
        "b2": jax.random.normal(kb2, (128,), dtype=jnp.float32) * 0.1,
        "w3": jax.random.normal(k3, (embed_dim, 128, 3, 3),
                                dtype=jnp.float32) * 0.05,
        "b3": jax.random.normal(kb3, (embed_dim,), dtype=jnp.float32) * 0.1,
    }

    out = jax.block_until_ready(jax.jit(encoder_forward)(x, params))
    ref = jax.block_until_ready(jax.jit(encoder_reference)(x, params))

    assert out.shape == (B, 1, embed_dim), out.shape
    assert jnp.allclose(out, ref, rtol=1e-4, atol=1e-4), \
        float(jnp.max(jnp.abs(out - ref)))

    print("KERNEL_OK")
</pallas_src>

<mosaic_0001>
module attributes {stable_mosaic.version = 11 : i64} {
  func.func @_encoder_kernel(%arg0: memref<27x128xf32, #tpu.memory_space<vmem>>, %arg1: memref<64x27xf32, #tpu.memory_space<vmem>>, %arg2: memref<64x1xf32, #tpu.memory_space<vmem>>, %arg3: memref<9x128x32xf32, #tpu.memory_space<vmem>>, %arg4: memref<128x576xf32, #tpu.memory_space<vmem>>, %arg5: memref<128x1xf32, #tpu.memory_space<vmem>>, %arg6: memref<9x32x2xf32, #tpu.memory_space<vmem>>, %arg7: memref<32x1152xf32, #tpu.memory_space<vmem>>, %arg8: memref<32x1xf32, #tpu.memory_space<vmem>>, %arg9: memref<32x2xf32, #tpu.memory_space<vmem>>, %arg10: memref<576x32xf32, #tpu.memory_space<vmem>>, %arg11: memref<1152x2xf32, #tpu.memory_space<vmem>>) attributes {dimension_semantics = [], scalar_prefetch = 0 : i64, scratch_operands = 2 : i64, tpu.core_type = #tpu.core_type<tc>} {
    %c0 = arith.constant 0 : index
    %c0_0 = arith.constant 0 : index
    %0 = vector.load %arg1[%c0, %c0_0] : memref<64x27xf32, #tpu.memory_space<vmem>>, vector<64x27xf32>
    %c0_1 = arith.constant 0 : index
    %c0_2 = arith.constant 0 : index
    %1 = vector.load %arg0[%c0_1, %c0_2] : memref<27x128xf32, #tpu.memory_space<vmem>>, vector<27x128xf32>
    %cst = arith.constant dense<0.000000e+00> : vector<64x128xf32>
    %2 = tpu.matmul %0, %1, %cst {dimension_numbers = #tpu.dot_dimension_numbers<[1], [0], [0], [1], [0, 0, 1, 1], [], []>} : vector<64x27xf32>, vector<27x128xf32>, vector<64x128xf32> -> vector<64x128xf32>
    %c0_3 = arith.constant 0 : index
    %c0_4 = arith.constant 0 : index
    %3 = vector.load %arg2[%c0_3, %c0_4] : memref<64x1xf32, #tpu.memory_space<vmem>>, vector<64x1xf32>
    %4 = vector.broadcast %3 : vector<64x1xf32> to vector<64x128xf32>
    %5 = arith.addf %2, %4 : vector<64x128xf32>
    %cst_5 = arith.constant 0.000000e+00 : f32
    %6 = vector.broadcast %cst_5 : f32 to vector<64x128xf32>
    %7 = arith.maximumf %5, %6 : vector<64x128xf32>
    %c0_6 = arith.constant 0 : index
    %c0_7 = arith.constant 0 : index
    %c0_8 = arith.constant 0 : index
    %8 = vector.load %arg3[%c0_6, %c0_7, %c0_8] : memref<9x128x32xf32, #tpu.memory_space<vmem>>, vector<1x128x32xf32>
    %9 = vector.shape_cast %8 : vector<1x128x32xf32> to vector<128x32xf32>
    %cst_9 = arith.constant dense<0.000000e+00> : vector<64x32xf32>
    %10 = tpu.matmul %7, %9, %cst_9 {dimension_numbers = #tpu.dot_dimension_numbers<[1], [0], [0], [1], [0, 0, 1, 1], [], []>} : vector<64x128xf32>, vector<128x32xf32>, vector<64x32xf32> -> vector<64x32xf32>
    %c0_10 = arith.constant 0 : index
    %c0_11 = arith.constant 0 : index
    %11 = vector.load %arg10[%c0_10, %c0_11] : memref<576x32xf32, #tpu.memory_space<vmem>>, vector<64x32xf32>
    tpu.vector_store %arg10[%c0_10, %c0_11], %10 {strides = array<i32>} : memref<576x32xf32, #tpu.memory_space<vmem>>, vector<64x32xf32>,
    %c1 = arith.constant 1 : index
    %c0_12 = arith.constant 0 : index
    %c0_13 = arith.constant 0 : index
    %12 = vector.load %arg3[%c1, %c0_12, %c0_13] : memref<9x128x32xf32, #tpu.memory_space<vmem>>, vector<1x128x32xf32>
    %13 = vector.shape_cast %12 : vector<1x128x32xf32> to vector<128x32xf32>
    %cst_14 = arith.constant dense<0.000000e+00> : vector<64x32xf32>
    %14 = tpu.matmul %7, %13, %cst_14 {dimension_numbers = #tpu.dot_dimension_numbers<[1], [0], [0], [1], [0, 0, 1, 1], [], []>} : vector<64x128xf32>, vector<128x32xf32>, vector<64x32xf32> -> vector<64x32xf32>
    %c64 = arith.constant 64 : index
    %c0_15 = arith.constant 0 : index
    %15 = vector.load %arg10[%c64, %c0_15] : memref<576x32xf32, #tpu.memory_space<vmem>>, vector<64x32xf32>
    tpu.vector_store %arg10[%c64, %c0_15], %14 {strides = array<i32>} : memref<576x32xf32, #tpu.memory_space<vmem>>, vector<64x32xf32>,
    %c2 = arith.constant 2 : index
    %c0_16 = arith.constant 0 : index
    %c0_17 = arith.constant 0 : index
    %16 = vector.load %arg3[%c2, %c0_16, %c0_17] : memref<9x128x32xf32, #tpu.memory_space<vmem>>, vector<1x128x32xf32>
    %17 = vector.shape_cast %16 : vector<1x128x32xf32> to vector<128x32xf32>
    %cst_18 = arith.constant dense<0.000000e+00> : vector<64x32xf32>
    %18 = tpu.matmul %7, %17, %cst_18 {dimension_numbers = #tpu.dot_dimension_numbers<[1], [0], [0], [1], [0, 0, 1, 1], [], []>} : vector<64x128xf32>, vector<128x32xf32>, vector<64x32xf32> -> vector<64x32xf32>
    %c128 = arith.constant 128 : index
    %c0_19 = arith.constant 0 : index
    %19 = vector.load %arg10[%c128, %c0_19] : memref<576x32xf32, #tpu.memory_space<vmem>>, vector<64x32xf32>
    tpu.vector_store %arg10[%c128, %c0_19], %18 {strides = array<i32>} : memref<576x32xf32, #tpu.memory_space<vmem>>, vector<64x32xf32>,
    %c3 = arith.constant 3 : index
    %c0_20 = arith.constant 0 : index
    %c0_21 = arith.constant 0 : index
    %20 = vector.load %arg3[%c3, %c0_20, %c0_21] : memref<9x128x32xf32, #tpu.memory_space<vmem>>, vector<1x128x32xf32>
    %21 = vector.shape_cast %20 : vector<1x128x32xf32> to vector<128x32xf32>
    %cst_22 = arith.constant dense<0.000000e+00> : vector<64x32xf32>
    %22 = tpu.matmul %7, %21, %cst_22 {dimension_numbers = #tpu.dot_dimension_numbers<[1], [0], [0], [1], [0, 0, 1, 1], [], []>} : vector<64x128xf32>, vector<128x32xf32>, vector<64x32xf32> -> vector<64x32xf32>
    %c192 = arith.constant 192 : index
    %c0_23 = arith.constant 0 : index
    %23 = vector.load %arg10[%c192, %c0_23] : memref<576x32xf32, #tpu.memory_space<vmem>>, vector<64x32xf32>
    tpu.vector_store %arg10[%c192, %c0_23], %22 {strides = array<i32>} : memref<576x32xf32, #tpu.memory_space<vmem>>, vector<64x32xf32>,
    %c4 = arith.constant 4 : index
    %c0_24 = arith.constant 0 : index
    %c0_25 = arith.constant 0 : index
    %24 = vector.load %arg3[%c4, %c0_24, %c0_25] : memref<9x128x32xf32, #tpu.memory_space<vmem>>, vector<1x128x32xf32>
    %25 = vector.shape_cast %24 : vector<1x128x32xf32> to vector<128x32xf32>
    %cst_26 = arith.constant dense<0.000000e+00> : vector<64x32xf32>
    %26 = tpu.matmul %7, %25, %cst_26 {dimension_numbers = #tpu.dot_dimension_numbers<[1], [0], [0], [1], [0, 0, 1, 1], [], []>} : vector<64x128xf32>, vector<128x32xf32>, vector<64x32xf32> -> vector<64x32xf32>
    %c256 = arith.constant 256 : index
    %c0_27 = arith.constant 0 : index
    %27 = vector.load %arg10[%c256, %c0_27] : memref<576x32xf32, #tpu.memory_space<vmem>>, vector<64x32xf32>
    tpu.vector_store %arg10[%c256, %c0_27], %26 {strides = array<i32>} : memref<576x32xf32, #tpu.memory_space<vmem>>, vector<64x32xf32>,
    %c5 = arith.constant 5 : index
    %c0_28 = arith.constant 0 : index
    %c0_29 = arith.constant 0 : index
    %28 = vector.load %arg3[%c5, %c0_28, %c0_29] : memref<9x128x32xf32, #tpu.memory_space<vmem>>, vector<1x128x32xf32>
    %29 = vector.shape_cast %28 : vector<1x128x32xf32> to vector<128x32xf32>
    %cst_30 = arith.constant dense<0.000000e+00> : vector<64x32xf32>
    %30 = tpu.matmul %7, %29, %cst_30 {dimension_numbers = #tpu.dot_dimension_numbers<[1], [0], [0], [1], [0, 0, 1, 1], [], []>} : vector<64x128xf32>, vector<128x32xf32>, vector<64x32xf32> -> vector<64x32xf32>
    %c320 = arith.constant 320 : index
    %c0_31 = arith.constant 0 : index
    %31 = vector.load %arg10[%c320, %c0_31] : memref<576x32xf32, #tpu.memory_space<vmem>>, vector<64x32xf32>
    tpu.vector_store %arg10[%c320, %c0_31], %30 {strides = array<i32>} : memref<576x32xf32, #tpu.memory_space<vmem>>, vector<64x32xf32>,
    %c6 = arith.constant 6 : index
    %c0_32 = arith.constant 0 : index
    %c0_33 = arith.constant 0 : index
    %32 = vector.load %arg3[%c6, %c0_32, %c0_33] : memref<9x128x32xf32, #tpu.memory_space<vmem>>, vector<1x128x32xf32>
    %33 = vector.shape_cast %32 : vector<1x128x32xf32> to vector<128x32xf32>
    %cst_34 = arith.constant dense<0.000000e+00> : vector<64x32xf32>
    %34 = tpu.matmul %7, %33, %cst_34 {dimension_numbers = #tpu.dot_dimension_numbers<[1], [0], [0], [1], [0, 0, 1, 1], [], []>} : vector<64x128xf32>, vector<128x32xf32>, vector<64x32xf32> -> vector<64x32xf32>
    %c384 = arith.constant 384 : index
    %c0_35 = arith.constant 0 : index
    %35 = vector.load %arg10[%c384, %c0_35] : memref<576x32xf32, #tpu.memory_space<vmem>>, vector<64x32xf32>
    tpu.vector_store %arg10[%c384, %c0_35], %34 {strides = array<i32>} : memref<576x32xf32, #tpu.memory_space<vmem>>, vector<64x32xf32>,
    %c7 = arith.constant 7 : index
    %c0_36 = arith.constant 0 : index
    %c0_37 = arith.constant 0 : index
    %36 = vector.load %arg3[%c7, %c0_36, %c0_37] : memref<9x128x32xf32, #tpu.memory_space<vmem>>, vector<1x128x32xf32>
    %37 = vector.shape_cast %36 : vector<1x128x32xf32> to vector<128x32xf32>
    %cst_38 = arith.constant dense<0.000000e+00> : vector<64x32xf32>
    %38 = tpu.matmul %7, %37, %cst_38 {dimension_numbers = #tpu.dot_dimension_numbers<[1], [0], [0], [1], [0, 0, 1, 1], [], []>} : vector<64x128xf32>, vector<128x32xf32>, vector<64x32xf32> -> vector<64x32xf32>
    %c448 = arith.constant 448 : index
    %c0_39 = arith.constant 0 : index
    %39 = vector.load %arg10[%c448, %c0_39] : memref<576x32xf32, #tpu.memory_space<vmem>>, vector<64x32xf32>
    tpu.vector_store %arg10[%c448, %c0_39], %38 {strides = array<i32>} : memref<576x32xf32, #tpu.memory_space<vmem>>, vector<64x32xf32>,
    %c8 = arith.constant 8 : index
    %c0_40 = arith.constant 0 : index
    %c0_41 = arith.constant 0 : index
    %40 = vector.load %arg3[%c8, %c0_40, %c0_41] : memref<9x128x32xf32, #tpu.memory_space<vmem>>, vector<1x128x32xf32>
    %41 = vector.shape_cast %40 : vector<1x128x32xf32> to vector<128x32xf32>
    %cst_42 = arith.constant dense<0.000000e+00> : vector<64x32xf32>
    %42 = tpu.matmul %7, %41, %cst_42 {dimension_numbers = #tpu.dot_dimension_numbers<[1], [0], [0], [1], [0, 0, 1, 1], [], []>} : vector<64x128xf32>, vector<128x32xf32>, vector<64x32xf32> -> vector<64x32xf32>
    %c512 = arith.constant 512 : index
    %c0_43 = arith.constant 0 : index
    %43 = vector.load %arg10[%c512, %c0_43] : memref<576x32xf32, #tpu.memory_space<vmem>>, vector<64x32xf32>
    tpu.vector_store %arg10[%c512, %c0_43], %42 {strides = array<i32>} : memref<576x32xf32, #tpu.memory_space<vmem>>, vector<64x32xf32>,
    %c0_44 = arith.constant 0 : index
    %c0_45 = arith.constant 0 : index
    %44 = vector.load %arg4[%c0_44, %c0_45] : memref<128x576xf32, #tpu.memory_space<vmem>>, vector<128x576xf32>
    %c0_46 = arith.constant 0 : index
    %c0_47 = arith.constant 0 : index
    %45 = vector.load %arg10[%c0_46, %c0_47] : memref<576x32xf32, #tpu.memory_space<vmem>>, vector<576x32xf32>
    %cst_48 = arith.constant dense<0.000000e+00> : vector<128x32xf32>
    %46 = tpu.matmul %44, %45, %cst_48 {dimension_numbers = #tpu.dot_dimension_numbers<[1], [0], [0], [1], [0, 0, 1, 1], [], []>} : vector<128x576xf32>, vector<576x32xf32>, vector<128x32xf32> -> vector<128x32xf32>
    %c0_49 = arith.constant 0 : index
    %c0_50 = arith.constant 0 : index
    %47 = vector.load %arg5[%c0_49, %c0_50] : memref<128x1xf32, #tpu.memory_space<vmem>>, vector<128x1xf32>
    %48 = vector.broadcast %47 : vector<128x1xf32> to vector<128x32xf32>
    %49 = arith.addf %46, %48 : vector<128x32xf32>
    %cst_51 = arith.constant 0.000000e+00 : f32
    %50 = vector.broadcast %cst_51 : f32 to vector<128x32xf32>
    %51 = arith.maximumf %49, %50 : vector<128x32xf32>
    %c0_52 = arith.constant 0 : index
    %c0_53 = arith.constant 0 : index
    %c0_54 = arith.constant 0 : index
    %52 = vector.load %arg6[%c0_52, %c0_53, %c0_54] : memref<9x32x2xf32, #tpu.memory_space<vmem>>, vector<1x32x2xf32>
    %53 = vector.shape_cast %52 : vector<1x32x2xf32> to vector<32x2xf32>
    %cst_55 = arith.constant dense<0.000000e+00> : vector<128x2xf32>
    %54 = tpu.matmul %51, %53, %cst_55 {dimension_numbers = #tpu.dot_dimension_numbers<[1], [0], [0], [1], [0, 0, 1, 1], [], []>} : vector<128x32xf32>, vector<32x2xf32>, vector<128x2xf32> -> vector<128x2xf32>
    %c0_56 = arith.constant 0 : index
    %c0_57 = arith.constant 0 : index
    %55 = vector.load %arg11[%c0_56, %c0_57] : memref<1152x2xf32, #tpu.memory_space<vmem>>, vector<128x2xf32>
    tpu.vector_store %arg11[%c0_56, %c0_57], %54 {strides = array<i32>} : memref<1152x2xf32, #tpu.memory_space<vmem>>, vector<128x2xf32>,
    %c1_58 = arith.constant 1 : index
    %c0_59 = arith.constant 0 : index
    %c0_60 = arith.constant 0 : index
    %56 = vector.load %arg6[%c1_58, %c0_59, %c0_60] : memref<9x32x2xf32, #tpu.memory_space<vmem>>, vector<1x32x2xf32>
    %57 = vector.shape_cast %56 : vector<1x32x2xf32> to vector<32x2xf32>
    %cst_61 = arith.constant dense<0.000000e+00> : vector<128x2xf32>
    %58 = tpu.matmul %51, %57, %cst_61 {dimension_numbers = #tpu.dot_dimension_numbers<[1], [0], [0], [1], [0, 0, 1, 1], [], []>} : vector<128x32xf32>, vector<32x2xf32>, vector<128x2xf32> -> vector<128x2xf32>
    %c128_62 = arith.constant 128 : index
    %c0_63 = arith.constant 0 : index
    %59 = vector.load %arg11[%c128_62, %c0_63] : memref<1152x2xf32, #tpu.memory_space<vmem>>, vector<128x2xf32>
    tpu.vector_store %arg11[%c128_62, %c0_63], %58 {strides = array<i32>} : memref<1152x2xf32, #tpu.memory_space<vmem>>, vector<128x2xf32>,
    %c2_64 = arith.constant 2 : index
    %c0_65 = arith.constant 0 : index
    %c0_66 = arith.constant 0 : index
    %60 = vector.load %arg6[%c2_64, %c0_65, %c0_66] : memref<9x32x2xf32, #tpu.memory_space<vmem>>, vector<1x32x2xf32>
    %61 = vector.shape_cast %60 : vector<1x32x2xf32> to vector<32x2xf32>
    %cst_67 = arith.constant dense<0.000000e+00> : vector<128x2xf32>
    %62 = tpu.matmul %51, %61, %cst_67 {dimension_numbers = #tpu.dot_dimension_numbers<[1], [0], [0], [1], [0, 0, 1, 1], [], []>} : vector<128x32xf32>, vector<32x2xf32>, vector<128x2xf32> -> vector<128x2xf32>
    %c256_68 = arith.constant 256 : index
    %c0_69 = arith.constant 0 : index
    %63 = vector.load %arg11[%c256_68, %c0_69] : memref<1152x2xf32, #tpu.memory_space<vmem>>, vector<128x2xf32>
    tpu.vector_store %arg11[%c256_68, %c0_69], %62 {strides = array<i32>} : memref<1152x2xf32, #tpu.memory_space<vmem>>, vector<128x2xf32>,
    %c3_70 = arith.constant 3 : index
    %c0_71 = arith.constant 0 : index
    %c0_72 = arith.constant 0 : index
    %64 = vector.load %arg6[%c3_70, %c0_71, %c0_72] : memref<9x32x2xf32, #tpu.memory_space<vmem>>, vector<1x32x2xf32>
    %65 = vector.shape_cast %64 : vector<1x32x2xf32> to vector<32x2xf32>
    %cst_73 = arith.constant dense<0.000000e+00> : vector<128x2xf32>
    %66 = tpu.matmul %51, %65, %cst_73 {dimension_numbers = #tpu.dot_dimension_numbers<[1], [0], [0], [1], [0, 0, 1, 1], [], []>} : vector<128x32xf32>, vector<32x2xf32>, vector<128x2xf32> -> vector<128x2xf32>
    %c384_74 = arith.constant 384 : index
    %c0_75 = arith.constant 0 : index
    %67 = vector.load %arg11[%c384_74, %c0_75] : memref<1152x2xf32, #tpu.memory_space<vmem>>, vector<128x2xf32>
    tpu.vector_store %arg11[%c384_74, %c0_75], %66 {strides = array<i32>} : memref<1152x2xf32, #tpu.memory_space<vmem>>, vector<128x2xf32>,
    %c4_76 = arith.constant 4 : index
    %c0_77 = arith.constant 0 : index
    %c0_78 = arith.constant 0 : index
    %68 = vector.load %arg6[%c4_76, %c0_77, %c0_78] : memref<9x32x2xf32, #tpu.memory_space<vmem>>, vector<1x32x2xf32>
    %69 = vector.shape_cast %68 : vector<1x32x2xf32> to vector<32x2xf32>
    %cst_79 = arith.constant dense<0.000000e+00> : vector<128x2xf32>
    %70 = tpu.matmul %51, %69, %cst_79 {dimension_numbers = #tpu.dot_dimension_numbers<[1], [0], [0], [1], [0, 0, 1, 1], [], []>} : vector<128x32xf32>, vector<32x2xf32>, vector<128x2xf32> -> vector<128x2xf32>
    %c512_80 = arith.constant 512 : index
    %c0_81 = arith.constant 0 : index
    %71 = vector.load %arg11[%c512_80, %c0_81] : memref<1152x2xf32, #tpu.memory_space<vmem>>, vector<128x2xf32>
    tpu.vector_store %arg11[%c512_80, %c0_81], %70 {strides = array<i32>} : memref<1152x2xf32, #tpu.memory_space<vmem>>, vector<128x2xf32>,
    %c5_82 = arith.constant 5 : index
    %c0_83 = arith.constant 0 : index
    %c0_84 = arith.constant 0 : index
    %72 = vector.load %arg6[%c5_82, %c0_83, %c0_84] : memref<9x32x2xf32, #tpu.memory_space<vmem>>, vector<1x32x2xf32>
    %73 = vector.shape_cast %72 : vector<1x32x2xf32> to vector<32x2xf32>
    %cst_85 = arith.constant dense<0.000000e+00> : vector<128x2xf32>
    %74 = tpu.matmul %51, %73, %cst_85 {dimension_numbers = #tpu.dot_dimension_numbers<[1], [0], [0], [1], [0, 0, 1, 1], [], []>} : vector<128x32xf32>, vector<32x2xf32>, vector<128x2xf32> -> vector<128x2xf32>
    %c640 = arith.constant 640 : index
    %c0_86 = arith.constant 0 : index
    %75 = vector.load %arg11[%c640, %c0_86] : memref<1152x2xf32, #tpu.memory_space<vmem>>, vector<128x2xf32>
    tpu.vector_store %arg11[%c640, %c0_86], %74 {strides = array<i32>} : memref<1152x2xf32, #tpu.memory_space<vmem>>, vector<128x2xf32>,
    %c6_87 = arith.constant 6 : index
    %c0_88 = arith.constant 0 : index
    %c0_89 = arith.constant 0 : index
    %76 = vector.load %arg6[%c6_87, %c0_88, %c0_89] : memref<9x32x2xf32, #tpu.memory_space<vmem>>, vector<1x32x2xf32>
    %77 = vector.shape_cast %76 : vector<1x32x2xf32> to vector<32x2xf32>
    %cst_90 = arith.constant dense<0.000000e+00> : vector<128x2xf32>
    %78 = tpu.matmul %51, %77, %cst_90 {dimension_numbers = #tpu.dot_dimension_numbers<[1], [0], [0], [1], [0, 0, 1, 1], [], []>} : vector<128x32xf32>, vector<32x2xf32>, vector<128x2xf32> -> vector<128x2xf32>
    %c768 = arith.constant 768 : index
    %c0_91 = arith.constant 0 : index
    %79 = vector.load %arg11[%c768, %c0_91] : memref<1152x2xf32, #tpu.memory_space<vmem>>, vector<128x2xf32>
    tpu.vector_store %arg11[%c768, %c0_91], %78 {strides = array<i32>} : memref<1152x2xf32, #tpu.memory_space<vmem>>, vector<128x2xf32>,
    %c7_92 = arith.constant 7 : index
    %c0_93 = arith.constant 0 : index
    %c0_94 = arith.constant 0 : index
    %80 = vector.load %arg6[%c7_92, %c0_93, %c0_94] : memref<9x32x2xf32, #tpu.memory_space<vmem>>, vector<1x32x2xf32>
    %81 = vector.shape_cast %80 : vector<1x32x2xf32> to vector<32x2xf32>
    %cst_95 = arith.constant dense<0.000000e+00> : vector<128x2xf32>
    %82 = tpu.matmul %51, %81, %cst_95 {dimension_numbers = #tpu.dot_dimension_numbers<[1], [0], [0], [1], [0, 0, 1, 1], [], []>} : vector<128x32xf32>, vector<32x2xf32>, vector<128x2xf32> -> vector<128x2xf32>
    %c896 = arith.constant 896 : index
    %c0_96 = arith.constant 0 : index
    %83 = vector.load %arg11[%c896, %c0_96] : memref<1152x2xf32, #tpu.memory_space<vmem>>, vector<128x2xf32>
    tpu.vector_store %arg11[%c896, %c0_96], %82 {strides = array<i32>} : memref<1152x2xf32, #tpu.memory_space<vmem>>, vector<128x2xf32>,
    %c8_97 = arith.constant 8 : index
    %c0_98 = arith.constant 0 : index
    %c0_99 = arith.constant 0 : index
    %84 = vector.load %arg6[%c8_97, %c0_98, %c0_99] : memref<9x32x2xf32, #tpu.memory_space<vmem>>, vector<1x32x2xf32>
    %85 = vector.shape_cast %84 : vector<1x32x2xf32> to vector<32x2xf32>
    %cst_100 = arith.constant dense<0.000000e+00> : vector<128x2xf32>
    %86 = tpu.matmul %51, %85, %cst_100 {dimension_numbers = #tpu.dot_dimension_numbers<[1], [0], [0], [1], [0, 0, 1, 1], [], []>} : vector<128x32xf32>, vector<32x2xf32>, vector<128x2xf32> -> vector<128x2xf32>
    %c1024 = arith.constant 1024 : index
    %c0_101 = arith.constant 0 : index
    %87 = vector.load %arg11[%c1024, %c0_101] : memref<1152x2xf32, #tpu.memory_space<vmem>>, vector<128x2xf32>
    tpu.vector_store %arg11[%c1024, %c0_101], %86 {strides = array<i32>} : memref<1152x2xf32, #tpu.memory_space<vmem>>, vector<128x2xf32>,
    %c0_102 = arith.constant 0 : index
    %c0_103 = arith.constant 0 : index
    %88 = vector.load %arg7[%c0_102, %c0_103] : memref<32x1152xf32, #tpu.memory_space<vmem>>, vector<32x1152xf32>
    %c0_104 = arith.constant 0 : index
    %c0_105 = arith.constant 0 : index
    %89 = vector.load %arg11[%c0_104, %c0_105] : memref<1152x2xf32, #tpu.memory_space<vmem>>, vector<1152x2xf32>
    %cst_106 = arith.constant dense<0.000000e+00> : vector<32x2xf32>
    %90 = tpu.matmul %88, %89, %cst_106 {dimension_numbers = #tpu.dot_dimension_numbers<[1], [0], [0], [1], [0, 0, 1, 1], [], []>} : vector<32x1152xf32>, vector<1152x2xf32>, vector<32x2xf32> -> vector<32x2xf32>
    %c0_107 = arith.constant 0 : index
    %c0_108 = arith.constant 0 : index
    %91 = vector.load %arg8[%c0_107, %c0_108] : memref<32x1xf32, #tpu.memory_space<vmem>>, vector<32x1xf32>
    %92 = vector.broadcast %91 : vector<32x1xf32> to vector<32x2xf32>
    %93 = arith.addf %90, %92 : vector<32x2xf32>
    %c0_109 = arith.constant 0 : index
    %c0_110 = arith.constant 0 : index
    %94 = vector.load %arg9[%c0_109, %c0_110] : memref<32x2xf32, #tpu.memory_space<vmem>>, vector<32x2xf32>
    tpu.vector_store %arg9[%c0_109, %c0_110], %93 {strides = array<i32>} : memref<32x2xf32, #tpu.memory_space<vmem>>, vector<32x2xf32>,
    return
  }
}

</mosaic_0001>

<bundles_post_ra>
// kernel: encoder_forward.1
= control target key start
LH: loop header
LB: loop body
LE: loop exit
PB: predicated region body
PF: predicated region fallthrough
CT: control target
= control target key end

     0   :  { %vm117_vm0 = vcmask 1042432   ;;  %v3030_v0 = vmov 0   ;;  %vm92_vm1 = vcmask 220160   ;;  %vm227_vm2 = vcmask 261120   ;;  %s4801_s2 = inlined_call_operand.vmem [shape: f32[64,1], index: 2, kind: input, shape index: {}]   ;;  %s4802_s0 = inlined_call_operand.vmem [shape: f32[27,128], index: 0, kind: input, shape index: {}]   ;;  %s4803_s1 = inlined_call_operand.vmem [shape: f32[64,27], index: 1, kind: input, shape index: {}]   ;;  %s4804_s5 = inlined_call_operand.vmem [shape: f32[128,1], index: 5, kind: input, shape index: {}]   ;;  %s4805_s8 = inlined_call_operand.vmem [shape: f32[32,1], index: 8, kind: input, shape index: {}]   ;;  %s4806_s3 = inlined_call_operand.vmem [shape: f32[9,128,32], index: 3, kind: input, shape index: {}]   ;;  %s4807_s4 = inlined_call_operand.vmem [shape: f32[128,576], index: 4, kind: input, shape index: {}]   ;;  %s4808_s6 = inlined_call_operand.vmem [shape: f32[9,32,2], index: 6, kind: input, shape index: {}]   ;;  %s4809_s7 = inlined_call_operand.vmem [shape: f32[32,1152], index: 7, kind: input, shape index: {}]   ;;  %s4810_s9 = inlined_call_operand.vmem [shape: f32[32,2], index: 9, kind: output, shape index: {}]  }
   0x1   :  { %3028 = vset.pattern.permute.xlu1 %v3030_v0  ;;  %3027 = vset.pattern.permute.xlu0 %v3030_v0  ;;  %v46_v1 = vld [vmem:[%s4801_s2 + $0x10] sm:$0xff]  ;;  %v44_v2 = vld [vmem:[%s4801_s2] sm:$0xff]  ;;  %v43_v3 = vld [vmem:[%s4802_s0 + $0x18] sm:$0x7]  ;;  %vm1012_vm3 = vcmask 523264   ;;  %vm1519_vm4 = vcmask 15360  }
   0x2   :  { %64 = vperm.xlu1 %3028, %v46_v1   ;;  %54 = vperm.xlu0 %3027, %v44_v2   ;;  %v42_v4 = vld [vmem:[%s4802_s0 + $0x10] sm:$0xff]  ;;  %v41_v5 = vld [vmem:[%s4802_s0 + $0x8] sm:$0xff]  ;;  %v48_v6 = vld [vmem:[%s4801_s2 + $0x20] sm:$0xff] }
   0x3   :  { %2697 = vmatpush.msk.msra.mxu0 %vm117_vm0, %v43_v3  ;;  %3029 = vset.pattern.permute.xlu2 %v3030_v0  ;;  %v40_v7 = vld [vmem:[%s4802_s0] sm:$0xff]  ;;  %v47_v9 = vld [vmem:[%s4801_s2 + $0x18] sm:$0xff]  ;;  %v45_v10 = vld [vmem:[%s4801_s2 + $0x8] sm:$0xff] }
   0x4   :  { %74 = vperm.xlu2 %3029, %v48_v6   ;;  %v32_v8 = vld [vmem:[%s4803_s1] sm:$0xff]  ;;  %v49_v11 = vld [vmem:[%s4801_s2 + $0x28] sm:$0xff]  ;;  %v51_v13 = vld [vmem:[%s4801_s2 + $0x38] sm:$0xff] }
   0x5   :  { %134 = vmatpush.msra.mxu0 %v42_v4  ;;  %v33_v12 = vld [vmem:[%s4803_s1 + $0x8] sm:$0xff]  ;;  %v50_v14 = vld [vmem:[%s4801_s2 + $0x30] sm:$0xff]  ;;  %v916_v15 = vld [vmem:[%s4804_s5] sm:$0xff] }
   0x6   :  { %v34_v16 = vld [vmem:[%s4803_s1 + $0x10] sm:$0xff]  ;;  %v917_v18 = vld [vmem:[%s4804_s5 + $0x8] sm:$0xff]  ;;  %v919_v19 = vld [vmem:[%s4804_s5 + $0x18] sm:$0xff] }
   0x7   :  { %135 = vmatpush.msra.mxu0 %v41_v5  ;;  %v918_v17 = vld [vmem:[%s4804_s5 + $0x10] sm:$0xff]  ;;  %v35_v20 = vld [vmem:[%s4803_s1 + $0x18] sm:$0xff]  ;;  %v921_v21 = vld [vmem:[%s4804_s5 + $0x28] sm:$0xff] }
   0x8   :  { %v920_v22 = vld [vmem:[%s4804_s5 + $0x20] sm:$0xff]  ;;  %v922_v23 = vld [vmem:[%s4804_s5 + $0x30] sm:$0xff]  ;;  %v923_v26 = vld [vmem:[%s4804_s5 + $0x38] sm:$0xff] }
   0x9   :  { %136 = vmatpush.msra.mxu0 %v40_v7  ;;  %v36_v24 = vld [vmem:[%s4803_s1 + $0x20] sm:$0xff]  ;;  %v925_v27 = vld [vmem:[%s4804_s5 + $0x48] sm:$0xff]  ;;  %v927_v29 = vld [vmem:[%s4804_s5 + $0x58] sm:$0xff] }
   0xa   :  { %2698 = vmatmul.msk.f32.vlgmr.msra.gmra.mxu0 %vm92_vm1, %v32_v8  ;;  %69 = vperm.xlu1 %3028, %v47_v9   ;;  %v924_v25 = vld [vmem:[%s4804_s5 + $0x40] sm:$0xff]  ;;  %v37_v28 = vld [vmem:[%s4803_s1 + $0x28] sm:$0xff]  ;;  %v926_v30 = vld [vmem:[%s4804_s5 + $0x50] sm:$0xff] }
   0xb   :  { %59 = vperm.xlu0 %3027, %v45_v10   ;;  %v928_v31 = vld [vmem:[%s4804_s5 + $0x60] sm:$0xff]  ;;  %v38_v32 = vld [vmem:[%s4803_s1 + $0x30] sm:$0xff]  ;;  %v929_v34 = vld [vmem:[%s4804_s5 + $0x68] sm:$0xff] }
   0xc   :  { %79 = vperm.xlu2 %3029, %v49_v11   ;;  %v930_v33 = vld [vmem:[%s4804_s5 + $0x70] sm:$0xff]  ;;  %v931_v35 = vld [vmem:[%s4804_s5 + $0x78] sm:$0xff]  ;;  %v2405_v37 = vld [vmem:[%s4805_s8 + $0x8] sm:$0xff] }
   0xd   :  { %v39_v36 = vld [vmem:[%s4803_s1 + $0x38] sm:$0xff]  ;;  %v2404_v41 = vld [vmem:[%s4805_s8] sm:$0xff]  ;;  %v184_v43 = vld [vmem:[%s4806_s3 + $0x70] sm:$0xff] }
   0xe   :  { %v185_v38 = vld [vmem:[%s4806_s3 + $0x78] sm:$0xff]  ;;  %v2720_v44 = vld [vmem:[%s4806_s3 + $0xf0] sm:$0xff]  ;;  %v183_v49 = vld [vmem:[%s4806_s3 + $0x68] sm:$0xff] }
   0xf   :  { %v2721_v39 = vld [vmem:[%s4806_s3 + $0xf8] sm:$0xff]  ;;  %186 = vmatpush.msra.mxu1 %v185_v38  ;;  %v2736_v45 = vld [vmem:[%s4806_s3 + $0x170] sm:$0xff]  ;;  %v2719_v50 = vld [vmem:[%s4806_s3 + $0xe8] sm:$0xff] }
  0x10   :  { %v2737_v40 = vld [vmem:[%s4806_s3 + $0x178] sm:$0xff]  ;;  %253 = vmatpush.msra.mxu2 %v2721_v39  ;;  %v2406_v46 = vld [vmem:[%s4805_s8 + $0x10] sm:$0xff]  ;;  %v2735_v51 = vld [vmem:[%s4806_s3 + $0x168] sm:$0xff] }
  0x11   :  { %v2753_v42 = vld [vmem:[%s4806_s3 + $0x1f8] sm:$0xff]  ;;  %319 = vmatpush.msra.mxu3 %v2737_v40  ;;  %187 = vmatpush.msra.mxu1 %v184_v43  ;;  %v2752_v48 = vld [vmem:[%s4806_s3 + $0x1f0] sm:$0xff]  ;;  %v2751_v52 = vld [vmem:[%s4806_s3 + $0x1e8] sm:$0xff] }
  0x12   :  { %2699 = vmatmul.msk.f32.gmra.mxu0 %vm92_vm1, %v33_v12  ;;  %89 = vperm.xlu1 %3028, %v51_v13   ;;  %v2407_v47 = vld [vmem:[%s4805_s8 + $0x18] sm:$0xff]  ;;  %v182_v53 = vld [vmem:[%s4806_s3 + $0x60] sm:$0xff]  ;;  %v180_v61 = vld [vmem:[%s4806_s3 + $0x50] sm:$0xff] }
  0x13   :  { %84 = vperm.xlu0 %3027, %v50_v14   ;;  %385 = vmatpush.msrb.mxu0 %v2753_v42  ;;  %v2718_v54 = vld [vmem:[%s4806_s3 + $0xe0] sm:$0xff]  ;;  %v181_v57 = vld [vmem:[%s4806_s3 + $0x58] sm:$0xff]  ;;  %v2716_v62 = vld [vmem:[%s4806_s3 + $0xd0] sm:$0xff] }
  0x14   :  { %934 = vperm.xlu2 %3029, %v916_v15   ;;  %254 = vmatpush.msra.mxu2 %v2720_v44  ;;  %v2734_v55 = vld [vmem:[%s4806_s3 + $0x160] sm:$0xff]  ;;  %v2717_v58 = vld [vmem:[%s4806_s3 + $0xd8] sm:$0xff]  ;;  %v2732_v63 = vld [vmem:[%s4806_s3 + $0x150] sm:$0xff] }
  0x15   :  { %320 = vmatpush.msra.mxu3 %v2736_v45  ;;  %386 = vmatpush.msrb.mxu0 %v2752_v48  ;;  %v2750_v56 = vld [vmem:[%s4806_s3 + $0x1e0] sm:$0xff]  ;;  %v2733_v59 = vld [vmem:[%s4806_s3 + $0x158] sm:$0xff]  ;;  %v2748_v0 = vld [vmem:[%s4806_s3 + $0x1d0] sm:$0xff] }
  0x16   :  { %188 = vmatpush.msra.mxu1 %v183_v49  ;;  %255 = vmatpush.msra.mxu2 %v2719_v50  ;;  %v2749_v60 = vld [vmem:[%s4806_s3 + $0x1d8] sm:$0xff]  ;;  %v179_v1 = vld [vmem:[%s4806_s3 + $0x48] sm:$0xff]  ;;  %v178_v5 = vld [vmem:[%s4806_s3 + $0x40] sm:$0xff] }
  0x17   :  { %321 = vmatpush.msra.mxu3 %v2735_v51  ;;  %387 = vmatpush.msrb.mxu0 %v2751_v52  ;;  %v2715_v2 = vld [vmem:[%s4806_s3 + $0xc8] sm:$0xff]  ;;  %v2714_v6 = vld [vmem:[%s4806_s3 + $0xc0] sm:$0xff]  ;;  %v177_v9 = vld [vmem:[%s4806_s3 + $0x38] sm:$0xff] }
  0x18   :  { %189 = vmatpush.msra.mxu1 %v182_v53  ;;  %256 = vmatpush.msra.mxu2 %v2718_v54  ;;  %v2731_v3 = vld [vmem:[%s4806_s3 + $0x148] sm:$0xff]  ;;  %v2730_v7 = vld [vmem:[%s4806_s3 + $0x140] sm:$0xff]  ;;  %v2713_v10 = vld [vmem:[%s4806_s3 + $0xb8] sm:$0xff] }
  0x19   :  { %322 = vmatpush.msra.mxu3 %v2734_v55  ;;  %388 = vmatpush.msrb.mxu0 %v2750_v56  ;;  %v2747_v4 = vld [vmem:[%s4806_s3 + $0x1c8] sm:$0xff]  ;;  %v2746_v8 = vld [vmem:[%s4806_s3 + $0x1c0] sm:$0xff]  ;;  %v2729_v11 = vld [vmem:[%s4806_s3 + $0x138] sm:$0xff] }
  0x1a   :  { %2700 = vmatmul.msk.f32.gmra.mxu0 %vm92_vm1, %v34_v16  ;;  %944 = vperm.xlu1 %3028, %v918_v17   ;;  %v2745_v12 = vld [vmem:[%s4806_s3 + $0x1b8] sm:$0xff]  ;;  %v176_v13 = vld [vmem:[%s4806_s3 + $0x30] sm:$0xff]  ;;  %v175_v17 = vld [vmem:[%s4806_s3 + $0x28] sm:$0xff] }
  0x1b   :  { %939 = vperm.xlu0 %3027, %v917_v18   ;;  %190 = vmatpush.msra.mxu1 %v181_v57  ;;  %v2712_v14 = vld [vmem:[%s4806_s3 + $0xb0] sm:$0xff]  ;;  %v2711_v18 = vld [vmem:[%s4806_s3 + $0xa8] sm:$0xff]  ;;  %v2706_v38 = vld [vmem:[%s4806_s3 + $0x80] sm:$0xff] }
  0x1c   :  { %949 = vperm.xlu2 %3029, %v919_v19   ;;  %257 = vmatpush.msra.mxu2 %v2717_v58  ;;  %v2728_v15 = vld [vmem:[%s4806_s3 + $0x130] sm:$0xff]  ;;  %v2727_v19 = vld [vmem:[%s4806_s3 + $0x128] sm:$0xff]  ;;  %v2722_v39 = vld [vmem:[%s4806_s3 + $0x100] sm:$0xff] }
  0x1d   :  { %323 = vmatpush.msra.mxu3 %v2733_v59  ;;  %389 = vmatpush.msrb.mxu0 %v2749_v60  ;;  %v2744_v16 = vld [vmem:[%s4806_s3 + $0x1b0] sm:$0xff]  ;;  %v2738_v40 = vld [vmem:[%s4806_s3 + $0x180] sm:$0xff]  ;;  %v2769_v45 = vld [vmem:[%s4806_s3 + $0x278] sm:$0xff] }
  0x1e   :  { %191 = vmatpush.msra.mxu1 %v180_v61  ;;  %258 = vmatpush.msra.mxu2 %v2716_v62  ;;  %v2817_v48 = vld [vmem:[%s4806_s3 + $0x3f8] sm:$0xff]  ;;  %v2768_v51 = vld [vmem:[%s4806_s3 + $0x270] sm:$0xff]  ;;  %v2767_v56 = vld [vmem:[%s4806_s3 + $0x268] sm:$0xff] }
  0x1f   :  { %324 = vmatpush.msra.mxu3 %v2732_v63  ;;  %390 = vmatpush.msrb.mxu0 %v2748_v0  ;;  %v2784_v52 = vld [vmem:[%s4806_s3 + $0x2f0] sm:$0xff]  ;;  %v2783_v57 = vld [vmem:[%s4806_s3 + $0x2e8] sm:$0xff]  ;;  %v2766_v61 = vld [vmem:[%s4806_s3 + $0x260] sm:$0xff] }
  0x20   :  { %192 = vmatpush.msra.mxu1 %v179_v1  ;;  %259 = vmatpush.msra.mxu2 %v2715_v2  ;;  %v2800_v53 = vld [vmem:[%s4806_s3 + $0x370] sm:$0xff]  ;;  %v2799_v58 = vld [vmem:[%s4806_s3 + $0x368] sm:$0xff]  ;;  %v2782_v62 = vld [vmem:[%s4806_s3 + $0x2e0] sm:$0xff] }
  0x21   :  { %325 = vmatpush.msra.mxu3 %v2731_v3  ;;  %391 = vmatpush.msrb.mxu0 %v2747_v4  ;;  %v2816_v55 = vld [vmem:[%s4806_s3 + $0x3f0] sm:$0xff]  ;;  %v2815_v60 = vld [vmem:[%s4806_s3 + $0x3e8] sm:$0xff]  ;;  %v2798_v63 = vld [vmem:[%s4806_s3 + $0x360] sm:$0xff] }
  0x22   :  { %2701 = vmatmul.msk.f32.gmra.mxu0 %vm92_vm1, %v35_v20  ;;  %959 = vperm.xlu1 %3028, %v921_v21   ;;  %v2743_v20 = vld [vmem:[%s4806_s3 + $0x1a8] sm:$0xff]  ;;  %v174_v21 = vld [vmem:[%s4806_s3 + $0x20] sm:$0xff]  ;;  %v2765_v2 = vld [vmem:[%s4806_s3 + $0x258] sm:$0xff] }
  0x23   :  { %954 = vperm.xlu0 %3027, %v920_v22   ;;  %193 = vmatpush.msra.mxu1 %v178_v5  ;;  %v2710_v22 = vld [vmem:[%s4806_s3 + $0xa0] sm:$0xff]  ;;  %v2781_v3 = vld [vmem:[%s4806_s3 + $0x2d8] sm:$0xff] }
  0x24   :  { %964 = vperm.xlu2 %3029, %v922_v23   ;;  %260 = vmatpush.msra.mxu2 %v2714_v6  ;;  %v2726_v23 = vld [vmem:[%s4806_s3 + $0x120] sm:$0xff]  ;;  %v2797_v4 = vld [vmem:[%s4806_s3 + $0x358] sm:$0xff] }
  0x25   :  { %326 = vmatpush.msra.mxu3 %v2730_v7  ;;  %392 = vmatpush.msrb.mxu0 %v2746_v8  ;;  %v2814_v0 = vld [vmem:[%s4806_s3 + $0x3e0] sm:$0xff]  ;;  %v2813_v5 = vld [vmem:[%s4806_s3 + $0x3d8] sm:$0xff]  ;;  %v2764_v7 = vld [vmem:[%s4806_s3 + $0x250] sm:$0xff] }
  0x26   :  { %194 = vmatpush.msra.mxu1 %v177_v9  ;;  %261 = vmatpush.msra.mxu2 %v2713_v10  ;;  %v2780_v8 = vld [vmem:[%s4806_s3 + $0x2d0] sm:$0xff] }
  0x27   :  { %327 = vmatpush.msra.mxu3 %v2729_v11  ;;  %393 = vmatpush.msrb.mxu0 %v2745_v12  ;;  %v2796_v10 = vld [vmem:[%s4806_s3 + $0x350] sm:$0xff] }
  0x28   :  { %195 = vmatpush.msra.mxu1 %v176_v13  ;;  %262 = vmatpush.msra.mxu2 %v2712_v14  ;;  %v2812_v11 = vld [vmem:[%s4806_s3 + $0x3d0] sm:$0xff]  ;;  %v2763_v13 = vld [vmem:[%s4806_s3 + $0x248] sm:$0xff] }
  0x29   :  { %328 = vmatpush.msra.mxu3 %v2728_v15  ;;  %394 = vmatpush.msrb.mxu0 %v2744_v16  ;;  %v2779_v14 = vld [vmem:[%s4806_s3 + $0x2c8] sm:$0xff] }
  0x2a   :  { %2702 = vmatmul.msk.f32.gmra.mxu0 %vm92_vm1, %v36_v24  ;;  %974 = vperm.xlu1 %3028, %v924_v25   ;;  %v2742_v24 = vld [vmem:[%s4806_s3 + $0x1a0] sm:$0xff]  ;;  %v173_v25 = vld [vmem:[%s4806_s3 + $0x18] sm:$0xff]  ;;  %v2795_v15 = vld [vmem:[%s4806_s3 + $0x348] sm:$0xff] }
  0x2b   :  { %969 = vperm.xlu0 %3027, %v923_v26   ;;  %196 = vmatpush.msra.mxu1 %v175_v17  ;;  %v2709_v26 = vld [vmem:[%s4806_s3 + $0x98] sm:$0xff]  ;;  %v2811_v16 = vld [vmem:[%s4806_s3 + $0x3c8] sm:$0xff]  ;;  %v2762_v17 = vld [vmem:[%s4806_s3 + $0x240] sm:$0xff] }
  0x2c   :  { %979 = vperm.xlu2 %3029, %v925_v27   ;;  %263 = vmatpush.msra.mxu2 %v2711_v18  ;;  %v2725_v27 = vld [vmem:[%s4806_s3 + $0x118] sm:$0xff]  ;;  %v2778_v18 = vld [vmem:[%s4806_s3 + $0x2c0] sm:$0xff] }
  0x2d   :  { %329 = vmatpush.msra.mxu3 %v2727_v19  ;;  %395 = vmatpush.msrb.mxu0 %v2743_v20  ;;  %v2794_v19 = vld [vmem:[%s4806_s3 + $0x340] sm:$0xff] }
  0x2e   :  { %197 = vmatpush.msra.mxu1 %v174_v21  ;;  %264 = vmatpush.msra.mxu2 %v2710_v22  ;;  %v2810_v20 = vld [vmem:[%s4806_s3 + $0x3c0] sm:$0xff] }
  0x2f   :  { %330 = vmatpush.msra.mxu3 %v2726_v23  ;;  %396 = vmatpush.msrb.mxu0 %v2742_v24  ;;  %v2761_v23 = vld [vmem:[%s4806_s3 + $0x238] sm:$0xff] }
  0x30   :  { %198 = vmatpush.msra.mxu1 %v173_v25  ;;  %265 = vmatpush.msra.mxu2 %v2709_v26  ;;  %v2777_v24 = vld [vmem:[%s4806_s3 + $0x2b8] sm:$0xff] }
  0x31   :  { %331 = vmatpush.msra.mxu3 %v2725_v27  ;;  %v2793_v26 = vld [vmem:[%s4806_s3 + $0x338] sm:$0xff] }
  0x32   :  { %2703 = vmatmul.msk.f32.gmra.mxu0 %vm92_vm1, %v37_v28  ;;  %989 = vperm.xlu1 %3028, %v927_v29   ;;  %v2741_v28 = vld [vmem:[%s4806_s3 + $0x198] sm:$0xff]  ;;  %v172_v29 = vld [vmem:[%s4806_s3 + $0x10] sm:$0xff] }
  0x33   :  { %984 = vperm.xlu0 %3027, %v926_v30   ;;  %397 = vmatpush.msrb.mxu0 %v2741_v28  ;;  %v2708_v30 = vld [vmem:[%s4806_s3 + $0x90] sm:$0xff]  ;;  %v2809_v27 = vld [vmem:[%s4806_s3 + $0x3b8] sm:$0xff] }
  0x34   :  { %994 = vperm.xlu2 %3029, %v928_v31   ;;  %v2724_v31 = vld [vmem:[%s4806_s3 + $0x110] sm:$0xff]  ;;  %199 = vmatpush.msra.mxu1 %v172_v29 }
  0x35   :  { %266 = vmatpush.msra.mxu2 %v2708_v30  ;;  %332 = vmatpush.msra.mxu3 %v2724_v31  ;;  %v2760_v29 = vld [vmem:[%s4806_s3 + $0x230] sm:$0xff] }
  0x36   :  { %v2776_v30 = vld [vmem:[%s4806_s3 + $0x2b0] sm:$0xff] }
  0x37   :  { %v2792_v31 = vld [vmem:[%s4806_s3 + $0x330] sm:$0xff] }
  0x3a   :  { %2704 = vmatmul.msk.f32.gmra.mxu0 %vm92_vm1, %v38_v32  ;;  %1004 = vperm.xlu1 %3028, %v930_v33   ;;  %v2740_v32 = vld [vmem:[%s4806_s3 + $0x190] sm:$0xff]  ;;  %v171_v33 = vld [vmem:[%s4806_s3 + $0x8] sm:$0xff] }
  0x3b   :  { %999 = vperm.xlu0 %3027, %v929_v34   ;;  %398 = vmatpush.msrb.mxu0 %v2740_v32  ;;  %v2707_v34 = vld [vmem:[%s4806_s3 + $0x88] sm:$0xff]  ;;  %v2808_v32 = vld [vmem:[%s4806_s3 + $0x3b0] sm:$0xff] }
  0x3c   :  { %1009 = vperm.xlu2 %3029, %v931_v35   ;;  %v2723_v35 = vld [vmem:[%s4806_s3 + $0x108] sm:$0xff]  ;;  %200 = vmatpush.msra.mxu1 %v171_v33 }
  0x3d   :  { %267 = vmatpush.msra.mxu2 %v2707_v34  ;;  %333 = vmatpush.msra.mxu3 %v2723_v35  ;;  %v2759_v34 = vld [vmem:[%s4806_s3 + $0x228] sm:$0xff] }
  0x3e   :  { %v2775_v35 = vld [vmem:[%s4806_s3 + $0x2a8] sm:$0xff] }
  0x3f   :  { %268 = vmatpush.msra.mxu2 %v2706_v38  ;;  %334 = vmatpush.msra.mxu3 %v2722_v39  ;;  %v2758_v39 = vld [vmem:[%s4806_s3 + $0x220] sm:$0xff] }
  0x42   :  { %2705 = vmatmul.msk.f32.gmra.mxu0 %vm92_vm1, %v39_v36  ;;  %2415 = vperm.xlu1 %3028, %v2405_v37   ;;  %v2739_v36 = vld [vmem:[%s4806_s3 + $0x188] sm:$0xff]  ;;  %v170_v37 = vld [vmem:[%s4806_s3] sm:$0xff] }
  0x43   :  { %2410 = vperm.xlu0 %3027, %v2404_v41   ;;  %399 = vmatpush.msrb.mxu0 %v2739_v36  ;;  %v2791_v36 = vld [vmem:[%s4806_s3 + $0x328] sm:$0xff] }
  0x44   :  { %2420 = vperm.xlu2 %3029, %v2406_v46   ;;  %201 = vmatpush.msra.mxu1 %v170_v37  ;;  %v2785_v46 = vld [vmem:[%s4806_s3 + $0x2f8] sm:$0xff]  ;;  %v2807_v37 = vld [vmem:[%s4806_s3 + $0x3a8] sm:$0xff] }
  0x45   :  { %400 = vmatpush.msrb.mxu0 %v2738_v40  ;;  %517 = vmatpush.msrb.mxu2 %v2785_v46  ;;  %v2774_v40 = vld [vmem:[%s4806_s3 + $0x2a0] sm:$0xff]  ;;  %v2757_v46 = vld [vmem:[%s4806_s3 + $0x218] sm:$0xff] }
  0x46   :  { %451 = vmatpush.msrb.mxu1 %v2769_v45 }
  0x47   :  { %649 = vmatpush.msra.mxu0 %v2817_v48  ;;  %518 = vmatpush.msrb.mxu2 %v2784_v52  ;;  %v2789_v48 = vld [vmem:[%s4806_s3 + $0x318] sm:$0xff]  ;;  %v2788_v52 = vld [vmem:[%s4806_s3 + $0x310] sm:$0xff] }
  0x48   :  { %452 = vmatpush.msrb.mxu1 %v2768_v51  ;;  %v2772_v51 = vld [vmem:[%s4806_s3 + $0x290] sm:$0xff] }
  0x49   :  { %650 = vmatpush.msra.mxu0 %v2816_v55  ;;  %519 = vmatpush.msrb.mxu2 %v2783_v57  ;;  %v2771_v57 = vld [vmem:[%s4806_s3 + $0x288] sm:$0xff] }
  0x4a   :  { %453 = vmatpush.msrb.mxu1 %v2767_v56  ;;  %v2755_v56 = vld [vmem:[%s4806_s3 + $0x208] sm:$0xff] }
  0x4b   :  { %2425 = vperm.xlu0 %3027, %v2407_v47   ;;  %v2801_v47 = vld [vmem:[%s4806_s3 + $0x378] sm:$0xff]  ;;  %651 = vmatpush.msra.mxu0 %v2815_v60  ;;  %v2787_v60 = vld [vmem:[%s4806_s3 + $0x308] sm:$0xff] }
  0x4c   :  { %583 = vmatpush.msrb.mxu3 %v2801_v47  ;;  %454 = vmatpush.msrb.mxu1 %v2766_v61  ;;  %v2773_v47 = vld [vmem:[%s4806_s3 + $0x298] sm:$0xff]  ;;  %v2803_v61 = vld [vmem:[%s4806_s3 + $0x388] sm:$0xff] }
  0x4d   :  { %520 = vmatpush.msrb.mxu2 %v2782_v62  ;;  %652 = vmatpush.msra.mxu0 %v2814_v0  ;;  %v2770_v0 = vld [vmem:[%s4806_s3 + $0x280] sm:$0xff] }
  0x4e   :  { %584 = vmatpush.msrb.mxu3 %v2800_v53  ;;  %455 = vmatpush.msrb.mxu1 %v2765_v2  ;;  %v2804_v53 = vld [vmem:[%s4806_s3 + $0x390] sm:$0xff]  ;;  %v2802_v2 = vld [vmem:[%s4806_s3 + $0x380] sm:$0xff] }
  0x4f   :  { %521 = vmatpush.msrb.mxu2 %v2781_v3  ;;  %653 = vmatpush.msra.mxu0 %v2813_v5 }
  0x50   :  { %585 = vmatpush.msrb.mxu3 %v2799_v58  ;;  %456 = vmatpush.msrb.mxu1 %v2764_v7 }
  0x51   :  { %522 = vmatpush.msrb.mxu2 %v2780_v8  ;;  %654 = vmatpush.msra.mxu0 %v2812_v11  ;;  %v2833_v11 = vld [vmem:[%s4806_s3 + $0x478] sm:$0xff] }
  0x52   :  { %586 = vmatpush.msrb.mxu3 %v2798_v63  ;;  %457 = vmatpush.msrb.mxu1 %v2763_v13  ;;  %v2754_v63 = vld [vmem:[%s4806_s3 + $0x200] sm:$0xff]  ;;  %v2832_v13 = vld [vmem:[%s4806_s3 + $0x470] sm:$0xff] }
  0x53   :  { %523 = vmatpush.msrb.mxu2 %v2779_v14  ;;  %655 = vmatpush.msra.mxu0 %v2811_v16  ;;  %v2831_v14 = vld [vmem:[%s4806_s3 + $0x468] sm:$0xff]  ;;  %v2829_v16 = vld [vmem:[%s4806_s3 + $0x458] sm:$0xff] }
  0x54   :  { %587 = vmatpush.msrb.mxu3 %v2797_v4  ;;  %458 = vmatpush.msrb.mxu1 %v2762_v17  ;;  %v2828_v17 = vld [vmem:[%s4806_s3 + $0x450] sm:$0xff] }
  0x55   :  { %524 = vmatpush.msrb.mxu2 %v2778_v18  ;;  %656 = vmatpush.msra.mxu0 %v2810_v20  ;;  %v2827_v18 = vld [vmem:[%s4806_s3 + $0x448] sm:$0xff]  ;;  %v2825_v20 = vld [vmem:[%s4806_s3 + $0x438] sm:$0xff] }
  0x56   :  { %588 = vmatpush.msrb.mxu3 %v2796_v10  ;;  %459 = vmatpush.msrb.mxu1 %v2761_v23  ;;  %v2822_v23 = vld [vmem:[%s4806_s3 + $0x420] sm:$0xff] }
  0x57   :  { %525 = vmatpush.msrb.mxu2 %v2777_v24  ;;  %657 = vmatpush.msra.mxu0 %v2809_v27  ;;  %v2821_v24 = vld [vmem:[%s4806_s3 + $0x418] sm:$0xff]  ;;  %v2818_v27 = vld [vmem:[%s4806_s3 + $0x400] sm:$0xff] }
  0x58   :  { %589 = vmatpush.msrb.mxu3 %v2795_v15  ;;  %460 = vmatpush.msrb.mxu1 %v2760_v29  ;;  %v2830_v15 = vld [vmem:[%s4806_s3 + $0x460] sm:$0xff] }
  0x59   :  { %526 = vmatpush.msrb.mxu2 %v2776_v30  ;;  %658 = vmatpush.msra.mxu0 %v2808_v32 }
  0x5a   :  { %590 = vmatpush.msrb.mxu3 %v2794_v19  ;;  %461 = vmatpush.msrb.mxu1 %v2759_v34  ;;  %v2826_v19 = vld [vmem:[%s4806_s3 + $0x440] sm:$0xff] }
  0x5b   :  { %527 = vmatpush.msrb.mxu2 %v2775_v35  ;;  %659 = vmatpush.msra.mxu0 %v2807_v37 }
  0x5c   :  { %591 = vmatpush.msrb.mxu3 %v2793_v26  ;;  %462 = vmatpush.msrb.mxu1 %v2758_v39  ;;  %v2819_v26 = vld [vmem:[%s4806_s3 + $0x408] sm:$0xff] }
  0x5d   :  { %528 = vmatpush.msrb.mxu2 %v2774_v40 }
  0x5e   :  { %v75_v33 = vpop.permute.xlu2 %74  ;;  %592 = vmatpush.msrb.mxu3 %v2792_v31  ;;  %463 = vmatpush.msrb.mxu1 %v2757_v46 }
  0x5f   :  { %529 = vmatpush.msrb.mxu2 %v2773_v47 }
  0x60   :  { %593 = vmatpush.msrb.mxu3 %v2791_v36 }
  0x61   :  { %530 = vmatpush.msrb.mxu2 %v2772_v51 }
  0x63   :  { %531 = vmatpush.msrb.mxu2 %v2771_v57 }
  0x65   :  { %532 = vmatpush.msrb.mxu2 %v2770_v0 }
  0x74   :  { %v55_v41 = vpop.permute.xlu0 %54  ;;  %v65_v1 = vpop.permute.xlu1 %64 }
  0x7c   :  { %v70_v21 = vpop.permute.xlu1 %69 }
  0x7d   :  { %v60_v49 = vpop.permute.xlu0 %59 }
  0x84   :  { %v90_v7 = vpop.permute.xlu1 %89 }
  0x85   :  { %v85_v3 = vpop.permute.xlu0 %84 }
  0x87   :  { %v138_v42 = vpop.f32.mrf.mxu0 }
  0x88   :  { %v139_v43 = vadd.f32 %v138_v42, %v55_v41  ;;  %v2790_v42 = vld [vmem:[%s4806_s3 + $0x320] sm:$0xff] }
  0x89   :  { %594 = vmatpush.msrb.mxu3 %v2790_v42 }
  0x8a   :  { %v3401_v44 = vmax.f32 %v139_v43, 0.0  ;;  %v2806_v43 = vld [vmem:[%s4806_s3 + $0x3a0] sm:$0xff] }
  0x8b   :  { %660 = vmatpush.msra.mxu0 %v2806_v43  ;;  %595 = vmatpush.msrb.mxu3 %v2789_v48 }
  0x8c   :  { %202 = vmatmul.f32.vlgmr.msra.gmra.mxu1 %v3401_v44  ;;  %269 = vmatmul.f32.vlgmr.msra.gmra.mxu2 %v3401_v44 }
  0x8d   :  { %335 = vmatmul.f32.vlgmr.msra.gmra.mxu3 %v3401_v44  ;;  %401 = vmatmul.f32.vlgmr.msrb.gmra.mxu0 %v3401_v44 }
  0x8e   :  { %596 = vmatpush.msrb.mxu3 %v2788_v52 }
  0x8f   :  { %v141_v50 = vpop.f32.mrf.mxu0 }
  0x90   :  { %v142_v54 = vadd.f32 %v141_v50, %v60_v49  ;;  %v2805_v49 = vld [vmem:[%s4806_s3 + $0x398] sm:$0xff]  ;;  %v2756_v50 = vld [vmem:[%s4806_s3 + $0x210] sm:$0xff]  ;;  %597 = vmatpush.msrb.mxu3 %v2787_v60 }
  0x91   :  { %661 = vmatpush.msra.mxu0 %v2805_v49  ;;  %464 = vmatpush.msrb.mxu1 %v2756_v50 }
  0x92   :  { %v3440_v59 = vmax.f32 %v142_v54, 0.0  ;;  %v80_v54 = vpop.permute.xlu2 %79 }
  0x93   :  { %662 = vmatpush.msra.mxu0 %v2804_v53  ;;  %465 = vmatpush.msrb.mxu1 %v2755_v56 }
  0x94   :  { %205 = vmatmul.f32.gmra.mxu1 %v3440_v59  ;;  %272 = vmatmul.f32.gmra.mxu2 %v3440_v59 }
  0x95   :  { %338 = vmatmul.f32.gmra.mxu3 %v3440_v59  ;;  %404 = vmatmul.f32.gmra.mxu0 %v3440_v59 }
  0x96   :  { %663 = vmatpush.msra.mxu0 %v2803_v61  ;;  %466 = vmatpush.msrb.mxu1 %v2754_v63 }
  0x97   :  { %v144_v6 = vpop.f32.mrf.mxu0 }
  0x98   :  { %v145_v9 = vadd.f32 %v144_v6, %v65_v1  ;;  %v2786_v1 = vld [vmem:[%s4806_s3 + $0x300] sm:$0xff]  ;;  %664 = vmatpush.msra.mxu0 %v2802_v2  ;;  %715 = vmatpush.msra.mxu1 %v2833_v11 }
  0x99   :  { %598 = vmatpush.msrb.mxu3 %v2786_v1 }
  0x9a   :  { %v3485_v12 = vmax.f32 %v145_v9, 0.0  ;;  %716 = vmatpush.msra.mxu1 %v2832_v13 }
  0x9c   :  { %208 = vmatmul.f32.gmra.mxu1 %v3485_v12  ;;  %275 = vmatmul.f32.gmra.mxu2 %v3485_v12 }
  0x9d   :  { %341 = vmatmul.f32.gmra.mxu3 %v3485_v12  ;;  %407 = vmatmul.f32.gmra.mxu0 %v3485_v12 }
  0x9e   :  { %717 = vmatpush.msra.mxu1 %v2831_v14 }
  0x9f   :  { %v147_v22 = vpop.f32.mrf.mxu0 }
  0xa0   :  { %v148_v25 = vadd.f32 %v147_v22, %v70_v21  ;;  %718 = vmatpush.msra.mxu1 %v2830_v15  ;;  %v2824_v21 = vld [vmem:[%s4806_s3 + $0x430] sm:$0xff]  ;;  %v2823_v22 = vld [vmem:[%s4806_s3 + $0x428] sm:$0xff] }
  0xa2   :  { %v3527_v28 = vmax.f32 %v148_v25, 0.0  ;;  %719 = vmatpush.msra.mxu1 %v2829_v16  ;;  %v2820_v25 = vld [vmem:[%s4806_s3 + $0x410] sm:$0xff] }
  0xa4   :  { %211 = vmatmul.f32.gmra.mxu1 %v3527_v28  ;;  %278 = vmatmul.f32.gmra.mxu2 %v3527_v28 }
  0xa5   :  { %344 = vmatmul.f32.gmra.mxu3 %v3527_v28  ;;  %410 = vmatmul.f32.gmra.mxu0 %v3527_v28 }
  0xa6   :  { %720 = vmatpush.msra.mxu1 %v2828_v17 }
  0xa7   :  { %v150_v38 = vpop.f32.mrf.mxu0 }
  0xa8   :  { %v151_v41 = vadd.f32 %v150_v38, %v75_v33  ;;  %721 = vmatpush.msra.mxu1 %v2827_v18 }
  0xaa   :  { %v3569_v45 = vmax.f32 %v151_v41, 0.0  ;;  %722 = vmatpush.msra.mxu1 %v2826_v19 }
  0xac   :  { %214 = vmatmul.f32.gmra.mxu1 %v3569_v45  ;;  %281 = vmatmul.f32.gmra.mxu2 %v3569_v45 }
  0xad   :  { %347 = vmatmul.f32.gmra.mxu3 %v3569_v45  ;;  %413 = vmatmul.f32.gmra.mxu0 %v3569_v45 }
  0xae   :  { %723 = vmatpush.msra.mxu1 %v2825_v20 }
  0xaf   :  { %v153_v55 = vpop.f32.mrf.mxu0 }
  0xb0   :  { %v154_v58 = vadd.f32 %v153_v55, %v80_v54  ;;  %724 = vmatpush.msra.mxu1 %v2824_v21 }
  0xb2   :  { %v3611_v62 = vmax.f32 %v154_v58, 0.0  ;;  %725 = vmatpush.msra.mxu1 %v2823_v22 }
  0xb4   :  { %217 = vmatmul.f32.gmra.mxu1 %v3611_v62  ;;  %284 = vmatmul.f32.gmra.mxu2 %v3611_v62 }
  0xb5   :  { %350 = vmatmul.f32.gmra.mxu3 %v3611_v62  ;;  %416 = vmatmul.f32.gmra.mxu0 %v3611_v62 }
  0xb6   :  { %726 = vmatpush.msra.mxu1 %v2822_v23 }
  0xb7   :  { %v156_v4 = vpop.f32.mrf.mxu0 }
  0xb8   :  { %v157_v5 = vadd.f32 %v156_v4, %v85_v3  ;;  %727 = vmatpush.msra.mxu1 %v2821_v24 }
  0xba   :  { %v3629_v6 = vmax.f32 %v157_v5, 0.0  ;;  %728 = vmatpush.msra.mxu1 %v2820_v25 }
  0xbc   :  { %220 = vmatmul.f32.gmra.mxu1 %v3629_v6  ;;  %287 = vmatmul.f32.gmra.mxu2 %v3629_v6 }
  0xbd   :  { %353 = vmatmul.f32.gmra.mxu3 %v3629_v6  ;;  %419 = vmatmul.f32.gmra.mxu0 %v3629_v6 }
  0xbe   :  { %729 = vmatpush.msra.mxu1 %v2819_v26 }
  0xbf   :  { %v159_v8 = vpop.f32.mrf.mxu0 }
  0xc0   :  { %v160_v9 = vadd.f32 %v159_v8, %v90_v7  ;;  %730 = vmatpush.msra.mxu1 %v2818_v27 }
  0xc2   :  { %v3635_v10 = vmax.f32 %v160_v9, 0.0 }
  0xc4   :  { %223 = vmatmul.f32.gmra.mxu1 %v3635_v10  ;;  %290 = vmatmul.f32.gmra.mxu2 %v3635_v10 }
  0xc5   :  { %356 = vmatmul.f32.gmra.mxu3 %v3635_v10  ;;  %422 = vmatmul.f32.gmra.mxu0 %v3635_v10 }
  0xcc   :  { %467 = vmatmul.f32.vlgmr.msrb.gmra.mxu1 %v3401_v44  ;;  %533 = vmatmul.f32.vlgmr.msrb.gmra.mxu2 %v3401_v44 }
  0xcd   :  { %599 = vmatmul.f32.vlgmr.msrb.gmra.mxu3 %v3401_v44  ;;  %665 = vmatmul.f32.vlgmr.msra.gmra.mxu0 %v3401_v44 }
  0xd4   :  { %470 = vmatmul.f32.gmra.mxu1 %v3440_v59  ;;  %536 = vmatmul.f32.gmra.mxu2 %v3440_v59 }
  0xd5   :  { %602 = vmatmul.f32.gmra.mxu3 %v3440_v59  ;;  %668 = vmatmul.f32.gmra.mxu0 %v3440_v59 }
  0xdc   :  { %473 = vmatmul.f32.gmra.mxu1 %v3485_v12  ;;  %539 = vmatmul.f32.gmra.mxu2 %v3485_v12 }
  0xdd   :  { %605 = vmatmul.f32.gmra.mxu3 %v3485_v12  ;;  %671 = vmatmul.f32.gmra.mxu0 %v3485_v12 }
  0xe4   :  { %476 = vmatmul.f32.gmra.mxu1 %v3527_v28  ;;  %542 = vmatmul.f32.gmra.mxu2 %v3527_v28 }
  0xe5   :  { %608 = vmatmul.f32.gmra.mxu3 %v3527_v28  ;;  %674 = vmatmul.f32.gmra.mxu0 %v3527_v28 }
  0xec   :  { %479 = vmatmul.f32.gmra.mxu1 %v3569_v45  ;;  %545 = vmatmul.f32.gmra.mxu2 %v3569_v45 }
  0xed   :  { %611 = vmatmul.f32.gmra.mxu3 %v3569_v45  ;;  %677 = vmatmul.f32.gmra.mxu0 %v3569_v45 }
  0xf4   :  { %482 = vmatmul.f32.gmra.mxu1 %v3611_v62  ;;  %548 = vmatmul.f32.gmra.mxu2 %v3611_v62 }
  0xf5   :  { %614 = vmatmul.f32.gmra.mxu3 %v3611_v62  ;;  %680 = vmatmul.f32.gmra.mxu0 %v3611_v62 }
  0xfc   :  { %485 = vmatmul.f32.gmra.mxu1 %v3629_v6  ;;  %551 = vmatmul.f32.gmra.mxu2 %v3629_v6 }
  0xfd   :  { %617 = vmatmul.f32.gmra.mxu3 %v3629_v6  ;;  %683 = vmatmul.f32.gmra.mxu0 %v3629_v6 }
 0x104   :  { %488 = vmatmul.f32.gmra.mxu1 %v3635_v10  ;;  %554 = vmatmul.f32.gmra.mxu2 %v3635_v10 }
 0x105   :  { %620 = vmatmul.f32.gmra.mxu3 %v3635_v10  ;;  %686 = vmatmul.f32.gmra.mxu0 %v3635_v10 }
 0x109   :  { %v203_v29 = vpop.f32.mrf.mxu1 }
 0x10a   :  { %228 = vst.msk [vmem:[#allocation2] sm:$0xff] %vm227_vm2, %v203_v29  ;;  %v402_v30 = vpop.f32.mrf.mxu0 }
 0x10b   :  { %426 = vst.msk [vmem:[#allocation2 + $0xc0] sm:$0xff] %vm227_vm2, %v402_v30 }
 0x10c   :  { %731 = vmatmul.f32.vlgmr.msra.gmra.mxu1 %v3401_v44 }
 0x10f   :  { %v270_v31 = vpop.f32.mrf.mxu2 }
 0x110   :  { %294 = vst.msk [vmem:[#allocation2 + $0x40] sm:$0xff] %vm227_vm2, %v270_v31  ;;  %v336_v32 = vpop.f32.mrf.mxu3 }
 0x111   :  { %360 = vst.msk [vmem:[#allocation2 + $0x80] sm:$0xff] %vm227_vm2, %v336_v32  ;;  %v206_v33 = vpop.f32.mrf.mxu1 }
 0x112   :  { %229 = vst.msk [vmem:[#allocation2 + $0x8] sm:$0xff] %vm227_vm2, %v206_v33  ;;  %v405_v34 = vpop.f32.mrf.mxu0  ;;  %v868_v16 = vld [vmem:[#allocation2 + $0xc0] sm:$0xff] }
 0x113   :  { %427 = vst.msk [vmem:[#allocation2 + $0xc8] sm:$0xff] %vm227_vm2, %v405_v34 }
 0x114   :  { %734 = vmatmul.f32.gmra.mxu1 %v3440_v59 }
 0x117   :  { %v273_v35 = vpop.f32.mrf.mxu2  ;;  %v852_v23 = vld [vmem:[#allocation2 + $0x40] sm:$0xff] }
 0x118   :  { %295 = vst.msk [vmem:[#allocation2 + $0x48] sm:$0xff] %vm227_vm2, %v273_v35  ;;  %v339_v36 = vpop.f32.mrf.mxu3 }
 0x119   :  { %361 = vst.msk [vmem:[#allocation2 + $0x88] sm:$0xff] %vm227_vm2, %v339_v36  ;;  %v209_v44 = vpop.f32.mrf.mxu1 }
 0x11a   :  { %230 = vst.msk [vmem:[#allocation2 + $0x10] sm:$0xff] %vm227_vm2, %v209_v44  ;;  %v408_v37 = vpop.f32.mrf.mxu0  ;;  %v869_v11 = vld [vmem:[#allocation2 + $0xc8] sm:$0xff] }
 0x11b   :  { %428 = vst.msk [vmem:[#allocation2 + $0xd0] sm:$0xff] %vm227_vm2, %v408_v37 }
 0x11c   :  { %737 = vmatmul.f32.gmra.mxu1 %v3485_v12 }
 0x11f   :  { %v276_v38 = vpop.f32.mrf.mxu2  ;;  %v853_v21 = vld [vmem:[#allocation2 + $0x48] sm:$0xff] }
 0x120   :  { %296 = vst.msk [vmem:[#allocation2 + $0x50] sm:$0xff] %vm227_vm2, %v276_v38  ;;  %v342_v39 = vpop.f32.mrf.mxu3  ;;  %v861_v44 = vld [vmem:[#allocation2 + $0x88] sm:$0xff] }
 0x121   :  { %362 = vst.msk [vmem:[#allocation2 + $0x90] sm:$0xff] %vm227_vm2, %v342_v39  ;;  %v212_v59 = vpop.f32.mrf.mxu1  ;;  %v765_v39 = vld [vmem:[%s4807_s4 + $0x8] sm:$0xff] }
 0x122   :  { %231 = vst.msk [vmem:[#allocation2 + $0x18] sm:$0xff] %vm227_vm2, %v212_v59  ;;  %v411_v40 = vpop.f32.mrf.mxu0  ;;  %v870_v9 = vld [vmem:[#allocation2 + $0xd0] sm:$0xff] }
 0x123   :  { %429 = vst.msk [vmem:[#allocation2 + $0xd8] sm:$0xff] %vm227_vm2, %v411_v40  ;;  %v860_v40 = vld [vmem:[#allocation2 + $0x80] sm:$0xff] }
 0x124   :  { %740 = vmatmul.f32.gmra.mxu1 %v3527_v28 }
 0x127   :  { %v279_v41 = vpop.f32.mrf.mxu2  ;;  %v854_v18 = vld [vmem:[#allocation2 + $0x50] sm:$0xff] }
 0x128   :  { %297 = vst.msk [vmem:[#allocation2 + $0x58] sm:$0xff] %vm227_vm2, %v279_v41  ;;  %v345_v42 = vpop.f32.mrf.mxu3  ;;  %v862_v35 = vld [vmem:[#allocation2 + $0x90] sm:$0xff] }
 0x129   :  { %363 = vst.msk [vmem:[#allocation2 + $0x98] sm:$0xff] %vm227_vm2, %v345_v42  ;;  %v215_v12 = vpop.f32.mrf.mxu1  ;;  %v847_v38 = vld [vmem:[#allocation2 + $0x18] sm:$0xff]  ;;  %v846_v42 = vld [vmem:[#allocation2 + $0x10] sm:$0xff] }
 0x12a   :  { %232 = vst.msk [vmem:[#allocation2 + $0x20] sm:$0xff] %vm227_vm2, %v215_v12  ;;  %v414_v43 = vpop.f32.mrf.mxu0  ;;  %v871_v7 = vld [vmem:[#allocation2 + $0xd8] sm:$0xff] }
 0x12b   :  { %430 = vst.msk [vmem:[#allocation2 + $0xe0] sm:$0xff] %vm227_vm2, %v414_v43  ;;  %v845_v43 = vld [vmem:[#allocation2 + $0x8] sm:$0xff] }
 0x12c   :  { %743 = vmatmul.f32.gmra.mxu1 %v3569_v45 }
 0x12f   :  { %v282_v46 = vpop.f32.mrf.mxu2  ;;  %v855_v14 = vld [vmem:[#allocation2 + $0x58] sm:$0xff] }
 0x130   :  { %298 = vst.msk [vmem:[#allocation2 + $0x60] sm:$0xff] %vm227_vm2, %v282_v46  ;;  %v348_v47 = vpop.f32.mrf.mxu3  ;;  %v863_v33 = vld [vmem:[#allocation2 + $0x98] sm:$0xff]  ;;  %v764_v46 = vld [vmem:[%s4807_s4] sm:$0xff] }
 0x131   :  { %364 = vst.msk [vmem:[#allocation2 + $0xa0] sm:$0xff] %vm227_vm2, %v348_v47  ;;  %v218_v28 = vpop.f32.mrf.mxu1  ;;  %v848_v36 = vld [vmem:[#allocation2 + $0x20] sm:$0xff] }
 0x132   :  { %233 = vst.msk [vmem:[#allocation2 + $0x28] sm:$0xff] %vm227_vm2, %v218_v28  ;;  %v417_v48 = vpop.f32.mrf.mxu0  ;;  %v872_v3 = vld [vmem:[#allocation2 + $0xe0] sm:$0xff] }
 0x133   :  { %431 = vst.msk [vmem:[#allocation2 + $0xe8] sm:$0xff] %vm227_vm2, %v417_v48  ;;  %v844_v47 = vld [vmem:[#allocation2] sm:$0xff]  ;;  %v770_v48 = vld [vmem:[%s4807_s4 + $0x30] sm:$0xff] }
 0x134   :  { %746 = vmatmul.f32.gmra.mxu1 %v3611_v62 }
 0x137   :  { %v285_v49 = vpop.f32.mrf.mxu2 }
 0x138   :  { %299 = vst.msk [vmem:[#allocation2 + $0x68] sm:$0xff] %vm227_vm2, %v285_v49  ;;  %v351_v50 = vpop.f32.mrf.mxu3  ;;  %v864_v29 = vld [vmem:[#allocation2 + $0xa0] sm:$0xff] }
 0x139   :  { %365 = vst.msk [vmem:[#allocation2 + $0xa8] sm:$0xff] %vm227_vm2, %v351_v50  ;;  %v221_v45 = vpop.f32.mrf.mxu1  ;;  %v849_v34 = vld [vmem:[#allocation2 + $0x28] sm:$0xff] }
 0x13a   :  { %234 = vst.msk [vmem:[#allocation2 + $0x30] sm:$0xff] %vm227_vm2, %v221_v45  ;;  %v420_v51 = vpop.f32.mrf.mxu0  ;;  %v873_v63 = vld [vmem:[#allocation2 + $0xe8] sm:$0xff] }
 0x13b   :  { %432 = vst.msk [vmem:[#allocation2 + $0xf0] sm:$0xff] %vm227_vm2, %v420_v51  ;;  %v769_v51 = vld [vmem:[%s4807_s4 + $0x28] sm:$0xff] }
 0x13c   :  { %749 = vmatmul.f32.gmra.mxu1 %v3629_v6 }
 0x13f   :  { %v288_v52 = vpop.f32.mrf.mxu2  ;;  %v857_v8 = vld [vmem:[#allocation2 + $0x68] sm:$0xff] }
 0x140   :  { %300 = vst.msk [vmem:[#allocation2 + $0x70] sm:$0xff] %vm227_vm2, %v288_v52  ;;  %v354_v53 = vpop.f32.mrf.mxu3  ;;  %v865_v24 = vld [vmem:[#allocation2 + $0xa8] sm:$0xff] }
 0x141   :  { %366 = vst.msk [vmem:[#allocation2 + $0xb0] sm:$0xff] %vm227_vm2, %v354_v53  ;;  %v224_v54 = vpop.f32.mrf.mxu1  ;;  %v850_v31 = vld [vmem:[#allocation2 + $0x30] sm:$0xff]  ;;  %v775_v53 = vld [vmem:[%s4807_s4 + $0x58] sm:$0xff] }
 0x142   :  { %235 = vst.msk [vmem:[#allocation2 + $0x38] sm:$0xff] %vm227_vm2, %v224_v54  ;;  %v423_v55 = vpop.f32.mrf.mxu0  ;;  %v874_v62 = vld [vmem:[#allocation2 + $0xf0] sm:$0xff] }
 0x143   :  { %433 = vst.msk [vmem:[#allocation2 + $0xf8] sm:$0xff] %vm227_vm2, %v423_v55 }
 0x144   :  { %752 = vmatmul.f32.gmra.mxu1 %v3635_v10  ;;  %v856_v10 = vld [vmem:[#allocation2 + $0x60] sm:$0xff] }
 0x147   :  { %v291_v56 = vpop.f32.mrf.mxu2  ;;  %v858_v5 = vld [vmem:[#allocation2 + $0x70] sm:$0xff] }
 0x148   :  { %301 = vst.msk [vmem:[#allocation2 + $0x78] sm:$0xff] %vm227_vm2, %v291_v56  ;;  %v357_v57 = vpop.f32.mrf.mxu3  ;;  %v866_v22 = vld [vmem:[#allocation2 + $0xb0] sm:$0xff] }
 0x149   :  { %367 = vst.msk [vmem:[#allocation2 + $0xb8] sm:$0xff] %vm227_vm2, %v357_v57  ;;  %v468_v58 = vpop.f32.mrf.mxu1  ;;  %v851_v26 = vld [vmem:[#allocation2 + $0x38] sm:$0xff]  ;;  %v774_v57 = vld [vmem:[%s4807_s4 + $0x50] sm:$0xff] }
 0x14a   :  { %492 = vst.msk [vmem:[#allocation2 + $0x100] sm:$0xff] %vm227_vm2, %v468_v58  ;;  %v666_v60 = vpop.f32.mrf.mxu0  ;;  %v875_v61 = vld [vmem:[#allocation2 + $0xf8] sm:$0xff] }
 0x14b   :  { %690 = vst.msk [vmem:[#allocation2 + $0x1c0] sm:$0xff] %vm227_vm2, %v666_v60  ;;  %1126 = vmatpush.msra.mxu3 %v875_v61  ;;  %v780_v60 = vld [vmem:[%s4807_s4 + $0x80] sm:$0xff] }
 0x14d   :  { %1127 = vmatpush.msra.mxu3 %v874_v62 }
 0x14f   :  { %1128 = vmatpush.msra.mxu3 %v873_v63  ;;  %v534_v0 = vpop.f32.mrf.mxu2  ;;  %v859_v1 = vld [vmem:[#allocation2 + $0x78] sm:$0xff] }
 0x150   :  { %558 = vst.msk [vmem:[#allocation2 + $0x140] sm:$0xff] %vm227_vm2, %v534_v0  ;;  %v600_v2 = vpop.f32.mrf.mxu3  ;;  %1061 = vmatpush.msra.mxu2 %v859_v1  ;;  %v867_v20 = vld [vmem:[#allocation2 + $0xb8] sm:$0xff] }
 0x151   :  { %624 = vst.msk [vmem:[#allocation2 + $0x180] sm:$0xff] %vm227_vm2, %v600_v2  ;;  %1129 = vmatpush.msra.mxu3 %v872_v3  ;;  %v471_v4 = vpop.f32.mrf.mxu1  ;;  %v779_v0 = vld [vmem:[%s4807_s4 + $0x78] sm:$0xff]  ;;  %v785_v2 = vld [vmem:[%s4807_s4 + $0xa8] sm:$0xff] }
 0x152   :  { %493 = vst.msk [vmem:[#allocation2 + $0x108] sm:$0xff] %vm227_vm2, %v471_v4  ;;  %v669_v6 = vpop.f32.mrf.mxu0  ;;  %1062 = vmatpush.msra.mxu2 %v858_v5 }
 0x153   :  { %691 = vst.msk [vmem:[#allocation2 + $0x1c8] sm:$0xff] %vm227_vm2, %v669_v6  ;;  %1130 = vmatpush.msra.mxu3 %v871_v7  ;;  %v784_v7 = vld [vmem:[%s4807_s4 + $0xa0] sm:$0xff] }
 0x154   :  { %1063 = vmatpush.msra.mxu2 %v857_v8 }
 0x155   :  { %1131 = vmatpush.msra.mxu3 %v870_v9 }
 0x156   :  { %1064 = vmatpush.msra.mxu2 %v856_v10  ;;  %v790_v10 = vld [vmem:[%s4807_s4 + $0xd0] sm:$0xff] }
 0x157   :  { %1132 = vmatpush.msra.mxu3 %v869_v11  ;;  %v537_v13 = vpop.f32.mrf.mxu2 }
 0x158   :  { %559 = vst.msk [vmem:[#allocation2 + $0x148] sm:$0xff] %vm227_vm2, %v537_v13  ;;  %v603_v15 = vpop.f32.mrf.mxu3  ;;  %1065 = vmatpush.msra.mxu2 %v855_v14 }
 0x159   :  { %625 = vst.msk [vmem:[#allocation2 + $0x188] sm:$0xff] %vm227_vm2, %v603_v15  ;;  %1133 = vmatpush.msra.mxu3 %v868_v16  ;;  %v474_v17 = vpop.f32.mrf.mxu1 }
 0x15a   :  { %494 = vst.msk [vmem:[#allocation2 + $0x110] sm:$0xff] %vm227_vm2, %v474_v17  ;;  %v672_v19 = vpop.f32.mrf.mxu0  ;;  %1066 = vmatpush.msra.mxu2 %v854_v18  ;;  %v789_v18 = vld [vmem:[%s4807_s4 + $0xc8] sm:$0xff] }
 0x15b   :  { %692 = vst.msk [vmem:[#allocation2 + $0x1d0] sm:$0xff] %vm227_vm2, %v672_v19  ;;  %1134 = vmatpush.msra.mxu3 %v867_v20  ;;  %v901_v20 = vld [vmem:[#allocation2 + $0x1c8] sm:$0xff] }
 0x15c   :  { %1067 = vmatpush.msra.mxu2 %v853_v21 }
 0x15d   :  { %1135 = vmatpush.msra.mxu3 %v866_v22  ;;  %v795_v22 = vld [vmem:[%s4807_s4 + $0xf8] sm:$0xff] }
 0x15e   :  { %1068 = vmatpush.msra.mxu2 %v852_v23  ;;  %v900_v23 = vld [vmem:[#allocation2 + $0x1c0] sm:$0xff] }
 0x15f   :  { %1136 = vmatpush.msra.mxu3 %v865_v24  ;;  %v540_v25 = vpop.f32.mrf.mxu2 }
 0x160   :  { %560 = vst.msk [vmem:[#allocation2 + $0x150] sm:$0xff] %vm227_vm2, %v540_v25  ;;  %v606_v27 = vpop.f32.mrf.mxu3  ;;  %1069 = vmatpush.msra.mxu2 %v851_v26 }
 0x161   :  { %626 = vst.msk [vmem:[#allocation2 + $0x190] sm:$0xff] %vm227_vm2, %v606_v27  ;;  %1137 = vmatpush.msra.mxu3 %v864_v29  ;;  %v477_v30 = vpop.f32.mrf.mxu1  ;;  %v885_v27 = vld [vmem:[#allocation2 + $0x148] sm:$0xff] }
 0x162   :  { %495 = vst.msk [vmem:[#allocation2 + $0x118] sm:$0xff] %vm227_vm2, %v477_v30  ;;  %v675_v32 = vpop.f32.mrf.mxu0  ;;  %1070 = vmatpush.msra.mxu2 %v850_v31  ;;  %v902_v17 = vld [vmem:[#allocation2 + $0x1d0] sm:$0xff]  ;;  %v884_v31 = vld [vmem:[#allocation2 + $0x140] sm:$0xff] }
 0x163   :  { %693 = vst.msk [vmem:[#allocation2 + $0x1d8] sm:$0xff] %vm227_vm2, %v675_v32  ;;  %1138 = vmatpush.msra.mxu3 %v863_v33  ;;  %v794_v30 = vld [vmem:[%s4807_s4 + $0xf0] sm:$0xff] }
 0x164   :  { %1071 = vmatpush.msra.mxu2 %v849_v34  ;;  %v800_v34 = vld [vmem:[%s4807_s4 + $0x120] sm:$0xff] }
 0x165   :  { %1139 = vmatpush.msra.mxu3 %v862_v35 }
 0x166   :  { %1072 = vmatpush.msra.mxu2 %v848_v36 }
 0x167   :  { %1140 = vmatpush.msra.mxu3 %v861_v44  ;;  %v543_v37 = vpop.f32.mrf.mxu2  ;;  %v886_v25 = vld [vmem:[#allocation2 + $0x150] sm:$0xff] }
 0x168   :  { %561 = vst.msk [vmem:[#allocation2 + $0x158] sm:$0xff] %vm227_vm2, %v543_v37  ;;  %v609_v59 = vpop.f32.mrf.mxu3  ;;  %1073 = vmatpush.msra.mxu2 %v847_v38 }
 0x169   :  { %627 = vst.msk [vmem:[#allocation2 + $0x198] sm:$0xff] %vm227_vm2, %v609_v59  ;;  %1141 = vmatpush.msra.mxu3 %v860_v40  ;;  %v480_v41 = vpop.f32.mrf.mxu1  ;;  %v799_v59 = vld [vmem:[%s4807_s4 + $0x118] sm:$0xff] }
 0x16a   :  { %496 = vst.msk [vmem:[#allocation2 + $0x120] sm:$0xff] %vm227_vm2, %v480_v41  ;;  %v678_v12 = vpop.f32.mrf.mxu0  ;;  %1074 = vmatpush.msra.mxu2 %v846_v42  ;;  %1142 = vmatmul.f32.vlgmr.msra.gmra.mxu3 %v765_v39  ;;  %v903_v15 = vld [vmem:[#allocation2 + $0x1d8] sm:$0xff]  ;;  %v894_v39 = vld [vmem:[#allocation2 + $0x190] sm:$0xff]  ;;  %v893_v41 = vld [vmem:[#allocation2 + $0x188] sm:$0xff] }
 0x16b   :  { %694 = vst.msk [vmem:[#allocation2 + $0x1e0] sm:$0xff] %vm227_vm2, %v678_v12  ;;  %v879_v42 = vld [vmem:[#allocation2 + $0x118] sm:$0xff]  ;;  %v805_v12 = vld [vmem:[%s4807_s4 + $0x148] sm:$0xff] }
 0x16c   :  { %1075 = vmatpush.msra.mxu2 %v845_v43  ;;  %v892_v43 = vld [vmem:[#allocation2 + $0x180] sm:$0xff] }
 0x16e   :  { %1076 = vmatpush.msra.mxu2 %v844_v47 }
 0x16f   :  { %v546_v28 = vpop.f32.mrf.mxu2  ;;  %1077 = vmatmul.f32.vlgmr.msra.gmra.mxu2 %v764_v46  ;;  %v887_v21 = vld [vmem:[#allocation2 + $0x158] sm:$0xff] }
 0x170   :  { %562 = vst.msk [vmem:[#allocation2 + $0x160] sm:$0xff] %vm227_vm2, %v546_v28  ;;  %v612_v49 = vpop.f32.mrf.mxu3  ;;  %v895_v37 = vld [vmem:[#allocation2 + $0x198] sm:$0xff]  ;;  %v878_v28 = vld [vmem:[#allocation2 + $0x110] sm:$0xff] }
 0x171   :  { %628 = vst.msk [vmem:[#allocation2 + $0x1a0] sm:$0xff] %vm227_vm2, %v612_v49  ;;  %v483_v50 = vpop.f32.mrf.mxu1  ;;  %v880_v40 = vld [vmem:[#allocation2 + $0x120] sm:$0xff]  ;;  %v767_v46 = vld [vmem:[%s4807_s4 + $0x18] sm:$0xff] }
 0x172   :  { %497 = vst.msk [vmem:[#allocation2 + $0x128] sm:$0xff] %vm227_vm2, %v483_v50  ;;  %v681_v45 = vpop.f32.mrf.mxu0  ;;  %1145 = vmatmul.f32.gmra.mxu3 %v770_v48  ;;  %v904_v11 = vld [vmem:[#allocation2 + $0x1e0] sm:$0xff]  ;;  %v877_v48 = vld [vmem:[#allocation2 + $0x108] sm:$0xff]  ;;  %v766_v50 = vld [vmem:[%s4807_s4 + $0x10] sm:$0xff] }
 0x173   :  { %695 = vst.msk [vmem:[#allocation2 + $0x1e8] sm:$0xff] %vm227_vm2, %v681_v45  ;;  %v804_v49 = vld [vmem:[%s4807_s4 + $0x140] sm:$0xff] }
 0x174   :  { %v876_v45 = vld [vmem:[#allocation2 + $0x100] sm:$0xff] }
 0x177   :  { %v549_v52 = vpop.f32.mrf.mxu2  ;;  %1080 = vmatmul.f32.gmra.mxu2 %v769_v51  ;;  %v888_v19 = vld [vmem:[#allocation2 + $0x160] sm:$0xff]  ;;  %v810_v51 = vld [vmem:[%s4807_s4 + $0x170] sm:$0xff] }
 0x178   :  { %563 = vst.msk [vmem:[#allocation2 + $0x168] sm:$0xff] %vm227_vm2, %v549_v52  ;;  %v615_v54 = vpop.f32.mrf.mxu3  ;;  %v896_v35 = vld [vmem:[#allocation2 + $0x1a0] sm:$0xff] }
 0x179   :  { %629 = vst.msk [vmem:[#allocation2 + $0x1a8] sm:$0xff] %vm227_vm2, %v615_v54  ;;  %v486_v55 = vpop.f32.mrf.mxu1  ;;  %v881_v38 = vld [vmem:[#allocation2 + $0x128] sm:$0xff]  ;;  %v772_v52 = vld [vmem:[%s4807_s4 + $0x40] sm:$0xff] }
 0x17a   :  { %498 = vst.msk [vmem:[#allocation2 + $0x130] sm:$0xff] %vm227_vm2, %v486_v55  ;;  %v684_v56 = vpop.f32.mrf.mxu0  ;;  %1148 = vmatmul.f32.gmra.mxu3 %v775_v53  ;;  %v905_v8 = vld [vmem:[#allocation2 + $0x1e8] sm:$0xff]  ;;  %v771_v55 = vld [vmem:[%s4807_s4 + $0x38] sm:$0xff] }
 0x17b   :  { %696 = vst.msk [vmem:[#allocation2 + $0x1f0] sm:$0xff] %vm227_vm2, %v684_v56  ;;  %v809_v54 = vld [vmem:[%s4807_s4 + $0x168] sm:$0xff]  ;;  %v815_v56 = vld [vmem:[%s4807_s4 + $0x198] sm:$0xff] }
 0x17f   :  { %v552_v58 = vpop.f32.mrf.mxu2  ;;  %1083 = vmatmul.f32.gmra.mxu2 %v774_v57  ;;  %v889_v16 = vld [vmem:[#allocation2 + $0x168] sm:$0xff] }
 0x180   :  { %564 = vst.msk [vmem:[#allocation2 + $0x170] sm:$0xff] %vm227_vm2, %v552_v58  ;;  %v618_v61 = vpop.f32.mrf.mxu3  ;;  %v897_v32 = vld [vmem:[#allocation2 + $0x1a8] sm:$0xff] }
 0x181   :  { %630 = vst.msk [vmem:[#allocation2 + $0x1b0] sm:$0xff] %vm227_vm2, %v618_v61  ;;  %v489_v62 = vpop.f32.mrf.mxu1  ;;  %v882_v44 = vld [vmem:[#allocation2 + $0x130] sm:$0xff]  ;;  %v777_v57 = vld [vmem:[%s4807_s4 + $0x68] sm:$0xff]  ;;  %v776_v61 = vld [vmem:[%s4807_s4 + $0x60] sm:$0xff] }
 0x182   :  { %499 = vst.msk [vmem:[#allocation2 + $0x138] sm:$0xff] %vm227_vm2, %v489_v62  ;;  %v687_v63 = vpop.f32.mrf.mxu0  ;;  %1151 = vmatmul.f32.gmra.mxu3 %v780_v60  ;;  %v906_v6 = vld [vmem:[#allocation2 + $0x1f0] sm:$0xff]  ;;  %v820_v62 = vld [vmem:[%s4807_s4 + $0x1c0] sm:$0xff] }
 0x183   :  { %697 = vst.msk [vmem:[#allocation2 + $0x1f8] sm:$0xff] %vm227_vm2, %v687_v63  ;;  %v814_v60 = vld [vmem:[%s4807_s4 + $0x190] sm:$0xff] }
 0x184   :  { %v782_v63 = vld [vmem:[%s4807_s4 + $0x90] sm:$0xff] }
 0x187   :  { %v555_v1 = vpop.f32.mrf.mxu2  ;;  %1086 = vmatmul.f32.gmra.mxu2 %v779_v0  ;;  %v890_v14 = vld [vmem:[#allocation2 + $0x170] sm:$0xff] }
 0x188   :  { %565 = vst.msk [vmem:[#allocation2 + $0x178] sm:$0xff] %vm227_vm2, %v555_v1  ;;  %v621_v3 = vpop.f32.mrf.mxu3  ;;  %v898_v29 = vld [vmem:[#allocation2 + $0x1b0] sm:$0xff]  ;;  %v819_v1 = vld [vmem:[%s4807_s4 + $0x1b8] sm:$0xff] }
 0x189   :  { %631 = vst.msk [vmem:[#allocation2 + $0x1b8] sm:$0xff] %vm227_vm2, %v621_v3  ;;  %v732_v4 = vpop.f32.mrf.mxu1  ;;  %v883_v33 = vld [vmem:[#allocation2 + $0x138] sm:$0xff]  ;;  %v825_v3 = vld [vmem:[%s4807_s4 + $0x1e8] sm:$0xff] }
 0x18a   :  { %756 = vst.msk [vmem:[#allocation2 + $0x200] sm:$0xff] %vm227_vm2, %v732_v4  ;;  %v907_v5 = vld [vmem:[#allocation2 + $0x1f8] sm:$0xff]  ;;  %1154 = vmatmul.f32.gmra.mxu3 %v785_v2  ;;  %v781_v2 = vld [vmem:[%s4807_s4 + $0x88] sm:$0xff] }
 0x18b   :  { %1256 = vmatpush.msrb.mxu1 %v907_v5  ;;  %v787_v4 = vld [vmem:[%s4807_s4 + $0xb8] sm:$0xff] }
 0x18d   :  { %1257 = vmatpush.msrb.mxu1 %v906_v6 }
 0x18f   :  { %1258 = vmatpush.msrb.mxu1 %v905_v8  ;;  %1089 = vmatmul.f32.gmra.mxu2 %v784_v7  ;;  %v891_v9 = vld [vmem:[#allocation2 + $0x178] sm:$0xff]  ;;  %v824_v7 = vld [vmem:[%s4807_s4 + $0x1e0] sm:$0xff]  ;;  %v786_v8 = vld [vmem:[%s4807_s4 + $0xb0] sm:$0xff] }
 0x190   :  { %1191 = vmatpush.msrb.mxu0 %v891_v9  ;;  %v899_v26 = vld [vmem:[#allocation2 + $0x1b8] sm:$0xff] }
 0x191   :  { %1259 = vmatpush.msrb.mxu1 %v904_v11  ;;  %v735_v13 = vpop.f32.mrf.mxu1  ;;  %v830_v11 = vld [vmem:[%s4807_s4 + $0x210] sm:$0xff] }
 0x192   :  { %757 = vst.msk [vmem:[#allocation2 + $0x208] sm:$0xff] %vm227_vm2, %v735_v13  ;;  %1192 = vmatpush.msrb.mxu0 %v890_v14  ;;  %1157 = vmatmul.f32.gmra.mxu3 %v790_v10  ;;  %v792_v13 = vld [vmem:[%s4807_s4 + $0xe0] sm:$0xff] }
 0x193   :  { %1260 = vmatpush.msrb.mxu1 %v903_v15 }
 0x194   :  { %1193 = vmatpush.msrb.mxu0 %v889_v16  ;;  %v829_v16 = vld [vmem:[%s4807_s4 + $0x208] sm:$0xff] }
 0x195   :  { %1261 = vmatpush.msrb.mxu1 %v902_v17  ;;  %v791_v17 = vld [vmem:[%s4807_s4 + $0xd8] sm:$0xff] }
 0x196   :  { %1194 = vmatpush.msrb.mxu0 %v888_v19  ;;  %v908_v19 = vld [vmem:[#allocation2 + $0x200] sm:$0xff] }
 0x197   :  { %1262 = vmatpush.msrb.mxu1 %v901_v20  ;;  %1092 = vmatmul.f32.gmra.mxu2 %v789_v18  ;;  %v835_v20 = vld [vmem:[%s4807_s4 + $0x238] sm:$0xff] }
 0x198   :  { %1195 = vmatpush.msrb.mxu0 %v887_v21  ;;  %v797_v21 = vld [vmem:[%s4807_s4 + $0x108] sm:$0xff] }
 0x199   :  { %1263 = vmatpush.msrb.mxu1 %v900_v23  ;;  %v738_v24 = vpop.f32.mrf.mxu1  ;;  %v909_v18 = vld [vmem:[#allocation2 + $0x208] sm:$0xff]  ;;  %v796_v23 = vld [vmem:[%s4807_s4 + $0x100] sm:$0xff] }
 0x19a   :  { %758 = vst.msk [vmem:[#allocation2 + $0x210] sm:$0xff] %vm227_vm2, %v738_v24  ;;  %1196 = vmatpush.msrb.mxu0 %v886_v25  ;;  %1160 = vmatmul.f32.gmra.mxu3 %v795_v22  ;;  %v834_v22 = vld [vmem:[%s4807_s4 + $0x230] sm:$0xff]  ;;  %v840_v24 = vld [vmem:[%s4807_s4 + $0x260] sm:$0xff] }
 0x19b   :  { %1264 = vmatpush.msrb.mxu1 %v899_v26  ;;  %v802_v25 = vld [vmem:[%s4807_s4 + $0x130] sm:$0xff]  ;;  %v839_v26 = vld [vmem:[%s4807_s4 + $0x258] sm:$0xff] }
 0x19c   :  { %1197 = vmatpush.msrb.mxu0 %v885_v27  ;;  %v801_v27 = vld [vmem:[%s4807_s4 + $0x128] sm:$0xff] }
 0x19d   :  { %1265 = vmatpush.msrb.mxu1 %v898_v29  ;;  %v807_v29 = vld [vmem:[%s4807_s4 + $0x158] sm:$0xff] }
 0x19e   :  { %1198 = vmatpush.msrb.mxu0 %v884_v31  ;;  %v768_v31 = vld [vmem:[%s4807_s4 + $0x20] sm:$0xff] }
 0x19f   :  { %1266 = vmatpush.msrb.mxu1 %v897_v32  ;;  %1095 = vmatmul.f32.gmra.mxu2 %v794_v30  ;;  %v806_v30 = vld [vmem:[%s4807_s4 + $0x150] sm:$0xff]  ;;  %v812_v32 = vld [vmem:[%s4807_s4 + $0x180] sm:$0xff] }
 0x1a0   :  { %1199 = vmatpush.msrb.mxu0 %v883_v33 }
 0x1a1   :  { %1267 = vmatpush.msrb.mxu1 %v896_v35  ;;  %v741_v36 = vpop.f32.mrf.mxu1  ;;  %v910_v15 = vld [vmem:[#allocation2 + $0x210] sm:$0xff]  ;;  %v773_v35 = vld [vmem:[%s4807_s4 + $0x48] sm:$0xff] }
 0x1a2   :  { %759 = vst.msk [vmem:[#allocation2 + $0x218] sm:$0xff] %vm227_vm2, %v741_v36  ;;  %1200 = vmatpush.msrb.mxu0 %v882_v44  ;;  %1163 = vmatmul.f32.gmra.mxu3 %v800_v34  ;;  %v811_v34 = vld [vmem:[%s4807_s4 + $0x178] sm:$0xff]  ;;  %v817_v36 = vld [vmem:[%s4807_s4 + $0x1a8] sm:$0xff] }
 0x1a3   :  { %1268 = vmatpush.msrb.mxu1 %v895_v37  ;;  %v816_v37 = vld [vmem:[%s4807_s4 + $0x1a0] sm:$0xff] }
 0x1a4   :  { %1201 = vmatpush.msrb.mxu0 %v881_v38  ;;  %v778_v38 = vld [vmem:[%s4807_s4 + $0x70] sm:$0xff] }
 0x1a5   :  { %1269 = vmatpush.msrb.mxu1 %v894_v39  ;;  %v822_v39 = vld [vmem:[%s4807_s4 + $0x1d0] sm:$0xff] }
 0x1a6   :  { %1202 = vmatpush.msrb.mxu0 %v880_v40  ;;  %v821_v40 = vld [vmem:[%s4807_s4 + $0x1c8] sm:$0xff] }
 0x1a7   :  { %1270 = vmatpush.msrb.mxu1 %v893_v41  ;;  %1098 = vmatmul.f32.gmra.mxu2 %v799_v59  ;;  %v783_v41 = vld [vmem:[%s4807_s4 + $0x98] sm:$0xff] }
 0x1a8   :  { %1203 = vmatpush.msrb.mxu0 %v879_v42  ;;  %v827_v42 = vld [vmem:[%s4807_s4 + $0x1f8] sm:$0xff] }
 0x1a9   :  { %1271 = vmatpush.msrb.mxu1 %v892_v43  ;;  %v744_v47 = vpop.f32.mrf.mxu1  ;;  %v911_v14 = vld [vmem:[#allocation2 + $0x218] sm:$0xff]  ;;  %v826_v43 = vld [vmem:[%s4807_s4 + $0x1f0] sm:$0xff] }
 0x1aa   :  { %760 = vst.msk [vmem:[#allocation2 + $0x220] sm:$0xff] %vm227_vm2, %v744_v47  ;;  %1204 = vmatpush.msrb.mxu0 %v878_v28  ;;  %1166 = vmatmul.f32.gmra.mxu3 %v805_v12  ;;  %v832_v47 = vld [vmem:[%s4807_s4 + $0x220] sm:$0xff] }
 0x1ab   :  { %1272 = vmatmul.f32.vlgmr.msrb.gmra.mxu1 %v767_v46  ;;  %v788_v46 = vld [vmem:[%s4807_s4 + $0xc0] sm:$0xff] }
 0x1ac   :  { %1205 = vmatpush.msrb.mxu0 %v877_v48  ;;  %v831_v48 = vld [vmem:[%s4807_s4 + $0x218] sm:$0xff] }
 0x1ae   :  { %1206 = vmatpush.msrb.mxu0 %v876_v45 }
 0x1af   :  { %1101 = vmatmul.f32.gmra.mxu2 %v804_v49  ;;  %1207 = vmatmul.f32.vlgmr.msrb.gmra.mxu0 %v766_v50  ;;  %v793_v49 = vld [vmem:[%s4807_s4 + $0xe8] sm:$0xff] }
 0x1b0   :  { %v837_v50 = vld [vmem:[%s4807_s4 + $0x248] sm:$0xff] }
 0x1b1   :  { %v747_v53 = vpop.f32.mrf.mxu1  ;;  %v912_v10 = vld [vmem:[#allocation2 + $0x220] sm:$0xff] }
 0x1b2   :  { %761 = vst.msk [vmem:[#allocation2 + $0x228] sm:$0xff] %vm227_vm2, %v747_v53  ;;  %1169 = vmatmul.f32.gmra.mxu3 %v810_v51  ;;  %v836_v51 = vld [vmem:[%s4807_s4 + $0x240] sm:$0xff]  ;;  %v842_v53 = vld [vmem:[%s4807_s4 + $0x270] sm:$0xff] }
 0x1b3   :  { %1275 = vmatmul.f32.gmra.mxu1 %v772_v52  ;;  %v798_v52 = vld [vmem:[%s4807_s4 + $0x110] sm:$0xff] }
 0x1b7   :  { %1104 = vmatmul.f32.gmra.mxu2 %v809_v54  ;;  %1210 = vmatmul.f32.gmra.mxu0 %v771_v55  ;;  %v841_v55 = vld [vmem:[%s4807_s4 + $0x268] sm:$0xff] }
 0x1b9   :  { %v750_v58 = vpop.f32.mrf.mxu1  ;;  %v913_v9 = vld [vmem:[#allocation2 + $0x228] sm:$0xff] }
 0x1ba   :  { %762 = vst.msk [vmem:[#allocation2 + $0x230] sm:$0xff] %vm227_vm2, %v750_v58  ;;  %1172 = vmatmul.f32.gmra.mxu3 %v815_v56  ;;  %v803_v56 = vld [vmem:[%s4807_s4 + $0x138] sm:$0xff]  ;;  %v808_v58 = vld [vmem:[%s4807_s4 + $0x160] sm:$0xff] }
 0x1bb   :  { %1278 = vmatmul.f32.gmra.mxu1 %v777_v57 }
 0x1bf   :  { %1107 = vmatmul.f32.gmra.mxu2 %v814_v60  ;;  %1213 = vmatmul.f32.gmra.mxu0 %v776_v61  ;;  %v1405_v61 = vld [vmem:[%s4808_s6 + $0x18] sm:$0xff] }
 0x1c0   :  { %1466 = vmatpush.msrb.mxu3 %v1405_v61  ;;  %v945_v61 = vpop.permute.xlu1 %944 }
 0x1c1   :  { %v753_v0 = vpop.f32.mrf.mxu1  ;;  %v914_v6 = vld [vmem:[#allocation2 + $0x230] sm:$0xff] }
 0x1c2   :  { %763 = vst.msk [vmem:[#allocation2 + $0x238] sm:$0xff] %vm227_vm2, %v753_v0  ;;  %1175 = vmatmul.f32.gmra.mxu3 %v820_v62  ;;  %v813_v62 = vld [vmem:[%s4807_s4 + $0x188] sm:$0xff]  ;;  %v818_v0 = vld [vmem:[%s4807_s4 + $0x1b0] sm:$0xff] }
 0x1c3   :  { %1281 = vmatmul.f32.gmra.mxu1 %v782_v63 }
 0x1c7   :  { %1110 = vmatmul.f32.gmra.mxu2 %v819_v1  ;;  %1216 = vmatmul.f32.gmra.mxu0 %v781_v2  ;;  %v823_v2 = vld [vmem:[%s4807_s4 + $0x1d8] sm:$0xff] }
 0x1c9   :  { %v915_v5 = vld [vmem:[#allocation2 + $0x238] sm:$0xff] }
 0x1ca   :  { %1329 = vmatpush.msrb.mxu2 %v915_v5  ;;  %1178 = vmatmul.f32.gmra.mxu3 %v825_v3 }
 0x1cb   :  { %1284 = vmatmul.f32.gmra.mxu1 %v787_v4 }
 0x1cc   :  { %1330 = vmatpush.msrb.mxu2 %v914_v6  ;;  %v828_v6 = vld [vmem:[%s4807_s4 + $0x200] sm:$0xff] }
 0x1ce   :  { %1331 = vmatpush.msrb.mxu2 %v913_v9  ;;  %v2909_v9 = vld [vmem:[%s4808_s6 + $0x78] sm:$0xff] }
 0x1cf   :  { %1113 = vmatmul.f32.gmra.mxu2 %v824_v7  ;;  %1219 = vmatmul.f32.gmra.mxu0 %v786_v8  ;;  %v2869_v7 = vld [vmem:[%s4808_s6 + $0x38] sm:$0xff] }
 0x1d0   :  { %1332 = vmatpush.msrb.mxu2 %v912_v10  ;;  %v2889_v8 = vld [vmem:[%s4808_s6 + $0x58] sm:$0xff]  ;;  %1553 = vmatpush.msra.mxu0 %v2869_v7 }
 0x1d1   :  { %1639 = vmatpush.msra.mxu1 %v2889_v8 }
 0x1d2   :  { %1333 = vmatpush.msrb.mxu2 %v911_v14  ;;  %1181 = vmatmul.f32.gmra.mxu3 %v830_v11  ;;  %v2868_v14 = vld [vmem:[%s4808_s6 + $0x30] sm:$0xff] }
 0x1d3   :  { %1287 = vmatmul.f32.gmra.mxu1 %v792_v13  ;;  %v1404_v13 = vld [vmem:[%s4808_s6 + $0x10] sm:$0xff]  ;;  %1554 = vmatpush.msra.mxu0 %v2868_v14 }
 0x1d4   :  { %1334 = vmatpush.msrb.mxu2 %v910_v15  ;;  %v2888_v15 = vld [vmem:[%s4808_s6 + $0x50] sm:$0xff]  ;;  %1467 = vmatpush.msrb.mxu3 %v1404_v13 }
 0x1d5   :  { %1640 = vmatpush.msra.mxu1 %v2888_v15 }
 0x1d6   :  { %1335 = vmatpush.msrb.mxu2 %v909_v18 }
 0x1d7   :  { %1116 = vmatmul.f32.gmra.mxu2 %v829_v16  ;;  %1222 = vmatmul.f32.gmra.mxu0 %v791_v17  ;;  %v833_v16 = vld [vmem:[%s4807_s4 + $0x228] sm:$0xff]  ;;  %v2908_v17 = vld [vmem:[%s4808_s6 + $0x70] sm:$0xff] }
 0x1d8   :  { %1336 = vmatpush.msrb.mxu2 %v908_v19  ;;  %v1403_v19 = vld [vmem:[%s4808_s6 + $0x8] sm:$0xff] }
 0x1d9   :  { %1468 = vmatpush.msrb.mxu3 %v1403_v19 }
 0x1da   :  { %1184 = vmatmul.f32.gmra.mxu3 %v835_v20  ;;  %1725 = vmatpush.msra.mxu2 %v2909_v9  ;;  %v2867_v20 = vld [vmem:[%s4808_s6 + $0x28] sm:$0xff] }
 0x1db   :  { %1290 = vmatmul.f32.gmra.mxu1 %v797_v21  ;;  %v2887_v21 = vld [vmem:[%s4808_s6 + $0x48] sm:$0xff]  ;;  %1555 = vmatpush.msra.mxu0 %v2867_v20 }
 0x1dc   :  { %1726 = vmatpush.msra.mxu2 %v2908_v17  ;;  %1641 = vmatpush.msra.mxu1 %v2887_v21 }
 0x1df   :  { %1119 = vmatmul.f32.gmra.mxu2 %v834_v22  ;;  %1225 = vmatmul.f32.gmra.mxu0 %v796_v23  ;;  %v2907_v22 = vld [vmem:[%s4808_s6 + $0x68] sm:$0xff] }
 0x1e0   :  { %1727 = vmatpush.msra.mxu2 %v2907_v22 }
 0x1e2   :  { %1187 = vmatmul.f32.gmra.mxu3 %v840_v24  ;;  %v1402_v24 = vld [vmem:[%s4808_s6] sm:$0xff] }
 0x1e3   :  { %1293 = vmatmul.f32.gmra.mxu1 %v802_v25  ;;  %v2866_v25 = vld [vmem:[%s4808_s6 + $0x20] sm:$0xff]  ;;  %1469 = vmatpush.msrb.mxu3 %v1402_v24 }
 0x1e4   :  { %1556 = vmatpush.msra.mxu0 %v2866_v25 }
 0x1e7   :  { %1122 = vmatmul.f32.gmra.mxu2 %v839_v26  ;;  %1228 = vmatmul.f32.gmra.mxu0 %v801_v27  ;;  %v2886_v26 = vld [vmem:[%s4808_s6 + $0x40] sm:$0xff] }
 0x1e8   :  { %v2906_v27 = vld [vmem:[%s4808_s6 + $0x60] sm:$0xff]  ;;  %1642 = vmatpush.msra.mxu1 %v2886_v26 }
 0x1e9   :  { %1728 = vmatpush.msra.mxu2 %v2906_v27 }
 0x1eb   :  { %1296 = vmatmul.f32.gmra.mxu1 %v807_v29 }
 0x1ed   :  { %v1143_v3 = vpop.f32.mrf.mxu3 }
 0x1ef   :  { %1231 = vmatmul.f32.gmra.mxu0 %v806_v30  ;;  %2834 = vmatmul.msk.f32.vlgmr.msrb.gmra.mxu2 %vm1012_vm3, %v768_v31  ;;  %v838_v31 = vld [vmem:[%s4807_s4 + $0x250] sm:$0xff] }
 0x1f2   :  { %v3958_v33 = vpop.f32.mrf.mxu2 }
 0x1f3   :  { %1299 = vmatmul.f32.gmra.mxu1 %v812_v32 }
 0x1f5   :  { %v1146_v18 = vpop.f32.mrf.mxu3 }
 0x1f7   :  { %1234 = vmatmul.f32.gmra.mxu0 %v811_v34  ;;  %2835 = vmatmul.msk.f32.gmra.mxu2 %vm1012_vm3, %v773_v35 }
 0x1fa   :  { %v3970_v44 = vpop.f32.mrf.mxu2 }
 0x1fb   :  { %1302 = vmatmul.f32.gmra.mxu1 %v817_v36 }
 0x1fd   :  { %v1149_v32 = vpop.f32.mrf.mxu3 }
 0x1ff   :  { %1237 = vmatmul.f32.gmra.mxu0 %v816_v37  ;;  %2836 = vmatmul.msk.f32.gmra.mxu2 %vm1012_vm3, %v778_v38  ;;  %v843_v37 = vld [vmem:[%s4807_s4 + $0x278] sm:$0xff]  ;;  %v935_v38 = vpop.permute.xlu2 %934 }
 0x202   :  { %v3982_v59 = vpop.f32.mrf.mxu2 }
 0x203   :  { %1305 = vmatmul.f32.gmra.mxu1 %v822_v39  ;;  %v1079_v39 = vadd.f32 %v3958_v33, %v935_v38 }
 0x207   :  { %1240 = vmatmul.f32.gmra.mxu0 %v821_v40  ;;  %2837 = vmatmul.msk.f32.gmra.mxu2 %vm1012_vm3, %v783_v41  ;;  %v1152_v40 = vpop.f32.mrf.mxu3  ;;  %v950_v8 = vpop.permute.xlu2 %949 }
 0x20a   :  { %v3994_v12 = vpop.f32.mrf.mxu2 }
 0x20b   :  { %1308 = vmatmul.f32.gmra.mxu1 %v827_v42 }
 0x20f   :  { %1243 = vmatmul.f32.gmra.mxu0 %v826_v43  ;;  %2838 = vmatmul.msk.f32.gmra.mxu2 %vm1012_vm3, %v788_v46  ;;  %v1144_v43 = vadd.f32 %v1143_v3, %v1079_v39 }
 0x212   :  { %v4006_v28 = vpop.f32.mrf.mxu2 }
 0x213   :  { %1311 = vmatmul.f32.gmra.mxu1 %v832_v47  ;;  %v940_v47 = vpop.permute.xlu0 %939 }
 0x217   :  { %1246 = vmatmul.f32.gmra.mxu0 %v831_v48  ;;  %2839 = vmatmul.msk.f32.gmra.mxu2 %vm1012_vm3, %v793_v49  ;;  %v1082_v49 = vadd.f32 %v3970_v44, %v940_v47 }
 0x21a   :  { %v4018_v45 = vpop.f32.mrf.mxu2 }
 0x21b   :  { %1314 = vmatmul.f32.gmra.mxu1 %v837_v50 }
 0x21f   :  { %1249 = vmatmul.f32.gmra.mxu0 %v836_v51  ;;  %2840 = vmatmul.msk.f32.gmra.mxu2 %vm1012_vm3, %v798_v52  ;;  %v1155_v51 = vpop.f32.mrf.mxu3 }
 0x222   :  { %v4030_v54 = vpop.f32.mrf.mxu2 }
 0x223   :  { %1317 = vmatmul.f32.gmra.mxu1 %v842_v53  ;;  %v1147_v53 = vadd.f32 %v1146_v18, %v1082_v49 }
 0x227   :  { %1252 = vmatmul.f32.gmra.mxu0 %v841_v55  ;;  %2841 = vmatmul.msk.f32.gmra.mxu2 %vm1012_vm3, %v803_v56 }
 0x228   :  { %v1273_v10 = vpop.f32.mrf.mxu1 }
 0x22a   :  { %v4039_v57 = vpop.f32.mrf.mxu2 }
 0x22c   :  { %v1208_v5 = vpop.f32.mrf.mxu0 }
 0x22d   :  { %v1209_v46 = vadd.f32 %v1208_v5, %v1144_v43  ;;  %v965_v43 = vpop.permute.xlu2 %964 }
 0x22e   :  { %v1097_v47 = vadd.f32 %v4030_v54, %v965_v43 }
 0x22f   :  { %2842 = vmatmul.msk.f32.gmra.mxu2 %vm1012_vm3, %v808_v58  ;;  %v1274_v50 = vadd.f32 %v1273_v10, %v1209_v46  ;;  %v1088_v10 = vadd.f32 %v3994_v12, %v950_v8  ;;  %v955_v12 = vpop.permute.xlu0 %954 }
 0x230   :  { %v1276_v29 = vpop.f32.mrf.mxu1  ;;  %v1091_v21 = vadd.f32 %v4006_v28, %v955_v12 }
 0x232   :  { %v4045_v60 = vpop.f32.mrf.mxu2  ;;  %v1156_v25 = vadd.f32 %v1155_v51, %v1091_v21 }
 0x234   :  { %v1211_v23 = vpop.f32.mrf.mxu0 }
 0x235   :  { %v1212_v58 = vadd.f32 %v1211_v23, %v1147_v53 }
 0x237   :  { %2843 = vmatmul.msk.f32.gmra.mxu2 %vm1012_vm3, %v813_v62  ;;  %v1085_v62 = vadd.f32 %v3982_v59, %v945_v61  ;;  %v1277_v44 = vadd.f32 %v1276_v29, %v1212_v58 }
 0x238   :  { %v1279_v36 = vpop.f32.mrf.mxu1 }
 0x239   :  { %v1150_v3 = vadd.f32 %v1149_v32, %v1085_v62 }
 0x23a   :  { %v4054_v63 = vpop.f32.mrf.mxu2 }
 0x23c   :  { %v1214_v34 = vpop.f32.mrf.mxu0 }
 0x23d   :  { %v1215_v7 = vadd.f32 %v1214_v34, %v1150_v3 }
 0x23f   :  { %2844 = vmatmul.msk.f32.gmra.mxu2 %vm1012_vm3, %v818_v0  ;;  %v1280_v13 = vadd.f32 %v1279_v36, %v1215_v7 }
 0x240   :  { %v1282_v48 = vpop.f32.mrf.mxu1 }
 0x242   :  { %v4060_v1 = vpop.f32.mrf.mxu2 }
 0x244   :  { %v1217_v41 = vpop.f32.mrf.mxu0 }
 0x247   :  { %2845 = vmatmul.msk.f32.gmra.mxu2 %vm1012_vm3, %v823_v2 }
 0x248   :  { %v1285_v0 = vpop.f32.mrf.mxu1 }
 0x24a   :  { %v4066_v4 = vpop.f32.mrf.mxu2 }
 0x24c   :  { %v1220_v56 = vpop.f32.mrf.mxu0 }
 0x24d   :  { %v1221_v29 = vadd.f32 %v1220_v56, %v1156_v25  ;;  %v970_v56 = vpop.permute.xlu0 %969 }
 0x24e   :  { %v1100_v58 = vadd.f32 %v4039_v57, %v970_v56 }
 0x24f   :  { %2846 = vmatmul.msk.f32.gmra.mxu2 %vm1012_vm3, %v828_v6  ;;  %v1158_v6 = vpop.f32.mrf.mxu3  ;;  %v1286_v36 = vadd.f32 %v1285_v0, %v1221_v29 }
 0x250   :  { %v1288_v14 = vpop.f32.mrf.mxu1 }
 0x252   :  { %v4081_v11 = vpop.f32.mrf.mxu2 }
 0x254   :  { %v1223_v9 = vpop.f32.mrf.mxu0 }
 0x255   :  { %v985_v29 = vpop.permute.xlu0 %984 }
 0x257   :  { %2847 = vmatmul.msk.f32.gmra.mxu2 %vm1012_vm3, %v833_v16  ;;  %v1153_v16 = vadd.f32 %v1152_v40, %v1088_v10  ;;  %v1161_v20 = vpop.f32.mrf.mxu3 }
 0x258   :  { %v1291_v27 = vpop.f32.mrf.mxu1  ;;  %v1162_v51 = vadd.f32 %v1161_v20, %v1097_v47 }
 0x259   :  { %v1218_v18 = vadd.f32 %v1217_v41, %v1153_v16 }
 0x25a   :  { %v4123_v30 = vpop.f32.mrf.mxu2 }
 0x25b   :  { %v1283_v23 = vadd.f32 %v1282_v48, %v1218_v18 }
 0x25c   :  { %v1226_v22 = vpop.f32.mrf.mxu0 }
 0x25f   :  { %2848 = vmatmul.msk.f32.gmra.mxu2 %vm1012_vm3, %v838_v31  ;;  %v960_v31 = vpop.permute.xlu1 %959  ;;  %v1164_v34 = vpop.f32.mrf.mxu3 }
 0x260   :  { %v1094_v32 = vadd.f32 %v4018_v45, %v960_v31  ;;  %v1294_v46 = vpop.f32.mrf.mxu1  ;;  %v1109_v31 = vadd.f32 %v4060_v1, %v985_v29 }
 0x262   :  { %v4129_v35 = vpop.f32.mrf.mxu2  ;;  %v1159_v39 = vadd.f32 %v1158_v6, %v1094_v32 }
 0x264   :  { %v1224_v41 = vadd.f32 %v1223_v9, %v1159_v39 }
 0x266   :  { %v1289_v48 = vadd.f32 %v1288_v14, %v1224_v41 }
 0x267   :  { %2849 = vmatmul.msk.f32.gmra.mxu2 %vm1012_vm3, %v843_v37  ;;  %v1229_v37 = vpop.f32.mrf.mxu0  ;;  %v1167_v49 = vpop.f32.mrf.mxu3 }
 0x268   :  { %v1297_v61 = vpop.f32.mrf.mxu1  ;;  %v975_v6 = vpop.permute.xlu1 %974 }
 0x269   :  { %v1103_v8 = vadd.f32 %v4045_v60, %v975_v6  ;;  %v980_v60 = vpop.permute.xlu2 %979 }
 0x26a   :  { %v4136_v42 = vpop.f32.mrf.mxu2  ;;  %v1106_v12 = vadd.f32 %v4054_v63, %v980_v60 }
 0x26b   :  { %v1168_v14 = vadd.f32 %v1167_v49, %v1103_v8  ;;  %v2949_v8 = vld [vmem:[%s4808_s6 + $0xb8] sm:$0xff] }
 0x26c   :  { %1897 = vmatpush.msrb.mxu0 %v2949_v8 }
 0x26f   :  { %v1232_v53 = vpop.f32.mrf.mxu0  ;;  %v1170_v3 = vpop.f32.mrf.mxu3 }
 0x270   :  { %v1300_v10 = vpop.f32.mrf.mxu1  ;;  %v1233_v16 = vadd.f32 %v1232_v53, %v1168_v14  ;;  %v990_v41 = vpop.permute.xlu1 %989  ;;  %v2948_v14 = vld [vmem:[%s4808_s6 + $0xb0] sm:$0xff] }
 0x271   :  { %1898 = vmatpush.msrb.mxu0 %v2948_v14 }
 0x272   :  { %v1338_v52 = vpop.f32.mrf.mxu2  ;;  %v1298_v21 = vadd.f32 %v1297_v61, %v1233_v16 }
 0x273   :  { %v1339_v55 = vadd.f32 %v1338_v52, %v1274_v50 }
 0x275   :  { %v4139_v33 = vmax.f32 %v1339_v55, 0.0  ;;  %v1227_v55 = vadd.f32 %v1226_v22, %v1162_v51 }
 0x277   :  { %2850 = vmatmul.msk.f32.vlgmr.msrb.gmra.mxu3 %vm227_vm2, %v4139_v33  ;;  %2870 = vmatmul.msk.f32.vlgmr.msra.gmra.mxu0 %vm227_vm2, %v4139_v33  ;;  %v1292_v62 = vadd.f32 %v1291_v27, %v1227_v55  ;;  %v1235_v7 = vpop.f32.mrf.mxu0  ;;  %v1173_v18 = vpop.f32.mrf.mxu3  ;;  %v2929_v27 = vld [vmem:[%s4808_s6 + $0x98] sm:$0xff] }
 0x278   :  { %2890 = vmatmul.msk.f32.vlgmr.msra.gmra.mxu1 %vm227_vm2, %v4139_v33  ;;  %2910 = vmatmul.msk.f32.vlgmr.msra.gmra.mxu2 %vm227_vm2, %v4139_v33  ;;  %v1303_v25 = vpop.f32.mrf.mxu1  ;;  %v995_v55 = vpop.permute.xlu2 %994 }
 0x279   :  { %1811 = vmatpush.msra.mxu3 %v2929_v27  ;;  %v1115_v56 = vadd.f32 %v4081_v11, %v995_v55  ;;  %v1005_v27 = vpop.permute.xlu1 %1004 }
 0x27a   :  { %v1341_v2 = vpop.f32.mrf.mxu2 }
 0x27b   :  { %v1342_v5 = vadd.f32 %v1341_v2, %v1277_v44  ;;  %v1165_v44 = vadd.f32 %v1164_v34, %v1100_v58 }
 0x27d   :  { %v4150_v59 = vmax.f32 %v1342_v5, 0.0  ;;  %v1230_v5 = vadd.f32 %v1229_v37, %v1165_v44 }
 0x27f   :  { %2851 = vmatmul.msk.f32.gmra.mxu3 %vm227_vm2, %v4150_v59  ;;  %2871 = vmatmul.msk.f32.gmra.mxu0 %vm227_vm2, %v4150_v59  ;;  %v1295_v9 = vadd.f32 %v1294_v46, %v1230_v5  ;;  %v1238_v20 = vpop.f32.mrf.mxu0  ;;  %v1176_v32 = vpop.f32.mrf.mxu3  ;;  %v1112_v46 = vadd.f32 %v4066_v4, %v990_v41 }
 0x280   :  { %2891 = vmatmul.msk.f32.gmra.mxu1 %vm227_vm2, %v4150_v59  ;;  %2911 = vmatmul.msk.f32.gmra.mxu2 %vm227_vm2, %v4150_v59  ;;  %v1306_v43 = vpop.f32.mrf.mxu1  ;;  %v1000_v5 = vpop.permute.xlu0 %999 }
 0x282   :  { %v1344_v15 = vpop.f32.mrf.mxu2 }
 0x283   :  { %v1345_v17 = vadd.f32 %v1344_v15, %v1280_v13 }
 0x285   :  { %v4161_v19 = vmax.f32 %v1345_v17, 0.0 }
 0x287   :  { %2852 = vmatmul.msk.f32.gmra.mxu3 %vm227_vm2, %v4161_v19  ;;  %2872 = vmatmul.msk.f32.gmra.mxu0 %vm227_vm2, %v4161_v19 }
 0x288   :  { %2892 = vmatmul.msk.f32.gmra.mxu1 %vm227_vm2, %v4161_v19  ;;  %2912 = vmatmul.msk.f32.gmra.mxu2 %vm227_vm2, %v4161_v19  ;;  %v1309_v58 = vpop.f32.mrf.mxu1 }
 0x28a   :  { %v1347_v24 = vpop.f32.mrf.mxu2 }
 0x28b   :  { %v1348_v26 = vadd.f32 %v1347_v24, %v1283_v23  ;;  %v1171_v23 = vadd.f32 %v1170_v3, %v1106_v12 }
 0x28d   :  { %v4172_v28 = vmax.f32 %v1348_v26, 0.0  ;;  %v1236_v26 = vadd.f32 %v1235_v7, %v1171_v23  ;;  %v1118_v7 = vadd.f32 %v4123_v30, %v1000_v5  ;;  %v2969_v30 = vld [vmem:[%s4808_s6 + $0xd8] sm:$0xff]  ;;  %v2967_v23 = vld [vmem:[%s4808_s6 + $0xc8] sm:$0xff] }
 0x28e   :  { %1983 = vmatpush.msrb.mxu1 %v2969_v30 }
 0x28f   :  { %2853 = vmatmul.msk.f32.gmra.mxu3 %vm227_vm2, %v4172_v28  ;;  %2873 = vmatmul.msk.f32.gmra.mxu0 %vm227_vm2, %v4172_v28  ;;  %v1301_v34 = vadd.f32 %v1300_v10, %v1236_v26  ;;  %v2987_v26 = vld [vmem:[%s4808_s6 + $0xe8] sm:$0xff] }
 0x290   :  { %2893 = vmatmul.msk.f32.gmra.mxu1 %vm227_vm2, %v4172_v28  ;;  %2913 = vmatmul.msk.f32.gmra.mxu2 %vm227_vm2, %v4172_v28  ;;  %v1312_v16 = vpop.f32.mrf.mxu1 }
 0x292   :  { %v1350_v38 = vpop.f32.mrf.mxu2 }
 0x293   :  { %v1351_v40 = vadd.f32 %v1350_v38, %v1286_v36  ;;  %v1241_v36 = vpop.f32.mrf.mxu0  ;;  %v1174_v38 = vadd.f32 %v1173_v18, %v1109_v31  ;;  %v2988_v18 = vld [vmem:[%s4808_s6 + $0xf0] sm:$0xff]  ;;  %v2926_v31 = vld [vmem:[%s4808_s6 + $0x80] sm:$0xff] }
 0x295   :  { %v4183_v45 = vmax.f32 %v1351_v40, 0.0  ;;  %v1239_v40 = vadd.f32 %v1238_v20, %v1174_v38 }
 0x297   :  { %2854 = vmatmul.msk.f32.gmra.mxu3 %vm227_vm2, %v4183_v45  ;;  %2874 = vmatmul.msk.f32.gmra.mxu0 %vm227_vm2, %v4183_v45  ;;  %v1304_v47 = vadd.f32 %v1303_v25, %v1239_v40 }
 0x298   :  { %2894 = vmatmul.msk.f32.gmra.mxu1 %vm227_vm2, %v4183_v45  ;;  %2914 = vmatmul.msk.f32.gmra.mxu2 %vm227_vm2, %v4183_v45 }
 0x29a   :  { %v1353_v50 = vpop.f32.mrf.mxu2 }
 0x29b   :  { %v1354_v52 = vadd.f32 %v1353_v50, %v1289_v48  ;;  %v1179_v48 = vpop.f32.mrf.mxu3  ;;  %v1177_v50 = vadd.f32 %v1176_v32, %v1112_v46  ;;  %v2946_v32 = vld [vmem:[%s4808_s6 + $0xa0] sm:$0xff] }
 0x29d   :  { %v4194_v54 = vmax.f32 %v1354_v52, 0.0  ;;  %v1244_v52 = vpop.f32.mrf.mxu0  ;;  %v1242_v53 = vadd.f32 %v1241_v36, %v1177_v50  ;;  %v2966_v36 = vld [vmem:[%s4808_s6 + $0xc0] sm:$0xff] }
 0x29f   :  { %2855 = vmatmul.msk.f32.gmra.mxu3 %vm227_vm2, %v4194_v54  ;;  %2875 = vmatmul.msk.f32.gmra.mxu0 %vm227_vm2, %v4194_v54  ;;  %v1307_v61 = vadd.f32 %v1306_v43, %v1242_v53  ;;  %v1315_v43 = vpop.f32.mrf.mxu1 }
 0x2a0   :  { %2895 = vmatmul.msk.f32.gmra.mxu1 %vm227_vm2, %v4194_v54  ;;  %2915 = vmatmul.msk.f32.gmra.mxu2 %vm227_vm2, %v4194_v54 }
 0x2a2   :  { %v1356_v0 = vpop.f32.mrf.mxu2 }
 0x2a3   :  { %v1357_v2 = vadd.f32 %v1356_v0, %v1292_v62  ;;  %v1180_v0 = vadd.f32 %v1179_v48, %v1115_v56  ;;  %v1010_v48 = vpop.permute.xlu2 %1009 }
 0x2a5   :  { %v4205_v57 = vmax.f32 %v1357_v2, 0.0  ;;  %v1182_v2 = vpop.f32.mrf.mxu3  ;;  %v1245_v3 = vadd.f32 %v1244_v52, %v1180_v0  ;;  %v1247_v6 = vpop.f32.mrf.mxu0 }
 0x2a6   :  { %v1183_v12 = vadd.f32 %v1182_v2, %v1118_v7 }
 0x2a7   :  { %2856 = vmatmul.msk.f32.gmra.mxu3 %vm227_vm2, %v4205_v57  ;;  %2876 = vmatmul.msk.f32.gmra.mxu0 %vm227_vm2, %v4205_v57  ;;  %v1310_v10 = vadd.f32 %v1309_v58, %v1245_v3 }
 0x2a8   :  { %2896 = vmatmul.msk.f32.gmra.mxu1 %vm227_vm2, %v4205_v57  ;;  %2916 = vmatmul.msk.f32.gmra.mxu2 %vm227_vm2, %v4205_v57 }
 0x2aa   :  { %v1359_v13 = vpop.f32.mrf.mxu2 }
 0x2ab   :  { %v1360_v15 = vadd.f32 %v1359_v13, %v1295_v9  ;;  %v2989_v9 = vld [vmem:[%s4808_s6 + $0xf8] sm:$0xff]  ;;  %v2928_v13 = vld [vmem:[%s4808_s6 + $0x90] sm:$0xff] }
 0x2ac   :  { %2069 = vmatpush.msrb.mxu2 %v2989_v9  ;;  %1812 = vmatpush.msra.mxu3 %v2928_v13 }
 0x2ad   :  { %v4216_v17 = vmax.f32 %v1360_v15, 0.0  ;;  %v2968_v15 = vld [vmem:[%s4808_s6 + $0xd0] sm:$0xff]  ;;  %v1185_v29 = vpop.f32.mrf.mxu3  ;;  %v1250_v38 = vpop.f32.mrf.mxu0 }
 0x2ae   :  { %1984 = vmatpush.msrb.mxu1 %v2968_v15  ;;  %2070 = vmatpush.msrb.mxu2 %v2988_v18 }
 0x2af   :  { %2857 = vmatmul.msk.f32.gmra.mxu3 %vm227_vm2, %v4216_v17  ;;  %2877 = vmatmul.msk.f32.gmra.mxu0 %vm227_vm2, %v4216_v17 }
 0x2b0   :  { %2897 = vmatmul.msk.f32.gmra.mxu1 %vm227_vm2, %v4216_v17  ;;  %2917 = vmatmul.msk.f32.gmra.mxu2 %vm227_vm2, %v4216_v17 }
 0x2b1   :  { %1985 = vmatpush.msrb.mxu1 %v2967_v23  ;;  %2071 = vmatpush.msrb.mxu2 %v2987_v26 }
 0x2b2   :  { %v1362_v22 = vpop.f32.mrf.mxu2 }
 0x2b3   :  { %v1363_v24 = vadd.f32 %v1362_v22, %v1298_v21  ;;  %v2927_v21 = vld [vmem:[%s4808_s6 + $0x88] sm:$0xff]  ;;  %1986 = vmatpush.msrb.mxu1 %v2966_v36 }
 0x2b4   :  { %v2947_v22 = vld [vmem:[%s4808_s6 + $0xa8] sm:$0xff]  ;;  %1813 = vmatpush.msra.mxu3 %v2927_v21 }
 0x2b5   :  { %v4227_v63 = vmax.f32 %v1363_v24, 0.0  ;;  %v1248_v24 = vadd.f32 %v1247_v6, %v1183_v12  ;;  %1899 = vmatpush.msrb.mxu0 %v2947_v22  ;;  %v1188_v50 = vpop.f32.mrf.mxu3  ;;  %v1253_v52 = vpop.f32.mrf.mxu0 }
 0x2b6   :  { %1814 = vmatpush.msra.mxu3 %v2926_v31 }
 0x2b7   :  { %2858 = vmatmul.msk.f32.gmra.mxu3 %vm227_vm2, %v4227_v63  ;;  %2878 = vmatmul.msk.f32.gmra.mxu0 %vm227_vm2, %v4227_v63 }
 0x2b8   :  { %2898 = vmatmul.msk.f32.gmra.mxu1 %vm227_vm2, %v4227_v63  ;;  %2918 = vmatmul.msk.f32.gmra.mxu2 %vm227_vm2, %v4227_v63 }
 0x2b9   :  { %1900 = vmatpush.msrb.mxu0 %v2946_v32 }
 0x2ba   :  { %v1365_v37 = vpop.f32.mrf.mxu2 }
 0x2bb   :  { %v1366_v39 = vadd.f32 %v1365_v37, %v1301_v34  ;;  %v1121_v34 = vadd.f32 %v4129_v35, %v1005_v27  ;;  %v2986_v37 = vld [vmem:[%s4808_s6 + $0xe0] sm:$0xff]  ;;  %v1313_v35 = vadd.f32 %v1312_v16, %v1248_v24 }
 0x2bc   :  { %2072 = vmatpush.msrb.mxu2 %v2986_v37 }
 0x2bd   :  { %v4241_v1 = vmax.f32 %v1366_v39, 0.0  ;;  %v1186_v40 = vadd.f32 %v1185_v29, %v1121_v34 }
 0x2bf   :  { %2859 = vmatmul.msk.f32.gmra.mxu3 %vm227_vm2, %v4241_v1  ;;  %2879 = vmatmul.msk.f32.gmra.mxu0 %vm227_vm2, %v4241_v1  ;;  %v1251_v46 = vadd.f32 %v1250_v38, %v1186_v40 }
 0x2c0   :  { %2899 = vmatmul.msk.f32.gmra.mxu1 %vm227_vm2, %v4241_v1  ;;  %2919 = vmatmul.msk.f32.gmra.mxu2 %vm227_vm2, %v4241_v1 }
 0x2c2   :  { %v1368_v49 = vpop.f32.mrf.mxu2 }
 0x2c3   :  { %v1369_v51 = vadd.f32 %v1368_v49, %v1304_v47  ;;  %v1124_v49 = vadd.f32 %v4136_v42, %v1010_v48 }
 0x2c5   :  { %v4252_v4 = vmax.f32 %v1369_v51, 0.0  ;;  %v1316_v51 = vadd.f32 %v1315_v43, %v1251_v46  ;;  %v1189_v55 = vadd.f32 %v1188_v50, %v1124_v49  ;;  %v3009_v43 = vld [vmem:[%s4808_s6 + $0x118] sm:$0xff] }
 0x2c6   :  { %2155 = vmatpush.msrb.mxu3 %v3009_v43 }
 0x2c7   :  { %2860 = vmatmul.msk.f32.gmra.mxu3 %vm227_vm2, %v4252_v4  ;;  %2880 = vmatmul.msk.f32.gmra.mxu0 %vm227_vm2, %v4252_v4  ;;  %v1254_v58 = vadd.f32 %v1253_v52, %v1189_v55 }
 0x2c8   :  { %2900 = vmatmul.msk.f32.gmra.mxu1 %vm227_vm2, %v4252_v4  ;;  %2920 = vmatmul.msk.f32.gmra.mxu2 %vm227_vm2, %v4252_v4 }
 0x2ca   :  { %v1371_v62 = vpop.f32.mrf.mxu2 }
 0x2cb   :  { %v1372_v44 = vadd.f32 %v1371_v62, %v1307_v61  ;;  %v1318_v61 = vpop.f32.mrf.mxu1 }
 0x2cc   :  { %v1319_v62 = vadd.f32 %v1318_v61, %v1254_v58 }
 0x2cd   :  { %v4263_v11 = vmax.f32 %v1372_v44, 0.0 }
 0x2cf   :  { %2861 = vmatmul.msk.f32.gmra.mxu3 %vm227_vm2, %v4263_v11  ;;  %2881 = vmatmul.msk.f32.gmra.mxu0 %vm227_vm2, %v4263_v11 }
 0x2d0   :  { %2901 = vmatmul.msk.f32.gmra.mxu1 %vm227_vm2, %v4263_v11  ;;  %2921 = vmatmul.msk.f32.gmra.mxu2 %vm227_vm2, %v4263_v11 }
 0x2d2   :  { %v1374_v60 = vpop.f32.mrf.mxu2 }
 0x2d3   :  { %v1375_v20 = vadd.f32 %v1374_v60, %v1310_v10 }
 0x2d5   :  { %v4304_v25 = vmax.f32 %v1375_v20, 0.0 }
 0x2d7   :  { %2862 = vmatmul.msk.f32.gmra.mxu3 %vm227_vm2, %v4304_v25  ;;  %2882 = vmatmul.msk.f32.gmra.mxu0 %vm227_vm2, %v4304_v25 }
 0x2d8   :  { %2902 = vmatmul.msk.f32.gmra.mxu1 %vm227_vm2, %v4304_v25  ;;  %2922 = vmatmul.msk.f32.gmra.mxu2 %vm227_vm2, %v4304_v25 }
 0x2da   :  { %v1377_v39 = vpop.f32.mrf.mxu2 }
 0x2db   :  { %v1378_v41 = vadd.f32 %v1377_v39, %v1313_v35 }
 0x2dd   :  { %v4330_v47 = vmax.f32 %v1378_v41, 0.0 }
 0x2df   :  { %2863 = vmatmul.msk.f32.gmra.mxu3 %vm227_vm2, %v4330_v47  ;;  %2883 = vmatmul.msk.f32.gmra.mxu0 %vm227_vm2, %v4330_v47 }
 0x2e0   :  { %2903 = vmatmul.msk.f32.gmra.mxu1 %vm227_vm2, %v4330_v47  ;;  %2923 = vmatmul.msk.f32.gmra.mxu2 %vm227_vm2, %v4330_v47 }
 0x2e2   :  { %v1380_v53 = vpop.f32.mrf.mxu2 }
 0x2e3   :  { %v1381_v56 = vadd.f32 %v1380_v53, %v1316_v51 }
 0x2e5   :  { %v4341_v42 = vmax.f32 %v1381_v56, 0.0 }
 0x2e7   :  { %2864 = vmatmul.msk.f32.gmra.mxu3 %vm227_vm2, %v4341_v42  ;;  %2884 = vmatmul.msk.f32.gmra.mxu0 %vm227_vm2, %v4341_v42 }
 0x2e8   :  { %2904 = vmatmul.msk.f32.gmra.mxu1 %vm227_vm2, %v4341_v42  ;;  %2924 = vmatmul.msk.f32.gmra.mxu2 %vm227_vm2, %v4341_v42 }
 0x2ea   :  { %v1383_v0 = vpop.f32.mrf.mxu2 }
 0x2eb   :  { %v1384_v44 = vadd.f32 %v1383_v0, %v1319_v62 }
 0x2ed   :  { %v4351_v2 = vmax.f32 %v1384_v44, 0.0 }
 0x2ef   :  { %2865 = vmatmul.msk.f32.gmra.mxu3 %vm227_vm2, %v4351_v2  ;;  %2885 = vmatmul.msk.f32.gmra.mxu0 %vm227_vm2, %v4351_v2 }
 0x2f0   :  { %2905 = vmatmul.msk.f32.gmra.mxu1 %vm227_vm2, %v4351_v2  ;;  %2925 = vmatmul.msk.f32.gmra.mxu2 %vm227_vm2, %v4351_v2 }
 0x2f4   :  { %v1558_v3 = vpop.f32.mrf.mxu0 }
 0x2f5   :  { %1606 = vst.msk [vmem:[#allocation3 + $0x80] sm:$0xff] %vm1519_vm4, %v1558_v3  ;;  %v1644_v5 = vpop.f32.mrf.mxu1  ;;  %v3008_v3 = vld [vmem:[%s4808_s6 + $0x110] sm:$0xff] }
 0x2f6   :  { %1692 = vst.msk [vmem:[#allocation3 + $0x100] sm:$0xff] %vm1519_vm4, %v1644_v5  ;;  %2156 = vmatpush.msrb.mxu3 %v3008_v3 }
 0x2f7   :  { %2930 = vmatmul.msk.f32.vlgmr.msra.gmra.mxu3 %vm227_vm2, %v4139_v33  ;;  %2950 = vmatmul.msk.f32.vlgmr.msrb.gmra.mxu0 %vm227_vm2, %v4139_v33 }
 0x2f8   :  { %2970 = vmatmul.msk.f32.vlgmr.msrb.gmra.mxu1 %vm227_vm2, %v4139_v33  ;;  %2990 = vmatmul.msk.f32.vlgmr.msrb.gmra.mxu2 %vm227_vm2, %v4139_v33 }
 0x2fa   :  { %v1471_v6 = vpop.f32.mrf.mxu3 }
 0x2fb   :  { %1520 = vst.msk [vmem:[#allocation3] sm:$0xff] %vm1519_vm4, %v1471_v6  ;;  %v1730_v7 = vpop.f32.mrf.mxu2 }
 0x2fc   :  { %1778 = vst.msk [vmem:[#allocation3 + $0x180] sm:$0xff] %vm1519_vm4, %v1730_v7  ;;  %v1561_v8 = vpop.f32.mrf.mxu0  ;;  %v3007_v7 = vld [vmem:[%s4808_s6 + $0x108] sm:$0xff] }
 0x2fd   :  { %1607 = vst.msk [vmem:[#allocation3 + $0x88] sm:$0xff] %vm1519_vm4, %v1561_v8  ;;  %v1647_v30 = vpop.f32.mrf.mxu1  ;;  %2157 = vmatpush.msrb.mxu3 %v3007_v7 }
 0x2fe   :  { %1693 = vst.msk [vmem:[#allocation3 + $0x108] sm:$0xff] %vm1519_vm4, %v1647_v30  ;;  %v3006_v30 = vld [vmem:[%s4808_s6 + $0x100] sm:$0xff] }
 0x2ff   :  { %2931 = vmatmul.msk.f32.gmra.mxu3 %vm227_vm2, %v4150_v59  ;;  %2951 = vmatmul.msk.f32.gmra.mxu0 %vm227_vm2, %v4150_v59 }
 0x300   :  { %2971 = vmatmul.msk.f32.gmra.mxu1 %vm227_vm2, %v4150_v59  ;;  %2991 = vmatmul.msk.f32.gmra.mxu2 %vm227_vm2, %v4150_v59 }
 0x301   :  { %2158 = vmatpush.msrb.mxu3 %v3006_v30 }
 0x302   :  { %v1474_v9 = vpop.f32.mrf.mxu3 }
 0x303   :  { %1521 = vst.msk [vmem:[#allocation3 + $0x8] sm:$0xff] %vm1519_vm4, %v1474_v9  ;;  %v1733_v10 = vpop.f32.mrf.mxu2 }
 0x304   :  { %1779 = vst.msk [vmem:[#allocation3 + $0x188] sm:$0xff] %vm1519_vm4, %v1733_v10  ;;  %v1564_v13 = vpop.f32.mrf.mxu0 }
 0x305   :  { %1608 = vst.msk [vmem:[#allocation3 + $0x90] sm:$0xff] %vm1519_vm4, %v1564_v13  ;;  %v1650_v14 = vpop.f32.mrf.mxu1 }
 0x306   :  { %1694 = vst.msk [vmem:[#allocation3 + $0x110] sm:$0xff] %vm1519_vm4, %v1650_v14 }
 0x307   :  { %2932 = vmatmul.msk.f32.gmra.mxu3 %vm227_vm2, %v4161_v19  ;;  %2952 = vmatmul.msk.f32.gmra.mxu0 %vm227_vm2, %v4161_v19 }
 0x308   :  { %2972 = vmatmul.msk.f32.gmra.mxu1 %vm227_vm2, %v4161_v19  ;;  %2992 = vmatmul.msk.f32.gmra.mxu2 %vm227_vm2, %v4161_v19 }
 0x30a   :  { %v1477_v15 = vpop.f32.mrf.mxu3 }
 0x30b   :  { %1522 = vst.msk [vmem:[#allocation3 + $0x10] sm:$0xff] %vm1519_vm4, %v1477_v15  ;;  %v1736_v16 = vpop.f32.mrf.mxu2 }
 0x30c   :  { %1780 = vst.msk [vmem:[#allocation3 + $0x190] sm:$0xff] %vm1519_vm4, %v1736_v16  ;;  %v1567_v60 = vpop.f32.mrf.mxu0 }
 0x30d   :  { %1609 = vst.msk [vmem:[#allocation3 + $0x98] sm:$0xff] %vm1519_vm4, %v1567_v60  ;;  %v1653_v18 = vpop.f32.mrf.mxu1 }
 0x30e   :  { %1695 = vst.msk [vmem:[#allocation3 + $0x118] sm:$0xff] %vm1519_vm4, %v1653_v18 }
 0x30f   :  { %2933 = vmatmul.msk.f32.gmra.mxu3 %vm227_vm2, %v4172_v28  ;;  %2953 = vmatmul.msk.f32.gmra.mxu0 %vm227_vm2, %v4172_v28 }
 0x310   :  { %2973 = vmatmul.msk.f32.gmra.mxu1 %vm227_vm2, %v4172_v28  ;;  %2993 = vmatmul.msk.f32.gmra.mxu2 %vm227_vm2, %v4172_v28 }
 0x312   :  { %v1480_v12 = vpop.f32.mrf.mxu3 }
 0x313   :  { %1523 = vst.msk [vmem:[#allocation3 + $0x18] sm:$0xff] %vm1519_vm4, %v1480_v12  ;;  %v1739_v20 = vpop.f32.mrf.mxu2 }
 0x314   :  { %1781 = vst.msk [vmem:[#allocation3 + $0x198] sm:$0xff] %vm1519_vm4, %v1739_v20  ;;  %v1570_v21 = vpop.f32.mrf.mxu0  ;;  %v2279_v30 = vld [vmem:[#allocation3 + $0x98] sm:$0xff] }
 0x315   :  { %1610 = vst.msk [vmem:[#allocation3 + $0xa0] sm:$0xff] %vm1519_vm4, %v1570_v21  ;;  %v1656_v22 = vpop.f32.mrf.mxu1 }
 0x316   :  { %1696 = vst.msk [vmem:[#allocation3 + $0x120] sm:$0xff] %vm1519_vm4, %v1656_v22 }
 0x317   :  { %2934 = vmatmul.msk.f32.gmra.mxu3 %vm227_vm2, %v4183_v45  ;;  %2954 = vmatmul.msk.f32.gmra.mxu0 %vm227_vm2, %v4183_v45 }
 0x318   :  { %2974 = vmatmul.msk.f32.gmra.mxu1 %vm227_vm2, %v4183_v45  ;;  %2994 = vmatmul.msk.f32.gmra.mxu2 %vm227_vm2, %v4183_v45 }
 0x31a   :  { %v1483_v23 = vpop.f32.mrf.mxu3 }
 0x31b   :  { %1524 = vst.msk [vmem:[#allocation3 + $0x20] sm:$0xff] %vm1519_vm4, %v1483_v23  ;;  %v1742_v24 = vpop.f32.mrf.mxu2 }
 0x31c   :  { %1782 = vst.msk [vmem:[#allocation3 + $0x1a0] sm:$0xff] %vm1519_vm4, %v1742_v24  ;;  %v1573_v26 = vpop.f32.mrf.mxu0 }
 0x31d   :  { %1611 = vst.msk [vmem:[#allocation3 + $0xa8] sm:$0xff] %vm1519_vm4, %v1573_v26  ;;  %v1659_v27 = vpop.f32.mrf.mxu1 }
 0x31e   :  { %1697 = vst.msk [vmem:[#allocation3 + $0x128] sm:$0xff] %vm1519_vm4, %v1659_v27 }
 0x31f   :  { %2935 = vmatmul.msk.f32.gmra.mxu3 %vm227_vm2, %v4194_v54  ;;  %2955 = vmatmul.msk.f32.gmra.mxu0 %vm227_vm2, %v4194_v54 }
 0x320   :  { %2975 = vmatmul.msk.f32.gmra.mxu1 %vm227_vm2, %v4194_v54  ;;  %2995 = vmatmul.msk.f32.gmra.mxu2 %vm227_vm2, %v4194_v54 }
 0x322   :  { %v1486_v29 = vpop.f32.mrf.mxu3 }
 0x323   :  { %1525 = vst.msk [vmem:[#allocation3 + $0x28] sm:$0xff] %vm1519_vm4, %v1486_v29  ;;  %v1745_v31 = vpop.f32.mrf.mxu2 }
 0x324   :  { %1783 = vst.msk [vmem:[#allocation3 + $0x1a8] sm:$0xff] %vm1519_vm4, %v1745_v31  ;;  %v1576_v32 = vpop.f32.mrf.mxu0 }
 0x325   :  { %1612 = vst.msk [vmem:[#allocation3 + $0xb0] sm:$0xff] %vm1519_vm4, %v1576_v32  ;;  %v1662_v34 = vpop.f32.mrf.mxu1 }
 0x326   :  { %1698 = vst.msk [vmem:[#allocation3 + $0x130] sm:$0xff] %vm1519_vm4, %v1662_v34 }
 0x327   :  { %2936 = vmatmul.msk.f32.gmra.mxu3 %vm227_vm2, %v4205_v57  ;;  %2956 = vmatmul.msk.f32.gmra.mxu0 %vm227_vm2, %v4205_v57 }
 0x328   :  { %2976 = vmatmul.msk.f32.gmra.mxu1 %vm227_vm2, %v4205_v57  ;;  %2996 = vmatmul.msk.f32.gmra.mxu2 %vm227_vm2, %v4205_v57 }
 0x32a   :  { %v1489_v36 = vpop.f32.mrf.mxu3 }
 0x32b   :  { %1526 = vst.msk [vmem:[#allocation3 + $0x30] sm:$0xff] %vm1519_vm4, %v1489_v36  ;;  %v1748_v37 = vpop.f32.mrf.mxu2 }
 0x32c   :  { %1784 = vst.msk [vmem:[#allocation3 + $0x1b0] sm:$0xff] %vm1519_vm4, %v1748_v37  ;;  %v1579_v38 = vpop.f32.mrf.mxu0 }
 0x32d   :  { %1613 = vst.msk [vmem:[#allocation3 + $0xb8] sm:$0xff] %vm1519_vm4, %v1579_v38  ;;  %v1665_v35 = vpop.f32.mrf.mxu1 }
 0x32e   :  { %1699 = vst.msk [vmem:[#allocation3 + $0x138] sm:$0xff] %vm1519_vm4, %v1665_v35 }
 0x32f   :  { %2937 = vmatmul.msk.f32.gmra.mxu3 %vm227_vm2, %v4216_v17  ;;  %2957 = vmatmul.msk.f32.gmra.mxu0 %vm227_vm2, %v4216_v17 }
 0x330   :  { %2977 = vmatmul.msk.f32.gmra.mxu1 %vm227_vm2, %v4216_v17  ;;  %2997 = vmatmul.msk.f32.gmra.mxu2 %vm227_vm2, %v4216_v17 }
 0x332   :  { %v1492_v39 = vpop.f32.mrf.mxu3 }
 0x333   :  { %1527 = vst.msk [vmem:[#allocation3 + $0x38] sm:$0xff] %vm1519_vm4, %v1492_v39  ;;  %v1751_v40 = vpop.f32.mrf.mxu2 }
 0x334   :  { %1785 = vst.msk [vmem:[#allocation3 + $0x1b8] sm:$0xff] %vm1519_vm4, %v1751_v40  ;;  %v1582_v41 = vpop.f32.mrf.mxu0 }
 0x335   :  { %1614 = vst.msk [vmem:[#allocation3 + $0xc0] sm:$0xff] %vm1519_vm4, %v1582_v41  ;;  %v1668_v46 = vpop.f32.mrf.mxu1 }
 0x336   :  { %1700 = vst.msk [vmem:[#allocation3 + $0x140] sm:$0xff] %vm1519_vm4, %v1668_v46 }
 0x337   :  { %2938 = vmatmul.msk.f32.gmra.mxu3 %vm227_vm2, %v4227_v63  ;;  %2958 = vmatmul.msk.f32.gmra.mxu0 %vm227_vm2, %v4227_v63 }
 0x338   :  { %2978 = vmatmul.msk.f32.gmra.mxu1 %vm227_vm2, %v4227_v63  ;;  %2998 = vmatmul.msk.f32.gmra.mxu2 %vm227_vm2, %v4227_v63 }
 0x33a   :  { %v1495_v48 = vpop.f32.mrf.mxu3  ;;  %v2267_v3 = vld [vmem:[#allocation3 + $0x38] sm:$0xff] }
 0x33b   :  { %1528 = vst.msk [vmem:[#allocation3 + $0x40] sm:$0xff] %vm1519_vm4, %v1495_v48  ;;  %v1754_v49 = vpop.f32.mrf.mxu2 }
 0x33c   :  { %1786 = vst.msk [vmem:[#allocation3 + $0x1c0] sm:$0xff] %vm1519_vm4, %v1754_v49  ;;  %v1585_v50 = vpop.f32.mrf.mxu0 }
 0x33d   :  { %1615 = vst.msk [vmem:[#allocation3 + $0xc8] sm:$0xff] %vm1519_vm4, %v1585_v50  ;;  %v1671_v51 = vpop.f32.mrf.mxu1 }
 0x33e   :  { %1701 = vst.msk [vmem:[#allocation3 + $0x148] sm:$0xff] %vm1519_vm4, %v1671_v51 }
 0x33f   :  { %2939 = vmatmul.msk.f32.gmra.mxu3 %vm227_vm2, %v4241_v1  ;;  %2959 = vmatmul.msk.f32.gmra.mxu0 %vm227_vm2, %v4241_v1 }
 0x340   :  { %2979 = vmatmul.msk.f32.gmra.mxu1 %vm227_vm2, %v4241_v1  ;;  %2999 = vmatmul.msk.f32.gmra.mxu2 %vm227_vm2, %v4241_v1 }
 0x342   :  { %v1498_v52 = vpop.f32.mrf.mxu3 }
 0x343   :  { %1529 = vst.msk [vmem:[#allocation3 + $0x48] sm:$0xff] %vm1519_vm4, %v1498_v52  ;;  %v1757_v53 = vpop.f32.mrf.mxu2  ;;  %v2284_v52 = vld [vmem:[#allocation3 + $0xc0] sm:$0xff] }
 0x344   :  { %1787 = vst.msk [vmem:[#allocation3 + $0x1c8] sm:$0xff] %vm1519_vm4, %v1757_v53  ;;  %v1588_v55 = vpop.f32.mrf.mxu0  ;;  %v2285_v48 = vld [vmem:[#allocation3 + $0xc8] sm:$0xff] }
 0x345   :  { %1616 = vst.msk [vmem:[#allocation3 + $0xd0] sm:$0xff] %vm1519_vm4, %v1588_v55  ;;  %v1674_v56 = vpop.f32.mrf.mxu1 }
 0x346   :  { %1702 = vst.msk [vmem:[#allocation3 + $0x150] sm:$0xff] %vm1519_vm4, %v1674_v56  ;;  %v2283_v56 = vld [vmem:[#allocation3 + $0xb8] sm:$0xff] }
 0x347   :  { %2940 = vmatmul.msk.f32.gmra.mxu3 %vm227_vm2, %v4252_v4  ;;  %2960 = vmatmul.msk.f32.gmra.mxu0 %vm227_vm2, %v4252_v4 }
 0x348   :  { %2980 = vmatmul.msk.f32.gmra.mxu1 %vm227_vm2, %v4252_v4  ;;  %3000 = vmatmul.msk.f32.gmra.mxu2 %vm227_vm2, %v4252_v4 }
 0x34a   :  { %v1501_v58 = vpop.f32.mrf.mxu3 }
 0x34b   :  { %1530 = vst.msk [vmem:[#allocation3 + $0x50] sm:$0xff] %vm1519_vm4, %v1501_v58  ;;  %v1760_v61 = vpop.f32.mrf.mxu2  ;;  %v2269_v58 = vld [vmem:[#allocation3 + $0x48] sm:$0xff] }
 0x34c   :  { %1788 = vst.msk [vmem:[#allocation3 + $0x1d0] sm:$0xff] %vm1519_vm4, %v1760_v61  ;;  %v1591_v62 = vpop.f32.mrf.mxu0  ;;  %v2286_v43 = vld [vmem:[#allocation3 + $0xd0] sm:$0xff] }
 0x34d   :  { %1617 = vst.msk [vmem:[#allocation3 + $0xd8] sm:$0xff] %vm1519_vm4, %v1591_v62  ;;  %v1677_v0 = vpop.f32.mrf.mxu1  ;;  %v2282_v61 = vld [vmem:[#allocation3 + $0xb0] sm:$0xff]  ;;  %v2268_v62 = vld [vmem:[#allocation3 + $0x40] sm:$0xff] }
 0x34e   :  { %1703 = vst.msk [vmem:[#allocation3 + $0x158] sm:$0xff] %vm1519_vm4, %v1677_v0  ;;  %v2281_v0 = vld [vmem:[#allocation3 + $0xa8] sm:$0xff] }
 0x34f   :  { %2941 = vmatmul.msk.f32.gmra.mxu3 %vm227_vm2, %v4263_v11  ;;  %2961 = vmatmul.msk.f32.gmra.mxu0 %vm227_vm2, %v4263_v11 }
 0x350   :  { %2981 = vmatmul.msk.f32.gmra.mxu1 %vm227_vm2, %v4263_v11  ;;  %3001 = vmatmul.msk.f32.gmra.mxu2 %vm227_vm2, %v4263_v11 }
 0x352   :  { %v1504_v44 = vpop.f32.mrf.mxu3  ;;  %v2270_v55 = vld [vmem:[#allocation3 + $0x50] sm:$0xff] }
 0x353   :  { %1531 = vst.msk [vmem:[#allocation3 + $0x58] sm:$0xff] %vm1519_vm4, %v1504_v44  ;;  %v1763_v5 = vpop.f32.mrf.mxu2 }
 0x354   :  { %1789 = vst.msk [vmem:[#allocation3 + $0x1d8] sm:$0xff] %vm1519_vm4, %v1763_v5  ;;  %v1594_v6 = vpop.f32.mrf.mxu0  ;;  %v2287_v40 = vld [vmem:[#allocation3 + $0xd8] sm:$0xff] }
 0x355   :  { %1618 = vst.msk [vmem:[#allocation3 + $0xe0] sm:$0xff] %vm1519_vm4, %v1594_v6  ;;  %v1680_v8 = vpop.f32.mrf.mxu1  ;;  %v2280_v6 = vld [vmem:[#allocation3 + $0xa0] sm:$0xff] }
 0x356   :  { %1704 = vst.msk [vmem:[#allocation3 + $0x160] sm:$0xff] %vm1519_vm4, %v1680_v8  ;;  %v2266_v8 = vld [vmem:[#allocation3 + $0x30] sm:$0xff] }
 0x357   :  { %2942 = vmatmul.msk.f32.gmra.mxu3 %vm227_vm2, %v4304_v25  ;;  %2962 = vmatmul.msk.f32.gmra.mxu0 %vm227_vm2, %v4304_v25 }
 0x358   :  { %2982 = vmatmul.msk.f32.gmra.mxu1 %vm227_vm2, %v4304_v25  ;;  %3002 = vmatmul.msk.f32.gmra.mxu2 %vm227_vm2, %v4304_v25 }
 0x35a   :  { %v1507_v9 = vpop.f32.mrf.mxu3  ;;  %v2271_v50 = vld [vmem:[#allocation3 + $0x58] sm:$0xff] }
 0x35b   :  { %1532 = vst.msk [vmem:[#allocation3 + $0x60] sm:$0xff] %vm1519_vm4, %v1507_v9  ;;  %v1766_v10 = vpop.f32.mrf.mxu2  ;;  %v2265_v9 = vld [vmem:[#allocation3 + $0x28] sm:$0xff] }
 0x35c   :  { %1790 = vst.msk [vmem:[#allocation3 + $0x1e0] sm:$0xff] %vm1519_vm4, %v1766_v10  ;;  %v1597_v13 = vpop.f32.mrf.mxu0  ;;  %v2288_v37 = vld [vmem:[#allocation3 + $0xe0] sm:$0xff]  ;;  %v2278_v10 = vld [vmem:[#allocation3 + $0x90] sm:$0xff] }
 0x35d   :  { %1619 = vst.msk [vmem:[#allocation3 + $0xe8] sm:$0xff] %vm1519_vm4, %v1597_v13  ;;  %v1683_v14 = vpop.f32.mrf.mxu1  ;;  %v2264_v13 = vld [vmem:[#allocation3 + $0x20] sm:$0xff] }
 0x35e   :  { %1705 = vst.msk [vmem:[#allocation3 + $0x168] sm:$0xff] %vm1519_vm4, %v1683_v14  ;;  %v2277_v14 = vld [vmem:[#allocation3 + $0x88] sm:$0xff] }
 0x35f   :  { %2943 = vmatmul.msk.f32.gmra.mxu3 %vm227_vm2, %v4330_v47  ;;  %2963 = vmatmul.msk.f32.gmra.mxu0 %vm227_vm2, %v4330_v47 }
 0x360   :  { %2983 = vmatmul.msk.f32.gmra.mxu1 %vm227_vm2, %v4330_v47  ;;  %3003 = vmatmul.msk.f32.gmra.mxu2 %vm227_vm2, %v4330_v47 }
 0x362   :  { %v1510_v15 = vpop.f32.mrf.mxu3  ;;  %v2272_v46 = vld [vmem:[#allocation3 + $0x60] sm:$0xff] }
 0x363   :  { %1533 = vst.msk [vmem:[#allocation3 + $0x68] sm:$0xff] %vm1519_vm4, %v1510_v15  ;;  %v1769_v16 = vpop.f32.mrf.mxu2 }
 0x364   :  { %1791 = vst.msk [vmem:[#allocation3 + $0x1e8] sm:$0xff] %vm1519_vm4, %v1769_v16  ;;  %v1600_v60 = vpop.f32.mrf.mxu0  ;;  %v2289_v32 = vld [vmem:[#allocation3 + $0xe8] sm:$0xff]  ;;  %v2263_v16 = vld [vmem:[#allocation3 + $0x18] sm:$0xff] }
 0x365   :  { %1620 = vst.msk [vmem:[#allocation3 + $0xf0] sm:$0xff] %vm1519_vm4, %v1600_v60  ;;  %v1686_v18 = vpop.f32.mrf.mxu1 }
 0x366   :  { %1706 = vst.msk [vmem:[#allocation3 + $0x170] sm:$0xff] %vm1519_vm4, %v1686_v18  ;;  %v2276_v18 = vld [vmem:[#allocation3 + $0x80] sm:$0xff] }
 0x367   :  { %2944 = vmatmul.msk.f32.gmra.mxu3 %vm227_vm2, %v4341_v42  ;;  %2964 = vmatmul.msk.f32.gmra.mxu0 %vm227_vm2, %v4341_v42 }
 0x368   :  { %2984 = vmatmul.msk.f32.gmra.mxu1 %vm227_vm2, %v4341_v42  ;;  %3004 = vmatmul.msk.f32.gmra.mxu2 %vm227_vm2, %v4341_v42 }
 0x36a   :  { %v1513_v12 = vpop.f32.mrf.mxu3 }
 0x36b   :  { %1534 = vst.msk [vmem:[#allocation3 + $0x70] sm:$0xff] %vm1519_vm4, %v1513_v12  ;;  %v1772_v20 = vpop.f32.mrf.mxu2  ;;  %v2225_v12 = vld [vmem:[%s4809_s7 + $0x8] sm:$0xff] }
 0x36c   :  { %1792 = vst.msk [vmem:[#allocation3 + $0x1f0] sm:$0xff] %vm1519_vm4, %v1772_v20  ;;  %v1603_v21 = vpop.f32.mrf.mxu0  ;;  %v2290_v31 = vld [vmem:[#allocation3 + $0xf0] sm:$0xff] }
 0x36d   :  { %1621 = vst.msk [vmem:[#allocation3 + $0xf8] sm:$0xff] %vm1519_vm4, %v1603_v21  ;;  %v1689_v22 = vpop.f32.mrf.mxu1  ;;  %v2262_v21 = vld [vmem:[#allocation3 + $0x10] sm:$0xff] }
 0x36e   :  { %1707 = vst.msk [vmem:[#allocation3 + $0x178] sm:$0xff] %vm1519_vm4, %v1689_v22 }
 0x36f   :  { %2945 = vmatmul.msk.f32.gmra.mxu3 %vm227_vm2, %v4351_v2  ;;  %2965 = vmatmul.msk.f32.gmra.mxu0 %vm227_vm2, %v4351_v2 }
 0x370   :  { %2985 = vmatmul.msk.f32.gmra.mxu1 %vm227_vm2, %v4351_v2  ;;  %3005 = vmatmul.msk.f32.gmra.mxu2 %vm227_vm2, %v4351_v2 }
 0x372   :  { %v1516_v23 = vpop.f32.mrf.mxu3  ;;  %v2274_v39 = vld [vmem:[#allocation3 + $0x70] sm:$0xff] }
 0x373   :  { %1535 = vst.msk [vmem:[#allocation3 + $0x78] sm:$0xff] %vm1519_vm4, %v1516_v23  ;;  %v1775_v24 = vpop.f32.mrf.mxu2  ;;  %v2322_v23 = vld [vmem:[#allocation3 + $0x1f0] sm:$0xff] }
 0x374   :  { %1793 = vst.msk [vmem:[#allocation3 + $0x1f8] sm:$0xff] %vm1519_vm4, %v1775_v24  ;;  %v1902_v26 = vpop.f32.mrf.mxu0  ;;  %v2291_v27 = vld [vmem:[#allocation3 + $0xf8] sm:$0xff]  ;;  %v2261_v24 = vld [vmem:[#allocation3 + $0x8] sm:$0xff] }
 0x375   :  { %1950 = vst.msk [vmem:[#allocation3 + $0x280] sm:$0xff] %vm1519_vm4, %v1902_v26  ;;  %v1988_v29 = vpop.f32.mrf.mxu1  ;;  %2457 = vmatpush.msra.mxu1 %v2291_v27  ;;  %v2321_v26 = vld [vmem:[#allocation3 + $0x1e8] sm:$0xff]  ;;  %v2224_v27 = vld [vmem:[%s4809_s7] sm:$0xff] }
 0x376   :  { %2036 = vst.msk [vmem:[#allocation3 + $0x300] sm:$0xff] %vm1519_vm4, %v1988_v29  ;;  %v2260_v29 = vld [vmem:[#allocation3] sm:$0xff] }
 0x377   :  { %3010 = vmatmul.msk.f32.vlgmr.msrb.gmra.mxu3 %vm227_vm2, %v4139_v33  ;;  %2458 = vmatpush.msra.mxu1 %v2290_v31  ;;  %v2273_v33 = vld [vmem:[#allocation3 + $0x68] sm:$0xff] }
 0x379   :  { %2459 = vmatpush.msra.mxu1 %v2289_v32  ;;  %v2320_v32 = vld [vmem:[#allocation3 + $0x1e0] sm:$0xff] }
 0x37a   :  { %v1816_v34 = vpop.f32.mrf.mxu3  ;;  %v2275_v36 = vld [vmem:[#allocation3 + $0x78] sm:$0xff] }
 0x37b   :  { %1864 = vst.msk [vmem:[#allocation3 + $0x200] sm:$0xff] %vm1519_vm4, %v1816_v34  ;;  %v2074_v38 = vpop.f32.mrf.mxu2  ;;  %2428 = vmatpush.msra.mxu0 %v2275_v36  ;;  %2460 = vmatpush.msra.mxu1 %v2288_v37  ;;  %v2323_v20 = vld [vmem:[#allocation3 + $0x1f8] sm:$0xff] }
 0x37c   :  { %2122 = vst.msk [vmem:[#allocation3 + $0x380] sm:$0xff] %vm1519_vm4, %v2074_v38  ;;  %v1905_v35 = vpop.f32.mrf.mxu0  ;;  %v2307_v36 = vld [vmem:[#allocation3 + $0x178] sm:$0xff] }
 0x37d   :  { %1951 = vst.msk [vmem:[#allocation3 + $0x288] sm:$0xff] %vm1519_vm4, %v1905_v35  ;;  %v1991_v41 = vpop.f32.mrf.mxu1  ;;  %2429 = vmatpush.msra.mxu0 %v2274_v39  ;;  %2461 = vmatpush.msra.mxu1 %v2287_v40  ;;  %v2319_v38 = vld [vmem:[#allocation3 + $0x1d8] sm:$0xff]  ;;  %v2306_v39 = vld [vmem:[#allocation3 + $0x170] sm:$0xff] }
 0x37e   :  { %2037 = vst.msk [vmem:[#allocation3 + $0x308] sm:$0xff] %vm1519_vm4, %v1991_v41  ;;  %v2318_v40 = vld [vmem:[#allocation3 + $0x1d0] sm:$0xff]  ;;  %v2305_v41 = vld [vmem:[#allocation3 + $0x168] sm:$0xff] }
 0x37f   :  { %3011 = vmatmul.msk.f32.gmra.mxu3 %vm227_vm2, %v4150_v59  ;;  %2430 = vmatpush.msra.mxu0 %v2273_v33  ;;  %v2317_v33 = vld [vmem:[#allocation3 + $0x1c8] sm:$0xff] }
 0x380   :  { %2462 = vmatpush.msra.mxu1 %v2286_v43  ;;  %v2233_v43 = vld [vmem:[%s4809_s7 + $0x48] sm:$0xff] }
 0x381   :  { %2431 = vmatpush.msra.mxu0 %v2272_v46  ;;  %v2304_v46 = vld [vmem:[#allocation3 + $0x160] sm:$0xff] }
 0x382   :  { %2463 = vmatpush.msra.mxu1 %v2285_v48  ;;  %v1819_v49 = vpop.f32.mrf.mxu3 }
 0x383   :  { %1865 = vst.msk [vmem:[#allocation3 + $0x208] sm:$0xff] %vm1519_vm4, %v1819_v49  ;;  %v2077_v51 = vpop.f32.mrf.mxu2  ;;  %2432 = vmatpush.msra.mxu0 %v2271_v50  ;;  %v2316_v49 = vld [vmem:[#allocation3 + $0x1c0] sm:$0xff] }
 0x384   :  { %2123 = vst.msk [vmem:[#allocation3 + $0x388] sm:$0xff] %vm1519_vm4, %v2077_v51  ;;  %2464 = vmatpush.msra.mxu1 %v2284_v52  ;;  %v1908_v53 = vpop.f32.mrf.mxu0  ;;  %v2303_v51 = vld [vmem:[#allocation3 + $0x158] sm:$0xff] }
 0x385   :  { %1952 = vst.msk [vmem:[#allocation3 + $0x290] sm:$0xff] %vm1519_vm4, %v1908_v53  ;;  %v1994_v59 = vpop.f32.mrf.mxu1  ;;  %2433 = vmatpush.msra.mxu0 %v2270_v55  ;;  %v2315_v53 = vld [vmem:[#allocation3 + $0x1b8] sm:$0xff] }
 0x386   :  { %2038 = vst.msk [vmem:[#allocation3 + $0x310] sm:$0xff] %vm1519_vm4, %v1994_v59  ;;  %2465 = vmatpush.msra.mxu1 %v2283_v56  ;;  %v2302_v59 = vld [vmem:[#allocation3 + $0x150] sm:$0xff] }
 0x387   :  { %3012 = vmatmul.msk.f32.gmra.mxu3 %vm227_vm2, %v4161_v19  ;;  %2434 = vmatpush.msra.mxu0 %v2269_v58  ;;  %v2314_v56 = vld [vmem:[#allocation3 + $0x1b0] sm:$0xff]  ;;  %v2301_v58 = vld [vmem:[#allocation3 + $0x148] sm:$0xff] }
 0x388   :  { %2466 = vmatpush.msra.mxu1 %v2282_v61  ;;  %v2313_v61 = vld [vmem:[#allocation3 + $0x1a8] sm:$0xff] }
 0x389   :  { %2435 = vmatpush.msra.mxu0 %v2268_v62  ;;  %v2242_v62 = vld [vmem:[%s4809_s7 + $0x90] sm:$0xff] }
 0x38a   :  { %2467 = vmatpush.msra.mxu1 %v2281_v0  ;;  %v1822_v44 = vpop.f32.mrf.mxu3  ;;  %v2300_v0 = vld [vmem:[#allocation3 + $0x140] sm:$0xff] }
 0x38b   :  { %1866 = vst.msk [vmem:[#allocation3 + $0x210] sm:$0xff] %vm1519_vm4, %v1822_v44  ;;  %v2080_v5 = vpop.f32.mrf.mxu2  ;;  %2436 = vmatpush.msra.mxu0 %v2267_v3  ;;  %v2312_v3 = vld [vmem:[#allocation3 + $0x1a0] sm:$0xff] }
 0x38c   :  { %2124 = vst.msk [vmem:[#allocation3 + $0x390] sm:$0xff] %vm1519_vm4, %v2080_v5  ;;  %2468 = vmatpush.msra.mxu1 %v2280_v6  ;;  %v1911_v7 = vpop.f32.mrf.mxu0  ;;  %v2299_v6 = vld [vmem:[#allocation3 + $0x138] sm:$0xff] }
 0x38d   :  { %1953 = vst.msk [vmem:[#allocation3 + $0x298] sm:$0xff] %vm1519_vm4, %v1911_v7  ;;  %v1997_v19 = vpop.f32.mrf.mxu1  ;;  %2437 = vmatpush.msra.mxu0 %v2266_v8  ;;  %v2311_v8 = vld [vmem:[#allocation3 + $0x198] sm:$0xff] }
 0x38e   :  { %2039 = vst.msk [vmem:[#allocation3 + $0x318] sm:$0xff] %vm1519_vm4, %v1997_v19  ;;  %2469 = vmatpush.msra.mxu1 %v2279_v30  ;;  %v2298_v30 = vld [vmem:[#allocation3 + $0x130] sm:$0xff] }
 0x38f   :  { %3013 = vmatmul.msk.f32.gmra.mxu3 %vm227_vm2, %v4172_v28  ;;  %2438 = vmatpush.msra.mxu0 %v2265_v9  ;;  %v2310_v9 = vld [vmem:[#allocation3 + $0x190] sm:$0xff] }
 0x390   :  { %2470 = vmatpush.msra.mxu1 %v2278_v10  ;;  %v2297_v10 = vld [vmem:[#allocation3 + $0x128] sm:$0xff] }
 0x391   :  { %2439 = vmatpush.msra.mxu0 %v2264_v13  ;;  %v2309_v13 = vld [vmem:[#allocation3 + $0x188] sm:$0xff] }
 0x392   :  { %2471 = vmatpush.msra.mxu1 %v2277_v14  ;;  %v1825_v15 = vpop.f32.mrf.mxu3  ;;  %v2251_v14 = vld [vmem:[%s4809_s7 + $0xd8] sm:$0xff] }
 0x393   :  { %1867 = vst.msk [vmem:[#allocation3 + $0x218] sm:$0xff] %vm1519_vm4, %v1825_v15  ;;  %v2083_v60 = vpop.f32.mrf.mxu2  ;;  %2440 = vmatpush.msra.mxu0 %v2263_v16  ;;  %v2296_v15 = vld [vmem:[#allocation3 + $0x120] sm:$0xff] }
 0x394   :  { %2125 = vst.msk [vmem:[#allocation3 + $0x398] sm:$0xff] %vm1519_vm4, %v2083_v60  ;;  %2472 = vmatpush.msra.mxu1 %v2276_v18  ;;  %v1914_v28 = vpop.f32.mrf.mxu0  ;;  %v2308_v60 = vld [vmem:[#allocation3 + $0x180] sm:$0xff] }
 0x395   :  { %1954 = vst.msk [vmem:[#allocation3 + $0x2a0] sm:$0xff] %vm1519_vm4, %v1914_v28  ;;  %v2000_v22 = vpop.f32.mrf.mxu1  ;;  %2441 = vmatpush.msra.mxu0 %v2262_v21  ;;  %2473 = vmatmul.f32.vlgmr.msra.gmra.mxu1 %v2225_v12  ;;  %v2295_v12 = vld [vmem:[#allocation3 + $0x118] sm:$0xff]  ;;  %v2294_v21 = vld [vmem:[#allocation3 + $0x110] sm:$0xff] }
 0x396   :  { %2515 = vmatpush.msrb.mxu1 %v2323_v20  ;;  %2040 = vst.msk [vmem:[#allocation3 + $0x320] sm:$0xff] %vm1519_vm4, %v2000_v22  ;;  %v2293_v22 = vld [vmem:[#allocation3 + $0x108] sm:$0xff] }
 0x397   :  { %3014 = vmatmul.msk.f32.gmra.mxu3 %vm227_vm2, %v4183_v45  ;;  %2442 = vmatpush.msra.mxu0 %v2261_v24  ;;  %v2234_v45 = vld [vmem:[%s4809_s7 + $0x50] sm:$0xff]  ;;  %v2292_v24 = vld [vmem:[#allocation3 + $0x100] sm:$0xff] }
 0x398   :  { %2516 = vmatpush.msrb.mxu1 %v2322_v23  ;;  %v2226_v23 = vld [vmem:[%s4809_s7 + $0x10] sm:$0xff] }
 0x399   :  { %2443 = vmatpush.msra.mxu0 %v2260_v29  ;;  %v2236_v29 = vld [vmem:[%s4809_s7 + $0x60] sm:$0xff] }
 0x39a   :  { %2517 = vmatpush.msrb.mxu1 %v2321_v26  ;;  %v1828_v31 = vpop.f32.mrf.mxu3  ;;  %2444 = vmatmul.f32.vlgmr.msra.gmra.mxu0 %v2224_v27 }
 0x39b   :  { %1868 = vst.msk [vmem:[#allocation3 + $0x220] sm:$0xff] %vm1519_vm4, %v1828_v31  ;;  %v2086_v34 = vpop.f32.mrf.mxu2  ;;  %2486 = vmatpush.msrb.mxu0 %v2307_v36 }
 0x39c   :  { %2518 = vmatpush.msrb.mxu1 %v2320_v32  ;;  %2126 = vst.msk [vmem:[#allocation3 + $0x3a0] sm:$0xff] %vm1519_vm4, %v2086_v34  ;;  %v1917_v37 = vpop.f32.mrf.mxu0  ;;  %v2235_v32 = vld [vmem:[%s4809_s7 + $0x58] sm:$0xff] }
 0x39d   :  { %1955 = vst.msk [vmem:[#allocation3 + $0x2a8] sm:$0xff] %vm1519_vm4, %v1917_v37  ;;  %v2003_v35 = vpop.f32.mrf.mxu1  ;;  %2487 = vmatpush.msrb.mxu0 %v2306_v39  ;;  %2476 = vmatmul.f32.gmra.mxu1 %v2234_v45  ;;  %v2245_v45 = vld [vmem:[%s4809_s7 + $0xa8] sm:$0xff] }
 0x39e   :  { %2519 = vmatpush.msrb.mxu1 %v2319_v38  ;;  %2041 = vst.msk [vmem:[#allocation3 + $0x328] sm:$0xff] %vm1519_vm4, %v2003_v35 }
 0x39f   :  { %3015 = vmatmul.msk.f32.gmra.mxu3 %vm227_vm2, %v4194_v54  ;;  %2488 = vmatpush.msrb.mxu0 %v2305_v41  ;;  %v2243_v54 = vld [vmem:[%s4809_s7 + $0x98] sm:$0xff] }
 0x3a0   :  { %2520 = vmatpush.msrb.mxu1 %v2318_v40  ;;  %v2254_v40 = vld [vmem:[%s4809_s7 + $0xf0] sm:$0xff] }
 0x3a1   :  { %2489 = vmatpush.msrb.mxu0 %v2304_v46 }
 0x3a2   :  { %2521 = vmatpush.msrb.mxu1 %v2317_v33  ;;  %v1831_v48 = vpop.f32.mrf.mxu3  ;;  %2447 = vmatmul.f32.gmra.mxu0 %v2233_v43 }
 0x3a3   :  { %1869 = vst.msk [vmem:[#allocation3 + $0x228] sm:$0xff] %vm1519_vm4, %v1831_v48  ;;  %v2089_v50 = vpop.f32.mrf.mxu2  ;;  %2490 = vmatpush.msrb.mxu0 %v2303_v51 }
 0x3a4   :  { %2522 = vmatpush.msrb.mxu1 %v2316_v49  ;;  %2127 = vst.msk [vmem:[#allocation3 + $0x3a8] sm:$0xff] %vm1519_vm4, %v2089_v50  ;;  %v1920_v52 = vpop.f32.mrf.mxu0 }
 0x3a5   :  { %1956 = vst.msk [vmem:[#allocation3 + $0x2b0] sm:$0xff] %vm1519_vm4, %v1920_v52  ;;  %v2006_v55 = vpop.f32.mrf.mxu1  ;;  %2491 = vmatpush.msrb.mxu0 %v2302_v59  ;;  %2479 = vmatmul.f32.gmra.mxu1 %v2243_v54 }
 0x3a6   :  { %2523 = vmatpush.msrb.mxu1 %v2315_v53  ;;  %2042 = vst.msk [vmem:[#allocation3 + $0x330] sm:$0xff] %vm1519_vm4, %v2006_v55 }
 0x3a7   :  { %3016 = vmatmul.msk.f32.gmra.mxu3 %vm227_vm2, %v4205_v57  ;;  %2492 = vmatpush.msrb.mxu0 %v2301_v58  ;;  %v2252_v57 = vld [vmem:[%s4809_s7 + $0xe0] sm:$0xff] }
 0x3a8   :  { %2524 = vmatpush.msrb.mxu1 %v2314_v56 }
 0x3a9   :  { %2493 = vmatpush.msrb.mxu0 %v2300_v0 }
 0x3aa   :  { %2525 = vmatpush.msrb.mxu1 %v2313_v61  ;;  %v1834_v44 = vpop.f32.mrf.mxu3  ;;  %2450 = vmatmul.f32.gmra.mxu0 %v2242_v62 }
 0x3ab   :  { %1870 = vst.msk [vmem:[#allocation3 + $0x230] sm:$0xff] %vm1519_vm4, %v1834_v44  ;;  %v2092_v5 = vpop.f32.mrf.mxu2  ;;  %2494 = vmatpush.msrb.mxu0 %v2299_v6 }
 0x3ac   :  { %2526 = vmatpush.msrb.mxu1 %v2312_v3  ;;  %2128 = vst.msk [vmem:[#allocation3 + $0x3b0] sm:$0xff] %vm1519_vm4, %v2092_v5  ;;  %v1923_v7 = vpop.f32.mrf.mxu0 }
 0x3ad   :  { %1957 = vst.msk [vmem:[#allocation3 + $0x2b8] sm:$0xff] %vm1519_vm4, %v1923_v7  ;;  %v2009_v19 = vpop.f32.mrf.mxu1  ;;  %2495 = vmatpush.msrb.mxu0 %v2298_v30  ;;  %2482 = vmatmul.f32.gmra.mxu1 %v2252_v57 }
 0x3ae   :  { %2527 = vmatpush.msrb.mxu1 %v2311_v8  ;;  %2043 = vst.msk [vmem:[#allocation3 + $0x338] sm:$0xff] %vm1519_vm4, %v2009_v19 }
 0x3af   :  { %3017 = vmatmul.msk.f32.gmra.mxu3 %vm227_vm2, %v4216_v17  ;;  %2496 = vmatpush.msrb.mxu0 %v2297_v10  ;;  %v2227_v17 = vld [vmem:[%s4809_s7 + $0x18] sm:$0xff] }
 0x3b0   :  { %2528 = vmatpush.msrb.mxu1 %v2310_v9 }
 0x3b1   :  { %2497 = vmatpush.msrb.mxu0 %v2296_v15 }
 0x3b2   :  { %2529 = vmatpush.msrb.mxu1 %v2309_v13  ;;  %v1837_v16 = vpop.f32.mrf.mxu3  ;;  %2453 = vmatmul.f32.gmra.mxu0 %v2251_v14 }
 0x3b3   :  { %1871 = vst.msk [vmem:[#allocation3 + $0x238] sm:$0xff] %vm1519_vm4, %v1837_v16  ;;  %v2095_v18 = vpop.f32.mrf.mxu2  ;;  %2498 = vmatpush.msrb.mxu0 %v2295_v12 }
 0x3b4   :  { %2530 = vmatpush.msrb.mxu1 %v2308_v60  ;;  %2129 = vst.msk [vmem:[#allocation3 + $0x3b8] sm:$0xff] %vm1519_vm4, %v2095_v18  ;;  %v1926_v28 = vpop.f32.mrf.mxu0 }
 0x3b5   :  { %1958 = vst.msk [vmem:[#allocation3 + $0x2c0] sm:$0xff] %vm1519_vm4, %v1926_v28  ;;  %v2012_v20 = vpop.f32.mrf.mxu1  ;;  %2499 = vmatpush.msrb.mxu0 %v2294_v21  ;;  %2531 = vmatmul.f32.vlgmr.msrb.gmra.mxu1 %v2227_v17 }
 0x3b6   :  { %2044 = vst.msk [vmem:[#allocation3 + $0x340] sm:$0xff] %vm1519_vm4, %v2012_v20 }
 0x3b7   :  { %3018 = vmatmul.msk.f32.gmra.mxu3 %vm227_vm2, %v4227_v63  ;;  %2500 = vmatpush.msrb.mxu0 %v2293_v22 }
 0x3b9   :  { %2501 = vmatpush.msrb.mxu0 %v2292_v24 }
 0x3ba   :  { %v1840_v26 = vpop.f32.mrf.mxu3  ;;  %2502 = vmatmul.f32.vlgmr.msrb.gmra.mxu0 %v2226_v23 }
 0x3bb   :  { %1872 = vst.msk [vmem:[#allocation3 + $0x240] sm:$0xff] %vm1519_vm4, %v1840_v26  ;;  %v2098_v27 = vpop.f32.mrf.mxu2 }
 0x3bc   :  { %2130 = vst.msk [vmem:[#allocation3 + $0x3c0] sm:$0xff] %vm1519_vm4, %v2098_v27  ;;  %v1929_v31 = vpop.f32.mrf.mxu0  ;;  %v2348_v22 = vld [vmem:[#allocation3 + $0x2c0] sm:$0xff]  ;;  %v2347_v27 = vld [vmem:[#allocation3 + $0x2b8] sm:$0xff] }
 0x3bd   :  { %1959 = vst.msk [vmem:[#allocation3 + $0x2c8] sm:$0xff] %vm1519_vm4, %v1929_v31  ;;  %v2015_v63 = vpop.f32.mrf.mxu1  ;;  %2534 = vmatmul.f32.gmra.mxu1 %v2236_v29  ;;  %v2364_v23 = vld [vmem:[#allocation3 + $0x340] sm:$0xff]  ;;  %v2363_v29 = vld [vmem:[#allocation3 + $0x338] sm:$0xff] }
 0x3be   :  { %2045 = vst.msk [vmem:[#allocation3 + $0x348] sm:$0xff] %vm1519_vm4, %v2015_v63 }
 0x3bf   :  { %3019 = vmatmul.msk.f32.gmra.mxu3 %vm227_vm2, %v4241_v1  ;;  %v2244_v1 = vld [vmem:[%s4809_s7 + $0xa0] sm:$0xff] }
 0x3c2   :  { %v1843_v34 = vpop.f32.mrf.mxu3  ;;  %2505 = vmatmul.f32.gmra.mxu0 %v2235_v32  ;;  %v2346_v32 = vld [vmem:[#allocation3 + $0x2b0] sm:$0xff] }
 0x3c3   :  { %1873 = vst.msk [vmem:[#allocation3 + $0x248] sm:$0xff] %vm1519_vm4, %v1843_v34  ;;  %v2101_v36 = vpop.f32.mrf.mxu2  ;;  %v2362_v34 = vld [vmem:[#allocation3 + $0x330] sm:$0xff] }
 0x3c4   :  { %2131 = vst.msk [vmem:[#allocation3 + $0x3c8] sm:$0xff] %vm1519_vm4, %v2101_v36  ;;  %v1932_v37 = vpop.f32.mrf.mxu0  ;;  %v2349_v12 = vld [vmem:[#allocation3 + $0x2c8] sm:$0xff] }
 0x3c5   :  { %1960 = vst.msk [vmem:[#allocation3 + $0x2d0] sm:$0xff] %vm1519_vm4, %v1932_v37  ;;  %v2018_v38 = vpop.f32.mrf.mxu1  ;;  %2537 = vmatmul.f32.gmra.mxu1 %v2245_v45  ;;  %v2365_v17 = vld [vmem:[#allocation3 + $0x348] sm:$0xff]  ;;  %v2332_v45 = vld [vmem:[#allocation3 + $0x240] sm:$0xff] }
 0x3c6   :  { %2046 = vst.msk [vmem:[#allocation3 + $0x350] sm:$0xff] %vm1519_vm4, %v2018_v38  ;;  %v2345_v37 = vld [vmem:[#allocation3 + $0x2a8] sm:$0xff] }
 0x3c7   :  { %3020 = vmatmul.msk.f32.gmra.mxu3 %vm227_vm2, %v4252_v4  ;;  %v2253_v4 = vld [vmem:[%s4809_s7 + $0xe8] sm:$0xff] }
 0x3c8   :  { %v2361_v38 = vld [vmem:[#allocation3 + $0x328] sm:$0xff] }
 0x3ca   :  { %v1846_v35 = vpop.f32.mrf.mxu3  ;;  %2508 = vmatmul.f32.gmra.mxu0 %v2244_v1  ;;  %v2333_v63 = vld [vmem:[#allocation3 + $0x248] sm:$0xff]  ;;  %v2380_v1 = vld [vmem:[#allocation3 + $0x3c0] sm:$0xff] }
 0x3cb   :  { %1874 = vst.msk [vmem:[#allocation3 + $0x250] sm:$0xff] %vm1519_vm4, %v1846_v35  ;;  %v2104_v39 = vpop.f32.mrf.mxu2  ;;  %v2381_v36 = vld [vmem:[#allocation3 + $0x3c8] sm:$0xff] }
 0x3cc   :  { %2132 = vst.msk [vmem:[#allocation3 + $0x3d0] sm:$0xff] %vm1519_vm4, %v2104_v39  ;;  %v1935_v41 = vpop.f32.mrf.mxu0  ;;  %v2350_v15 = vld [vmem:[#allocation3 + $0x2d0] sm:$0xff]  ;;  %v2331_v39 = vld [vmem:[#allocation3 + $0x238] sm:$0xff] }
 0x3cd   :  { %1961 = vst.msk [vmem:[#allocation3 + $0x2d8] sm:$0xff] %vm1519_vm4, %v1935_v41  ;;  %v2021_v33 = vpop.f32.mrf.mxu1  ;;  %2540 = vmatmul.f32.gmra.mxu1 %v2254_v40  ;;  %v2366_v16 = vld [vmem:[#allocation3 + $0x350] sm:$0xff]  ;;  %v2344_v40 = vld [vmem:[#allocation3 + $0x2a0] sm:$0xff] }
 0x3ce   :  { %2047 = vst.msk [vmem:[#allocation3 + $0x358] sm:$0xff] %vm1519_vm4, %v2021_v33  ;;  %v2360_v41 = vld [vmem:[#allocation3 + $0x320] sm:$0xff]  ;;  %v2379_v33 = vld [vmem:[#allocation3 + $0x3b8] sm:$0xff] }
 0x3cf   :  { %3021 = vmatmul.msk.f32.gmra.mxu3 %vm227_vm2, %v4263_v11 }
 0x3d2   :  { %v1849_v43 = vpop.f32.mrf.mxu3  ;;  %2511 = vmatmul.f32.gmra.mxu0 %v2253_v4  ;;  %v2334_v26 = vld [vmem:[#allocation3 + $0x250] sm:$0xff] }
 0x3d3   :  { %1875 = vst.msk [vmem:[#allocation3 + $0x258] sm:$0xff] %vm1519_vm4, %v1849_v43  ;;  %v2107_v46 = vpop.f32.mrf.mxu2  ;;  %v2382_v31 = vld [vmem:[#allocation3 + $0x3d0] sm:$0xff]  ;;  %v2343_v43 = vld [vmem:[#allocation3 + $0x298] sm:$0xff] }
 0x3d4   :  { %2133 = vst.msk [vmem:[#allocation3 + $0x3d8] sm:$0xff] %vm1519_vm4, %v2107_v46  ;;  %v1938_v48 = vpop.f32.mrf.mxu0  ;;  %v2351_v9 = vld [vmem:[#allocation3 + $0x2d8] sm:$0xff]  ;;  %v2330_v4 = vld [vmem:[#allocation3 + $0x230] sm:$0xff] }
 0x3d5   :  { %1962 = vst.msk [vmem:[#allocation3 + $0x2e0] sm:$0xff] %vm1519_vm4, %v1938_v48  ;;  %v2024_v49 = vpop.f32.mrf.mxu1  ;;  %v2367_v10 = vld [vmem:[#allocation3 + $0x358] sm:$0xff]  ;;  %v2378_v48 = vld [vmem:[#allocation3 + $0x3b0] sm:$0xff] }
 0x3d6   :  { %2048 = vst.msk [vmem:[#allocation3 + $0x360] sm:$0xff] %vm1519_vm4, %v2024_v49  ;;  %v2359_v46 = vld [vmem:[#allocation3 + $0x318] sm:$0xff]  ;;  %v2329_v49 = vld [vmem:[#allocation3 + $0x228] sm:$0xff] }
 0x3d7   :  { %3022 = vmatmul.msk.f32.gmra.mxu3 %vm227_vm2, %v4304_v25 }
 0x3da   :  { %v1852_v11 = vpop.f32.mrf.mxu3  ;;  %v2335_v21 = vld [vmem:[#allocation3 + $0x258] sm:$0xff] }
 0x3db   :  { %1876 = vst.msk [vmem:[#allocation3 + $0x260] sm:$0xff] %vm1519_vm4, %v1852_v11  ;;  %v2110_v50 = vpop.f32.mrf.mxu2  ;;  %v2383_v24 = vld [vmem:[#allocation3 + $0x3d8] sm:$0xff]  ;;  %v2342_v11 = vld [vmem:[#allocation3 + $0x290] sm:$0xff] }
 0x3dc   :  { %2134 = vst.msk [vmem:[#allocation3 + $0x3e0] sm:$0xff] %vm1519_vm4, %v2110_v50  ;;  %v1941_v51 = vpop.f32.mrf.mxu0  ;;  %v2352_v7 = vld [vmem:[#allocation3 + $0x2e0] sm:$0xff]  ;;  %v2358_v50 = vld [vmem:[#allocation3 + $0x310] sm:$0xff] }
 0x3dd   :  { %1963 = vst.msk [vmem:[#allocation3 + $0x2e8] sm:$0xff] %vm1519_vm4, %v1941_v51  ;;  %v2027_v54 = vpop.f32.mrf.mxu1  ;;  %v2368_v8 = vld [vmem:[#allocation3 + $0x360] sm:$0xff]  ;;  %v2377_v51 = vld [vmem:[#allocation3 + $0x3a8] sm:$0xff] }
 0x3de   :  { %2049 = vst.msk [vmem:[#allocation3 + $0x368] sm:$0xff] %vm1519_vm4, %v2027_v54  ;;  %v2328_v54 = vld [vmem:[#allocation3 + $0x220] sm:$0xff] }
 0x3df   :  { %3023 = vmatmul.msk.f32.gmra.mxu3 %vm227_vm2, %v4330_v47 }
 0x3e2   :  { %v1855_v52 = vpop.f32.mrf.mxu3  ;;  %v2336_v18 = vld [vmem:[#allocation3 + $0x260] sm:$0xff] }
 0x3e3   :  { %1877 = vst.msk [vmem:[#allocation3 + $0x268] sm:$0xff] %vm1519_vm4, %v1855_v52  ;;  %v2113_v53 = vpop.f32.mrf.mxu2  ;;  %v2384_v28 = vld [vmem:[#allocation3 + $0x3e0] sm:$0xff]  ;;  %v2341_v52 = vld [vmem:[#allocation3 + $0x288] sm:$0xff] }
 0x3e4   :  { %2135 = vst.msk [vmem:[#allocation3 + $0x3e8] sm:$0xff] %vm1519_vm4, %v2113_v53  ;;  %v1944_v25 = vpop.f32.mrf.mxu0  ;;  %v2353_v5 = vld [vmem:[#allocation3 + $0x2e8] sm:$0xff] }
 0x3e5   :  { %1964 = vst.msk [vmem:[#allocation3 + $0x2f0] sm:$0xff] %vm1519_vm4, %v1944_v25  ;;  %v2030_v55 = vpop.f32.mrf.mxu1  ;;  %v2369_v6 = vld [vmem:[#allocation3 + $0x368] sm:$0xff]  ;;  %v2376_v25 = vld [vmem:[#allocation3 + $0x3a0] sm:$0xff] }
 0x3e6   :  { %2050 = vst.msk [vmem:[#allocation3 + $0x370] sm:$0xff] %vm1519_vm4, %v2030_v55  ;;  %v2357_v53 = vld [vmem:[#allocation3 + $0x308] sm:$0xff] }
 0x3e7   :  { %3024 = vmatmul.msk.f32.gmra.mxu3 %vm227_vm2, %v4341_v42 }
 0x3ea   :  { %v1858_v59 = vpop.f32.mrf.mxu3  ;;  %v2337_v14 = vld [vmem:[#allocation3 + $0x268] sm:$0xff] }
 0x3eb   :  { %1878 = vst.msk [vmem:[#allocation3 + $0x270] sm:$0xff] %vm1519_vm4, %v1858_v59  ;;  %v2116_v56 = vpop.f32.mrf.mxu2  ;;  %v2385_v60 = vld [vmem:[#allocation3 + $0x3e8] sm:$0xff]  ;;  %v2327_v59 = vld [vmem:[#allocation3 + $0x218] sm:$0xff] }
 0x3ec   :  { %2136 = vst.msk [vmem:[#allocation3 + $0x3f0] sm:$0xff] %vm1519_vm4, %v2116_v56  ;;  %v1947_v47 = vpop.f32.mrf.mxu0  ;;  %v2354_v44 = vld [vmem:[#allocation3 + $0x2f0] sm:$0xff]  ;;  %v2340_v56 = vld [vmem:[#allocation3 + $0x280] sm:$0xff] }
 0x3ed   :  { %1965 = vst.msk [vmem:[#allocation3 + $0x2f8] sm:$0xff] %vm1519_vm4, %v1947_v47  ;;  %v2033_v58 = vpop.f32.mrf.mxu1  ;;  %v2370_v3 = vld [vmem:[#allocation3 + $0x370] sm:$0xff] }
 0x3ee   :  { %2051 = vst.msk [vmem:[#allocation3 + $0x378] sm:$0xff] %vm1519_vm4, %v2033_v58  ;;  %v2230_v47 = vld [vmem:[%s4809_s7 + $0x30] sm:$0xff]  ;;  %v2356_v58 = vld [vmem:[#allocation3 + $0x300] sm:$0xff] }
 0x3ef   :  { %3025 = vmatmul.msk.f32.gmra.mxu3 %vm227_vm2, %v4351_v2 }
 0x3f2   :  { %v1861_v61 = vpop.f32.mrf.mxu3  ;;  %v2338_v30 = vld [vmem:[#allocation3 + $0x270] sm:$0xff] }
 0x3f3   :  { %1879 = vst.msk [vmem:[#allocation3 + $0x278] sm:$0xff] %vm1519_vm4, %v1861_v61  ;;  %v2119_v62 = vpop.f32.mrf.mxu2  ;;  %v2386_v13 = vld [vmem:[#allocation3 + $0x3f0] sm:$0xff]  ;;  %v2375_v61 = vld [vmem:[#allocation3 + $0x398] sm:$0xff] }
 0x3f4   :  { %2137 = vst.msk [vmem:[#allocation3 + $0x3f8] sm:$0xff] %vm1519_vm4, %v2119_v62  ;;  %v2355_v42 = vld [vmem:[#allocation3 + $0x2f8] sm:$0xff]  ;;  %v2229_v62 = vld [vmem:[%s4809_s7 + $0x28] sm:$0xff] }
 0x3f5   :  { %2573 = vmatpush.msra.mxu1 %v2355_v42  ;;  %v2371_v0 = vld [vmem:[#allocation3 + $0x378] sm:$0xff]  ;;  %v2326_v42 = vld [vmem:[#allocation3 + $0x210] sm:$0xff] }
 0x3f6   :  { %2602 = vmatpush.msra.mxu2 %v2371_v0  ;;  %v2374_v0 = vld [vmem:[#allocation3 + $0x390] sm:$0xff] }
 0x3f7   :  { %2574 = vmatpush.msra.mxu1 %v2354_v44  ;;  %v2325_v44 = vld [vmem:[#allocation3 + $0x208] sm:$0xff] }
 0x3f8   :  { %2603 = vmatpush.msra.mxu2 %v2370_v3  ;;  %v2373_v3 = vld [vmem:[#allocation3 + $0x388] sm:$0xff] }
 0x3f9   :  { %2575 = vmatpush.msra.mxu1 %v2353_v5  ;;  %v2228_v5 = vld [vmem:[%s4809_s7 + $0x20] sm:$0xff] }
 0x3fa   :  { %2604 = vmatpush.msra.mxu2 %v2369_v6  ;;  %v2160_v57 = vpop.f32.mrf.mxu3  ;;  %v2339_v2 = vld [vmem:[#allocation3 + $0x278] sm:$0xff]  ;;  %v2324_v6 = vld [vmem:[#allocation3 + $0x200] sm:$0xff] }
 0x3fb   :  { %2208 = vst.msk [vmem:[#allocation3 + $0x400] sm:$0xff] %vm1519_vm4, %v2160_v57  ;;  %2544 = vmatpush.msra.mxu0 %v2339_v2  ;;  %2576 = vmatpush.msra.mxu1 %v2352_v7  ;;  %v2387_v19 = vld [vmem:[#allocation3 + $0x3f8] sm:$0xff]  ;;  %v2372_v2 = vld [vmem:[#allocation3 + $0x380] sm:$0xff] }
 0x3fc   :  { %2605 = vmatpush.msra.mxu2 %v2368_v8  ;;  %2631 = vmatpush.msra.mxu3 %v2387_v19  ;;  %v2231_v57 = vld [vmem:[%s4809_s7 + $0x38] sm:$0xff]  ;;  %v2238_v19 = vld [vmem:[%s4809_s7 + $0x70] sm:$0xff] }
 0x3fd   :  { %2545 = vmatpush.msra.mxu0 %v2338_v30  ;;  %2577 = vmatpush.msra.mxu1 %v2351_v9  ;;  %v2239_v8 = vld [vmem:[%s4809_s7 + $0x78] sm:$0xff]  ;;  %v2237_v30 = vld [vmem:[%s4809_s7 + $0x68] sm:$0xff]  ;;  %v2240_v9 = vld [vmem:[%s4809_s7 + $0x80] sm:$0xff] }
 0x3fe   :  { %2606 = vmatpush.msra.mxu2 %v2367_v10  ;;  %2632 = vmatpush.msra.mxu3 %v2386_v13  ;;  %v2248_v13 = vld [vmem:[%s4809_s7 + $0xc0] sm:$0xff] }
 0x3ff   :  { %2546 = vmatpush.msra.mxu0 %v2337_v14  ;;  %2578 = vmatpush.msra.mxu1 %v2350_v15  ;;  %v2247_v14 = vld [vmem:[%s4809_s7 + $0xb8] sm:$0xff]  ;;  %v2246_v15 = vld [vmem:[%s4809_s7 + $0xb0] sm:$0xff] }
 0x400   :  { %2607 = vmatpush.msra.mxu2 %v2366_v16  ;;  %2633 = vmatpush.msra.mxu3 %v2385_v60  ;;  %v2249_v16 = vld [vmem:[%s4809_s7 + $0xc8] sm:$0xff] }
 0x401   :  { %2547 = vmatpush.msra.mxu0 %v2336_v18  ;;  %2579 = vmatpush.msra.mxu1 %v2349_v12  ;;  %v2257_v18 = vld [vmem:[%s4809_s7 + $0x108] sm:$0xff]  ;;  %v2256_v12 = vld [vmem:[%s4809_s7 + $0x100] sm:$0xff] }
 0x402   :  { %2608 = vmatpush.msra.mxu2 %v2365_v17  ;;  %2634 = vmatpush.msra.mxu3 %v2384_v28  ;;  %v2163_v20 = vpop.f32.mrf.mxu3  ;;  %v2255_v17 = vld [vmem:[%s4809_s7 + $0xf8] sm:$0xff]  ;;  %v2258_v28 = vld [vmem:[%s4809_s7 + $0x110] sm:$0xff] }
 0x403   :  { %2209 = vst.msk [vmem:[#allocation3 + $0x408] sm:$0xff] %vm1519_vm4, %v2163_v20  ;;  %2548 = vmatpush.msra.mxu0 %v2335_v21  ;;  %2580 = vmatpush.msra.mxu1 %v2348_v22 }
 0x404   :  { %2609 = vmatpush.msra.mxu2 %v2364_v23  ;;  %2635 = vmatpush.msra.mxu3 %v2383_v24 }
 0x405   :  { %2549 = vmatpush.msra.mxu0 %v2334_v26  ;;  %2581 = vmatpush.msra.mxu1 %v2347_v27 }
 0x406   :  { %2610 = vmatpush.msra.mxu2 %v2363_v29  ;;  %2636 = vmatpush.msra.mxu3 %v2382_v31 }
 0x407   :  { %2550 = vmatpush.msra.mxu0 %v2333_v63  ;;  %2582 = vmatpush.msra.mxu1 %v2346_v32 }
 0x408   :  { %2611 = vmatpush.msra.mxu2 %v2362_v34  ;;  %2637 = vmatpush.msra.mxu3 %v2381_v36 }
 0x409   :  { %2551 = vmatpush.msra.mxu0 %v2332_v45  ;;  %2583 = vmatpush.msra.mxu1 %v2345_v37 }
 0x40a   :  { %2612 = vmatpush.msra.mxu2 %v2361_v38  ;;  %2638 = vmatpush.msra.mxu3 %v2380_v1  ;;  %v2166_v35 = vpop.f32.mrf.mxu3 }
 0x40b   :  { %2210 = vst.msk [vmem:[#allocation3 + $0x410] sm:$0xff] %vm1519_vm4, %v2166_v35  ;;  %2552 = vmatpush.msra.mxu0 %v2331_v39  ;;  %2584 = vmatpush.msra.mxu1 %v2344_v40 }
 0x40c   :  { %2613 = vmatpush.msra.mxu2 %v2360_v41  ;;  %2639 = vmatpush.msra.mxu3 %v2379_v33 }
 0x40d   :  { %2553 = vmatpush.msra.mxu0 %v2330_v4  ;;  %2585 = vmatpush.msra.mxu1 %v2343_v43  ;;  %v2389_v43 = vld [vmem:[#allocation3 + $0x408] sm:$0xff] }
 0x40e   :  { %2614 = vmatpush.msra.mxu2 %v2359_v46  ;;  %2640 = vmatpush.msra.mxu3 %v2378_v48  ;;  %v2232_v46 = vld [vmem:[%s4809_s7 + $0x40] sm:$0xff] }
 0x40f   :  { %2554 = vmatpush.msra.mxu0 %v2329_v49  ;;  %2586 = vmatpush.msra.mxu1 %v2342_v11  ;;  %v2388_v48 = vld [vmem:[#allocation3 + $0x400] sm:$0xff]  ;;  %v2241_v49 = vld [vmem:[%s4809_s7 + $0x88] sm:$0xff] }
 0x410   :  { %2615 = vmatpush.msra.mxu2 %v2358_v50  ;;  %2641 = vmatpush.msra.mxu3 %v2377_v51  ;;  %v2250_v50 = vld [vmem:[%s4809_s7 + $0xd0] sm:$0xff] }
 0x411   :  { %2555 = vmatpush.msra.mxu0 %v2328_v54  ;;  %2587 = vmatpush.msra.mxu1 %v2341_v52  ;;  %v2259_v54 = vld [vmem:[%s4809_s7 + $0x118] sm:$0xff] }
 0x412   :  { %2616 = vmatpush.msra.mxu2 %v2357_v53  ;;  %2642 = vmatpush.msra.mxu3 %v2376_v25  ;;  %v2169_v55 = vpop.f32.mrf.mxu3  ;;  %v2390_v4 = vld [vmem:[#allocation3 + $0x410] sm:$0xff]  ;;  %v2474_v52 = vpop.f32.mrf.mxu1 }
 0x413   :  { %2211 = vst.msk [vmem:[#allocation3 + $0x418] sm:$0xff] %vm1519_vm4, %v2169_v55  ;;  %2556 = vmatpush.msra.mxu0 %v2327_v59  ;;  %2588 = vmatpush.msra.mxu1 %v2340_v56 }
 0x414   :  { %2617 = vmatpush.msra.mxu2 %v2356_v58  ;;  %2643 = vmatpush.msra.mxu3 %v2375_v61 }
 0x415   :  { %2557 = vmatpush.msra.mxu0 %v2326_v42  ;;  %2618 = vmatmul.f32.vlgmr.msra.gmra.mxu2 %v2230_v47 }
 0x416   :  { %2644 = vmatpush.msra.mxu3 %v2374_v0  ;;  %2589 = vmatmul.f32.vlgmr.msra.gmra.mxu1 %v2229_v62 }
 0x417   :  { %2558 = vmatpush.msra.mxu0 %v2325_v44  ;;  %v2445_v11 = vpop.f32.mrf.mxu0 }
 0x418   :  { %2645 = vmatpush.msra.mxu3 %v2373_v3 }
 0x419   :  { %2559 = vmatpush.msra.mxu0 %v2324_v6  ;;  %v2411_v6 = vpop.permute.xlu0 %2410 }
 0x41a   :  { %2646 = vmatpush.msra.mxu3 %v2372_v2  ;;  %v2172_v7 = vpop.f32.mrf.mxu3  ;;  %2560 = vmatmul.f32.vlgmr.msra.gmra.mxu0 %v2228_v5  ;;  %v2391_v33 = vld [vmem:[#allocation3 + $0x418] sm:$0xff]  ;;  %v2477_v25 = vpop.f32.mrf.mxu1  ;;  %v2446_v2 = vadd.f32 %v2445_v11, %v2411_v6 }
 0x41b   :  { %2212 = vst.msk [vmem:[#allocation3 + $0x420] sm:$0xff] %vm1519_vm4, %v2172_v7  ;;  %2647 = vmatmul.f32.vlgmr.msra.gmra.mxu3 %v2231_v57 }
 0x41c   :  { %v2475_v7 = vadd.f32 %v2474_v52, %v2446_v2 }
 0x41d   :  { %2621 = vmatmul.f32.gmra.mxu2 %v2239_v8  ;;  %v2416_v8 = vpop.permute.xlu1 %2415 }
 0x41e   :  { %2592 = vmatmul.f32.gmra.mxu1 %v2238_v19 }
 0x41f   :  { %v2448_v51 = vpop.f32.mrf.mxu0 }
 0x422   :  { %v2175_v10 = vpop.f32.mrf.mxu3  ;;  %2563 = vmatmul.f32.gmra.mxu0 %v2237_v30  ;;  %v2392_v41 = vld [vmem:[#allocation3 + $0x420] sm:$0xff]  ;;  %v2480_v59 = vpop.f32.mrf.mxu1 }
 0x423   :  { %2213 = vst.msk [vmem:[#allocation3 + $0x428] sm:$0xff] %vm1519_vm4, %v2175_v10  ;;  %2650 = vmatmul.f32.gmra.mxu3 %v2240_v9  ;;  %v2449_v10 = vadd.f32 %v2448_v51, %v2416_v8 }
 0x425   :  { %2624 = vmatmul.f32.gmra.mxu2 %v2248_v13 }
 0x426   :  { %2595 = vmatmul.f32.gmra.mxu1 %v2247_v14 }
 0x427   :  { %v2451_v53 = vpop.f32.mrf.mxu0 }
 0x42a   :  { %v2178_v60 = vpop.f32.mrf.mxu3  ;;  %2566 = vmatmul.f32.gmra.mxu0 %v2246_v15  ;;  %v2393_v40 = vld [vmem:[#allocation3 + $0x428] sm:$0xff]  ;;  %v2483_v47 = vpop.f32.mrf.mxu1  ;;  %v2478_v15 = vadd.f32 %v2477_v25, %v2449_v10 }
 0x42b   :  { %2214 = vst.msk [vmem:[#allocation3 + $0x430] sm:$0xff] %vm1519_vm4, %v2178_v60  ;;  %2653 = vmatmul.f32.gmra.mxu3 %v2249_v16 }
 0x42d   :  { %2627 = vmatmul.f32.gmra.mxu2 %v2257_v18  ;;  %v2421_v18 = vpop.permute.xlu2 %2420 }
 0x42e   :  { %2598 = vmatmul.f32.gmra.mxu1 %v2256_v12 }
 0x42f   :  { %v2454_v55 = vpop.f32.mrf.mxu0 }
 0x432   :  { %v2181_v20 = vpop.f32.mrf.mxu3  ;;  %2569 = vmatmul.f32.gmra.mxu0 %v2255_v17  ;;  %v2394_v39 = vld [vmem:[#allocation3 + $0x430] sm:$0xff]  ;;  %v2532_v61 = vpop.f32.mrf.mxu1  ;;  %v2452_v17 = vadd.f32 %v2451_v53, %v2421_v18 }
 0x433   :  { %2215 = vst.msk [vmem:[#allocation3 + $0x438] sm:$0xff] %vm1519_vm4, %v2181_v20  ;;  %2656 = vmatmul.f32.gmra.mxu3 %v2258_v28 }
 0x437   :  { %v2503_v56 = vpop.f32.mrf.mxu0 }
 0x438   :  { %v2504_v19 = vadd.f32 %v2503_v56, %v2475_v7 }
 0x43a   :  { %v2184_v21 = vpop.f32.mrf.mxu3  ;;  %v2395_v35 = vld [vmem:[#allocation3 + $0x438] sm:$0xff]  ;;  %v2535_v42 = vpop.f32.mrf.mxu1  ;;  %v2533_v13 = vadd.f32 %v2532_v61, %v2504_v19 }
 0x43b   :  { %2216 = vst.msk [vmem:[#allocation3 + $0x440] sm:$0xff] %vm1519_vm4, %v2184_v21 }
 0x43f   :  { %v2506_v58 = vpop.f32.mrf.mxu0 }
 0x440   :  { %v2507_v60 = vadd.f32 %v2506_v58, %v2478_v15 }
 0x442   :  { %v2187_v22 = vpop.f32.mrf.mxu3  ;;  %v2396_v1 = vld [vmem:[#allocation3 + $0x440] sm:$0xff]  ;;  %v2538_v3 = vpop.f32.mrf.mxu1 }
 0x443   :  { %2217 = vst.msk [vmem:[#allocation3 + $0x448] sm:$0xff] %vm1519_vm4, %v2187_v22  ;;  %v2536_v22 = vadd.f32 %v2535_v42, %v2507_v60 }
 0x447   :  { %v2509_v62 = vpop.f32.mrf.mxu0 }
 0x44a   :  { %v2190_v23 = vpop.f32.mrf.mxu3  ;;  %v2397_v38 = vld [vmem:[#allocation3 + $0x448] sm:$0xff]  ;;  %v2541_v57 = vpop.f32.mrf.mxu1 }
 0x44b   :  { %2218 = vst.msk [vmem:[#allocation3 + $0x450] sm:$0xff] %vm1519_vm4, %v2190_v23  ;;  %v2481_v23 = vadd.f32 %v2480_v59, %v2452_v17 }
 0x44f   :  { %v2512_v0 = vpop.f32.mrf.mxu0 }
 0x452   :  { %v2193_v24 = vpop.f32.mrf.mxu3  ;;  %v2398_v37 = vld [vmem:[#allocation3 + $0x450] sm:$0xff] }
 0x453   :  { %2219 = vst.msk [vmem:[#allocation3 + $0x458] sm:$0xff] %vm1519_vm4, %v2193_v24 }
 0x45a   :  { %v2196_v26 = vpop.f32.mrf.mxu3  ;;  %v2399_v45 = vld [vmem:[#allocation3 + $0x458] sm:$0xff] }
 0x45b   :  { %2220 = vst.msk [vmem:[#allocation3 + $0x460] sm:$0xff] %vm1519_vm4, %v2196_v26 }
 0x462   :  { %v2199_v27 = vpop.f32.mrf.mxu3  ;;  %v2400_v36 = vld [vmem:[#allocation3 + $0x460] sm:$0xff] }
 0x463   :  { %2221 = vst.msk [vmem:[#allocation3 + $0x468] sm:$0xff] %vm1519_vm4, %v2199_v27 }
 0x46a   :  { %v2202_v29 = vpop.f32.mrf.mxu3  ;;  %v2401_v34 = vld [vmem:[#allocation3 + $0x468] sm:$0xff] }
 0x46b   :  { %2222 = vst.msk [vmem:[#allocation3 + $0x470] sm:$0xff] %vm1519_vm4, %v2202_v29  ;;  %v2510_v29 = vadd.f32 %v2509_v62, %v2481_v23 }
 0x472   :  { %v2205_v31 = vpop.f32.mrf.mxu3  ;;  %v2402_v32 = vld [vmem:[#allocation3 + $0x470] sm:$0xff] }
 0x473   :  { %2223 = vst.msk [vmem:[#allocation3 + $0x478] sm:$0xff] %vm1519_vm4, %v2205_v31  ;;  %v2426_v31 = vpop.permute.xlu0 %2425 }
 0x47a   :  { %v2403_v63 = vld [vmem:[#allocation3 + $0x478] sm:$0xff] }
 0x47b   :  { %2660 = vmatpush.msrb.mxu0 %v2403_v63  ;;  %v2455_v63 = vadd.f32 %v2454_v55, %v2426_v31 }
 0x47d   :  { %2661 = vmatpush.msrb.mxu0 %v2402_v32 }
 0x47f   :  { %2662 = vmatpush.msrb.mxu0 %v2401_v34 }
 0x481   :  { %2663 = vmatpush.msrb.mxu0 %v2400_v36 }
 0x483   :  { %2664 = vmatpush.msrb.mxu0 %v2399_v45 }
 0x485   :  { %2665 = vmatpush.msrb.mxu0 %v2398_v37  ;;  %v2539_v37 = vadd.f32 %v2538_v3, %v2510_v29 }
 0x487   :  { %2666 = vmatpush.msrb.mxu0 %v2397_v38 }
 0x489   :  { %2667 = vmatpush.msrb.mxu0 %v2396_v1 }
 0x48b   :  { %2668 = vmatpush.msrb.mxu0 %v2395_v35  ;;  %v2484_v35 = vadd.f32 %v2483_v47, %v2455_v63 }
 0x48d   :  { %2669 = vmatpush.msrb.mxu0 %v2394_v39 }
 0x48f   :  { %2670 = vmatpush.msrb.mxu0 %v2393_v40 }
 0x491   :  { %2671 = vmatpush.msrb.mxu0 %v2392_v41  ;;  %v2513_v41 = vadd.f32 %v2512_v0, %v2484_v35 }
 0x493   :  { %2672 = vmatpush.msrb.mxu0 %v2391_v33  ;;  %v2590_v30 = vpop.f32.mrf.mxu1 }
 0x495   :  { %2673 = vmatpush.msrb.mxu0 %v2390_v4 }
 0x497   :  { %2674 = vmatpush.msrb.mxu0 %v2389_v43  ;;  %v2561_v44 = vpop.f32.mrf.mxu0 }
 0x498   :  { %v2619_v14 = vpop.f32.mrf.mxu2  ;;  %v2562_v16 = vadd.f32 %v2561_v44, %v2533_v13 }
 0x499   :  { %2675 = vmatpush.msrb.mxu0 %v2388_v48  ;;  %v2542_v48 = vadd.f32 %v2541_v57, %v2513_v41 }
 0x49a   :  { %2676 = vmatmul.f32.vlgmr.msrb.gmra.mxu0 %v2232_v46  ;;  %v2591_v28 = vadd.f32 %v2590_v30, %v2562_v16 }
 0x49b   :  { %v2593_v20 = vpop.f32.mrf.mxu1 }
 0x49c   :  { %v2620_v24 = vadd.f32 %v2619_v14, %v2591_v28 }
 0x49e   :  { %v2648_v12 = vpop.f32.mrf.mxu3 }
 0x49f   :  { %v2564_v5 = vpop.f32.mrf.mxu0  ;;  %v2649_v32 = vadd.f32 %v2648_v12, %v2620_v24 }
 0x4a0   :  { %v2565_v26 = vadd.f32 %v2564_v5, %v2536_v22  ;;  %v2622_v27 = vpop.f32.mrf.mxu2 }
 0x4a2   :  { %2679 = vmatmul.f32.gmra.mxu0 %v2241_v49  ;;  %v2594_v34 = vadd.f32 %v2593_v20, %v2565_v26 }
 0x4a3   :  { %v2596_v1 = vpop.f32.mrf.mxu1 }
 0x4a4   :  { %v2623_v39 = vadd.f32 %v2622_v27, %v2594_v34 }
 0x4a6   :  { %v2651_v36 = vpop.f32.mrf.mxu3 }
 0x4a7   :  { %v2567_v9 = vpop.f32.mrf.mxu0  ;;  %v2652_v4 = vadd.f32 %v2651_v36, %v2623_v39 }
 0x4a8   :  { %v2568_v40 = vadd.f32 %v2567_v9, %v2539_v37  ;;  %v2625_v33 = vpop.f32.mrf.mxu2 }
 0x4aa   :  { %2682 = vmatmul.f32.gmra.mxu0 %v2250_v50  ;;  %v2597_v43 = vadd.f32 %v2596_v1, %v2568_v40 }
 0x4ac   :  { %v2626_v50 = vadd.f32 %v2625_v33, %v2597_v43 }
 0x4ae   :  { %v2654_v11 = vpop.f32.mrf.mxu3 }
 0x4af   :  { %v2570_v21 = vpop.f32.mrf.mxu0  ;;  %v2655_v52 = vadd.f32 %v2654_v11, %v2626_v50 }
 0x4b0   :  { %v2571_v51 = vadd.f32 %v2570_v21, %v2542_v48  ;;  %v2628_v25 = vpop.f32.mrf.mxu2 }
 0x4b2   :  { %2685 = vmatmul.f32.gmra.mxu0 %v2259_v54  ;;  %v2599_v54 = vpop.f32.mrf.mxu1 }
 0x4b3   :  { %v2600_v53 = vadd.f32 %v2599_v54, %v2571_v51 }
 0x4b5   :  { %v2629_v56 = vadd.f32 %v2628_v25, %v2600_v53 }
 0x4b6   :  { %v2657_v47 = vpop.f32.mrf.mxu3 }
 0x4b7   :  { %v2658_v58 = vadd.f32 %v2657_v47, %v2629_v56 }
 0x517   :  { %v2677_v45 = vpop.f32.mrf.mxu0 }
 0x518   :  { %v2678_v38 = vadd.f32 %v2677_v45, %v2649_v32 }
 0x51a   :  { %2689 = vst.msk [vmem:[%s4810_s9] sm:$0xff] %vm1519_vm4, %v2678_v38 }
 0x51f   :  { %v2680_v46 = vpop.f32.mrf.mxu0 }
 0x520   :  { %v2681_v49 = vadd.f32 %v2680_v46, %v2652_v4 }
 0x522   :  { %2690 = vst.msk [vmem:[%s4810_s9 + $0x8] sm:$0xff] %vm1519_vm4, %v2681_v49 }
 0x527   :  { %v2683_v55 = vpop.f32.mrf.mxu0 }
 0x528   :  { %v2684_v59 = vadd.f32 %v2683_v55, %v2655_v52 }
 0x52a   :  { %2691 = vst.msk [vmem:[%s4810_s9 + $0x10] sm:$0xff] %vm1519_vm4, %v2684_v59 }
 0x52f   :  { %v2686_v61 = vpop.f32.mrf.mxu0 }
 0x530   :  { %v2687_v62 = vadd.f32 %v2686_v61, %v2658_v58 }
 0x532   :  { %2692 = vst.msk [vmem:[%s4810_s9 + $0x18] sm:$0xff] %vm1519_vm4, %v2687_v62 }

</bundles_post_ra>
